<compile_context>
chip_gen: v5e
topology: v5e:2x2
jax: 0.10.0
libtpu: 0.0.40
codegen_flags: <defaults>
</compile_context>

<pallas_src>
import functools
import re

import jax
import jax.numpy as jnp
from jax.experimental import pallas as pl
from jax.experimental.pallas import tpu as pltpu


# ---------------------------------------------------------------------------
# Kernel
# ---------------------------------------------------------------------------
def attn_prop_kernel(x_ref, src_ref,
                     wq_ref, bq_ref, wk_ref, bk_ref, wv_ref, bv_ref,
                     wm_ref, w1x_ref, w1m_ref, b1_ref, w2_ref, b2_ref,
                     o_ref,
                     k_scr, v_scr, h1_scr,
                     *, num_heads, head_dim, tq, exp_dtype, approx_recip):
    """Grid = (batch, query_tile).

    Per step: project a TQ-wide query tile, attend over the full source (kept
    resident in VMEM scratch), fuse the per-head merge into a lane-dense (TQ, F)
    accumulator, run the first MLP conv into an h1 scratch.  At the last query
    tile of a batch element: exact full-N InstanceNorm, ReLU, final conv, one
    lane-dense (N, F) output store."""
    cdt = x_ref.dtype                       # MXU operand dtype; accumulation is f32
    F = num_heads * head_dim
    qt = pl.program_id(1)

    # Once per batch element: K / V projections of the full source into VMEM
    # scratch (head-major lanes), reused by every query tile.
    @pl.when(qt == 0)
    def _():
        src = src_ref[0]                                                   # (M, F)
        k = jnp.dot(src, wk_ref[...], preferred_element_type=jnp.float32) + bk_ref[...]
        v = jnp.dot(src, wv_ref[...], preferred_element_type=jnp.float32) + bv_ref[...]
        k_scr[...] = k.astype(k_scr.dtype)
        v_scr[...] = v.astype(v_scr.dtype)

    x_t = x_ref[0]                                                         # (TQ, F)
    # wq / bq already carry the 1/sqrt(head_dim) score scale (folded offline).
    q = (jnp.dot(x_t, wq_ref[...], preferred_element_type=jnp.float32)
         + bq_ref[...]).astype(cdt)                                        # (TQ, F)

    dnums = (((1,), (1,)), ((), ()))        # contract head_dim; no materialised .T
    msg = jnp.zeros((tq, F), jnp.float32)   # fused-merge accumulator (lane dense)
    for h in range(num_heads):              # H is small and static
        lo = h * head_dim
        kh = k_scr[:, lo:lo + head_dim]                                    # (M, d)
        vh = v_scr[:, lo:lo + head_dim]                                    # (M, d)
        s = jax.lax.dot_general(q[:, lo:lo + head_dim], kh, dnums,
                                preferred_element_type=jnp.float32)        # (TQ, M)
        # Softmax over source tokens; statistics kept in f32.
        s = s - jnp.max(s, axis=-1, keepdims=True)
        p = jnp.exp(s.astype(exp_dtype))        # bf16 EUP exp on v6e/v7x, f32 on v5e
        denom = jnp.sum(p, axis=-1, keepdims=True, dtype=jnp.float32)
        inv = pl.reciprocal(denom, approx=approx_recip)                    # EUP slot
        out_h = jnp.dot(p.astype(cdt), vh,
                        preferred_element_type=jnp.float32)                # (TQ, d)
        # Fused merge: (normalised head output) @ wm_h accumulated into the full
        # width buffer -> no sub-128-lane stores, no message scratch.
        msg = msg + jnp.dot((out_h * inv).astype(cdt),
                            wm_ref[lo:lo + head_dim, :],
                            preferred_element_type=jnp.float32)            # (TQ, F)

    # MLP conv1: cat([x, message]) @ w1 == x @ w1[:F] + message @ w1[F:]
    # (merge bias bm is folded into b1 via bm @ w1m in prepare_params).
    h1 = (jnp.dot(x_t, w1x_ref[...], preferred_element_type=jnp.float32)
          + jnp.dot(msg.astype(cdt), w1m_ref[...], preferred_element_type=jnp.float32)
          + b1_ref[...])                                                   # (TQ, 2F)
    row0 = pl.multiple_of(qt * tq, tq)
    h1_scr[pl.ds(row0, tq), :] = h1

    # Last query tile of this batch element: exact full-N InstanceNorm stats,
    # ReLU, final conv, single lane-dense store of the whole (N, F) output.
    @pl.when(qt == pl.num_programs(1) - 1)
    def _():
        h1_all = h1_scr[...]                                               # (N, 2F)
        mean = jnp.mean(h1_all, axis=0, keepdims=True)
        var = jnp.mean((h1_all - mean) ** 2, axis=0, keepdims=True)
        h1n = (h1_all - mean) * jax.lax.rsqrt(var + 1e-5)
        h1r = jnp.maximum(h1n, 0.0)
        out = jnp.dot(h1r.astype(cdt), w2_ref[...],
                      preferred_element_type=jnp.float32) + b2_ref[...]
        o_ref[0] = out.astype(o_ref.dtype)


# ---------------------------------------------------------------------------
# One-time parameter preparation (outside the hot path)
# ---------------------------------------------------------------------------
def prepare_params(params, num_heads, compute_dtype=jnp.bfloat16):
    """Conv->matmul transpose, head-major channel permutation, 1/sqrt(d) folded
    into wq/bq, w1 split into x / message halves, merge bias folded into b1,
    MXU-operand dtype cast (bf16 by default for v6e/v7x MXU throughput)."""
    F = params["wq"].shape[0]
    head_dim, rem = divmod(F, num_heads)
    assert rem == 0, "feature_dim must be divisible by num_heads"
    # PyTorch .view(B, d, H, N) maps channel c -> (d_idx, h) with c = d_idx*H + h;
    # reorder projection outputs to head-major c' = h*d + d_idx.
    new_to_old = jnp.array([(c % head_dim) * num_heads + (c // head_dim)
                            for c in range(F)], dtype=jnp.int32)

    def t(w):   # conv1d weight (Cout, Cin, 1) -> (Cin, Cout) so that y = x @ w
        return jnp.transpose(w[:, :, 0], (1, 0))

    cdt = compute_dtype
    scale = 1.0 / (head_dim ** 0.5)
    w1 = t(params["w1"])                   # (2F, 2F); rows [:F] <- x, [F:] <- message
    w1x, w1m = w1[:F, :], w1[F:, :]
    b1_eff = params["b1"] + params["bm"] @ w1m     # fold merge bias through conv1
    return {
        "wq": (t(params["wq"])[:, new_to_old] * scale).astype(cdt),
        "bq": (params["bq"][new_to_old] * scale)[None, :].astype(jnp.float32),
        "wk": t(params["wk"])[:, new_to_old].astype(cdt),
        "bk": params["bk"][new_to_old][None, :].astype(jnp.float32),
        "wv": t(params["wv"])[:, new_to_old].astype(cdt),
        "bv": params["bv"][new_to_old][None, :].astype(jnp.float32),
        "wm": t(params["wm"])[new_to_old, :].astype(cdt),   # input rows head-major
        "w1x": w1x.astype(cdt),
        "w1m": w1m.astype(cdt),
        "b1": b1_eff[None, :].astype(jnp.float32),
        "w2": t(params["w2"]).astype(cdt),
        "b2": params["b2"][None, :].astype(jnp.float32),
    }


# ---------------------------------------------------------------------------
# Wrappers
# ---------------------------------------------------------------------------
def _tpu_generation():
    try:
        kind = jax.devices()[0].device_kind.lower()
        m = re.search(r"(\d+)", kind)
        if m:
            return int(m.group(1))
    except Exception:
        pass
    return 6


def _pick_tq(n_tokens, tpu_gen):
    # v7x has half the VMEM of v5e/v6e -> smaller query tiles there.
    cap = 256 if tpu_gen >= 7 else 512
    if n_tokens <= cap:
        return n_tokens
    for t in range(cap, 7, -8):
        if n_tokens % t == 0:
            return t
    # TODO(synk): pad / mask a ragged final query tile instead of falling back.
    return n_tokens


def attentional_propagation_tokens(x_t, s_t, prepped, num_heads, tq=None):
    """Token-major hot path: x_t (B, N, F), s_t (B, M, F) in the compute dtype.
    Returns (B, N, F) float32."""
    B, N, F = x_t.shape
    M = s_t.shape[1]
    head_dim = F // num_heads
    assert F == num_heads * head_dim, "feature_dim must be divisible by num_heads"
    cdt = prepped["wq"].dtype
    gen = _tpu_generation()

    if tq is None:
        tq = _pick_tq(N, gen)
    assert N % tq == 0 and (tq == N or tq % 8 == 0), (N, tq)
    n_qt = N // tq

    # bf16 exp only where the EUP supports it (v6e / v7x); v5e keeps f32.
    exp_dtype = jnp.bfloat16 if (cdt == jnp.bfloat16 and gen >= 6) else jnp.float32
    # Approximate EUP reciprocal only in the bf16 configuration; the f32 path
    # stays close to PyTorch bit-parity.
    approx_recip = cdt == jnp.bfloat16

    kernel = functools.partial(attn_prop_kernel, num_heads=num_heads,
                               head_dim=head_dim, tq=tq,
                               exp_dtype=exp_dtype, approx_recip=approx_recip)

    itm = jnp.dtype(cdt).itemsize
    exp_itm = jnp.dtype(exp_dtype).itemsize

    # Advisory cost estimate for the XLA scheduler.
    flops = 2 * B * (N * F * F                 # q projection
                     + 2 * M * F * F           # k / v projections
                     + 2 * N * M * F           # scores + prob@v over all heads
                     + N * F * F               # fused per-head merge
                     + 2 * N * F * (2 * F)     # w1x + w1m
                     + N * (2 * F) * F)        # w2
    transcendentals = B * num_heads * N * (M + 1)
    w_bytes = 10 * F * F * itm + 6 * F * 4
    io_bytes = B * (N + M) * F * itm + B * N * F * 4
    cost = pl.CostEstimate(flops=int(flops), transcendentals=int(transcendentals),
                           bytes_accessed=int(w_bytes + io_bytes))

    # Per-step VMEM working set: double-buffered blocks twice, resident scratch
    # once, plus the simultaneously-live in-kernel temporaries.
    per_step = (2 * tq * F * itm               # x tile (double-buffered)
                + 2 * M * F * itm              # source block (double-buffered)
                + 2 * N * F * 4                # output block (double-buffered)
                + 2 * w_bytes                  # weights (conservative: double-buffered)
                + 2 * M * F * itm              # K / V scratch
                + N * 2 * F * 4                # h1 scratch
                + tq * M * (4 + exp_itm + itm) # scores + exp(p) + p cast, live together
                + 6 * tq * F * 4               # q / message / h1-tile temporaries
                + 3 * N * 2 * F * 4)           # finale: normalised h1 / relu temporaries
    default_limit = (16 if gen <= 5 else 32) * 1024 * 1024
    cp_kwargs = dict(dimension_semantics=("parallel", "arbitrary"))
    if per_step > default_limit:
        try:
            cap = int(pltpu.get_tpu_info().vmem_capacity_bytes) * 3 // 4
        except Exception:
            cap = 96 * 1024 * 1024
        cp_kwargs["vmem_limit_bytes"] = int(min(per_step * 5 // 4, cap))

    weight_args = (prepped["wq"], prepped["bq"], prepped["wk"], prepped["bk"],
                   prepped["wv"], prepped["bv"], prepped["wm"],
                   prepped["w1x"], prepped["w1m"], prepped["b1"],
                   prepped["w2"], prepped["b2"])

    def build(single_buffer_weights):
        def wspec(arr):
            if single_buffer_weights:
                # Constant-index blocks are fetched once; one VMEM buffer suffices.
                return pl.BlockSpec(arr.shape, lambda b, qt: (0, 0),
                                    pipeline_mode=pl.Buffered(1))
            return pl.BlockSpec(arr.shape, lambda b, qt: (0, 0))

        return pl.pallas_call(
            kernel,
            out_shape=jax.ShapeDtypeStruct((B, N, F), jnp.float32),
            grid=(B, n_qt),
            in_specs=[pl.BlockSpec((1, tq, F), lambda b, qt: (b, qt, 0)),    # x tile
                      pl.BlockSpec((1, M, F), lambda b, qt: (b, 0, 0))]      # source
                     + [wspec(a) for a in weight_args],
            out_specs=pl.BlockSpec((1, N, F), lambda b, qt: (b, 0, 0)),      # resident
            scratch_shapes=[pltpu.VMEM((M, F), cdt),           # K (head-major lanes)
                            pltpu.VMEM((M, F), cdt),           # V
                            pltpu.VMEM((N, 2 * F), jnp.float32)],  # h1 for InstanceNorm
            compiler_params=pltpu.CompilerParams(**cp_kwargs),
            cost_estimate=cost,
        )

    try:
        return build(True)(x_t, s_t, *weight_args)
    except Exception:
        # pipeline_mode=pl.Buffered(1) unsupported on this jax/backend: fall back
        # to default double-buffered weight blocks (costs ~w_bytes extra VMEM).
        return build(False)(x_t, s_t, *weight_args)


def attentional_propagation(x, source, prepped, num_heads, tq=None):
    """PyTorch-layout interface: x (B, F, N), source (B, F, M) -> (B, F, N) f32.

    TODO(synk): keep activations token-major (B, N, C) across the whole model so
    these boundary transposes (full HBM read+write of x / source / out as
    separate XLA ops) disappear; the kernel itself is already token-major.
    """
    cdt = prepped["wq"].dtype
    x_t = jnp.transpose(x, (0, 2, 1)).astype(cdt)        # (B, N, F)
    s_t = jnp.transpose(source, (0, 2, 1)).astype(cdt)   # (B, M, F)
    out = attentional_propagation_tokens(x_t, s_t, prepped, num_heads, tq=tq)
    return jnp.transpose(out, (0, 2, 1))                 # back to (B, F, N)


# ---------------------------------------------------------------------------
# Pure-JAX reference (mirrors the PyTorch forward exactly) + synthetic params
# ---------------------------------------------------------------------------
def ref_forward(x, source, params, num_heads):
    B, F, N = x.shape
    d = F // num_heads

    def conv1d(z, w, b):
        return jnp.einsum("oi,bin->bon", w[:, :, 0], z) + b[None, :, None]

    q = conv1d(x, params["wq"], params["bq"]).reshape(B, d, num_heads, N)
    k = conv1d(source, params["wk"], params["bk"]).reshape(B, d, num_heads, -1)
    v = conv1d(source, params["wv"], params["bv"]).reshape(B, d, num_heads, -1)
    scores = jnp.einsum("bdhn,bdhm->bhnm", q, k) / (d ** 0.5)
    prob = jax.nn.softmax(scores, axis=-1)
    xh = jnp.einsum("bhnm,bdhm->bdhn", prob, v)
    message = conv1d(xh.reshape(B, d * num_heads, N), params["wm"], params["bm"])
    cat = jnp.concatenate([x, message], axis=1)
    h1 = conv1d(cat, params["w1"], params["b1"])
    mean = jnp.mean(h1, axis=2, keepdims=True)
    var = jnp.mean((h1 - mean) ** 2, axis=2, keepdims=True)
    h1n = (h1 - mean) / jnp.sqrt(var + 1e-5)
    h1r = jnp.maximum(h1n, 0.0)
    return conv1d(h1r, params["w2"], params["b2"])


def init_params(key, feature_dim):
    F = feature_dim
    ks = jax.random.split(key, 12)
    s = lambda fan_in: 1.0 / (fan_in ** 0.5)
    return {
        "wq": jax.random.normal(ks[0], (F, F, 1), jnp.float32) * s(F),
        "bq": jax.random.normal(ks[1], (F,), jnp.float32) * 0.01,
        "wk": jax.random.normal(ks[2], (F, F, 1), jnp.float32) * s(F),
        "bk": jax.random.normal(ks[3], (F,), jnp.float32) * 0.01,
        "wv": jax.random.normal(ks[4], (F, F, 1), jnp.float32) * s(F),
        "bv": jax.random.normal(ks[5], (F,), jnp.float32) * 0.01,
        "wm": jax.random.normal(ks[6], (F, F, 1), jnp.float32) * s(F),
        "bm": jax.random.normal(ks[7], (F,), jnp.float32) * 0.01,
        "w1": jax.random.normal(ks[8], (2 * F, 2 * F, 1), jnp.float32) * s(2 * F),
        "b1": jax.random.normal(ks[9], (2 * F,), jnp.float32) * 0.01,
        "w2": jax.random.normal(ks[10], (F, 2 * F, 1), jnp.float32) * s(2 * F),
        "b2": jnp.zeros((F,), jnp.float32),  # nn.init.constant_(mlp[-1].bias, 0.0)
    }


if __name__ == "__main__":
    feature_dim = 32
    num_heads = 4
    B, N, M = 2, 16, 16

    key = jax.random.PRNGKey(0)
    kx, ks, kp = jax.random.split(key, 3)
    x = jax.random.normal(kx, (B, feature_dim, N), jnp.float32)
    source = jax.random.normal(ks, (B, feature_dim, M), jnp.float32)
    params = init_params(kp, feature_dim)

    ref = ref_forward(x, source, params, num_heads)

    # f32-operand path: tight check against the PyTorch-equivalent reference,
    # both single-tile (tq = N) and multi-tile (tq = 8) query tilings.
    prepped_f32 = prepare_params(params, num_heads, jnp.float32)
    out32 = jax.block_until_ready(
        attentional_propagation(x, source, prepped_f32, num_heads))
    assert out32.shape == (B, feature_dim, N)
    err32 = float(jnp.max(jnp.abs(out32 - ref)))
    assert jnp.allclose(out32, ref, atol=2e-3, rtol=2e-3), err32

    out32t = jax.block_until_ready(
        attentional_propagation(x, source, prepped_f32, num_heads, tq=8))
    errt = float(jnp.max(jnp.abs(out32t - ref)))
    assert jnp.allclose(out32t, ref, atol=2e-3, rtol=2e-3), errt

    # bf16 MXU-operand path (default / performance configuration): softmax and
    # InstanceNorm statistics stay f32 in-kernel, only operand rounding differs.
    prepped_bf16 = prepare_params(params, num_heads)          # bf16 by default
    outbf = jax.block_until_ready(
        attentional_propagation(x, source, prepped_bf16, num_heads))
    errbf = float(jnp.max(jnp.abs(outbf - ref)))
    assert jnp.allclose(outbf, ref, atol=1e-1, rtol=1e-1), errbf

    print("KERNEL_OK")
</pallas_src>

<mosaic_0001>
module attributes {stable_mosaic.version = 11 : i64} {
  func.func @attn_prop_kernel(%arg0: i32, %arg1: i32, %arg2: memref<1x16x32xf32, #tpu.memory_space<vmem>>, %arg3: memref<1x16x32xf32, #tpu.memory_space<vmem>>, %arg4: memref<32x32xf32, #tpu.memory_space<vmem>>, %arg5: memref<1x32xf32, #tpu.memory_space<vmem>>, %arg6: memref<32x32xf32, #tpu.memory_space<vmem>>, %arg7: memref<1x32xf32, #tpu.memory_space<vmem>>, %arg8: memref<32x32xf32, #tpu.memory_space<vmem>>, %arg9: memref<1x32xf32, #tpu.memory_space<vmem>>, %arg10: memref<32x32xf32, #tpu.memory_space<vmem>>, %arg11: memref<32x64xf32, #tpu.memory_space<vmem>>, %arg12: memref<32x64xf32, #tpu.memory_space<vmem>>, %arg13: memref<1x64xf32, #tpu.memory_space<vmem>>, %arg14: memref<64x32xf32, #tpu.memory_space<vmem>>, %arg15: memref<1x32xf32, #tpu.memory_space<vmem>>, %arg16: memref<1x16x32xf32, #tpu.memory_space<vmem>>, %arg17: memref<16x32xf32, #tpu.memory_space<vmem>>, %arg18: memref<16x32xf32, #tpu.memory_space<vmem>>, %arg19: memref<16x64xf32, #tpu.memory_space<vmem>>) attributes {dimension_semantics = [#tpu.dimension_semantics<parallel>, #tpu.dimension_semantics<arbitrary>], iteration_bounds = array<i64: 2, 1>, scalar_prefetch = 0 : i64, scratch_operands = 3 : i64, tpu.core_type = #tpu.core_type<tc>, window_params = [{transform_indices = @transform_0, window_bounds = array<i64: 1, 16, 32>}, {transform_indices = @transform_1, window_bounds = array<i64: 1, 16, 32>}, {pipeline_mode = #tpu.pipeline_mode<synchronous>, transform_indices = @transform_2, window_bounds = array<i64: 32, 32>}, {pipeline_mode = #tpu.pipeline_mode<synchronous>, transform_indices = @transform_3, window_bounds = array<i64: 1, 32>}, {pipeline_mode = #tpu.pipeline_mode<synchronous>, transform_indices = @transform_4, window_bounds = array<i64: 32, 32>}, {pipeline_mode = #tpu.pipeline_mode<synchronous>, transform_indices = @transform_5, window_bounds = array<i64: 1, 32>}, {pipeline_mode = #tpu.pipeline_mode<synchronous>, transform_indices = @transform_6, window_bounds = array<i64: 32, 32>}, {pipeline_mode = #tpu.pipeline_mode<synchronous>, transform_indices = @transform_7, window_bounds = array<i64: 1, 32>}, {pipeline_mode = #tpu.pipeline_mode<synchronous>, transform_indices = @transform_8, window_bounds = array<i64: 32, 32>}, {pipeline_mode = #tpu.pipeline_mode<synchronous>, transform_indices = @transform_9, window_bounds = array<i64: 32, 64>}, {pipeline_mode = #tpu.pipeline_mode<synchronous>, transform_indices = @transform_10, window_bounds = array<i64: 32, 64>}, {pipeline_mode = #tpu.pipeline_mode<synchronous>, transform_indices = @transform_11, window_bounds = array<i64: 1, 64>}, {pipeline_mode = #tpu.pipeline_mode<synchronous>, transform_indices = @transform_12, window_bounds = array<i64: 64, 32>}, {pipeline_mode = #tpu.pipeline_mode<synchronous>, transform_indices = @transform_13, window_bounds = array<i64: 1, 32>}, {transform_indices = @transform_14, window_bounds = array<i64: 1, 16, 32>}]} {
    %c0_i32 = arith.constant 0 : i32
    %0 = arith.cmpi eq, %arg1, %c0_i32 : i32
    %1 = arith.extui %0 : i1 to i32
    %c0_i32_0 = arith.constant 0 : i32
    %2 = arith.cmpi ne, %1, %c0_i32_0 : i32
    scf.if %2 {
      %c0_60 = arith.constant 0 : index
      %c0_61 = arith.constant 0 : index
      %c0_62 = arith.constant 0 : index
      %98 = vector.load %arg3[%c0_60, %c0_61, %c0_62] : memref<1x16x32xf32, #tpu.memory_space<vmem>>, vector<1x16x32xf32>
      %99 = vector.shape_cast %98 : vector<1x16x32xf32> to vector<16x32xf32>
      %c0_63 = arith.constant 0 : index
      %c0_64 = arith.constant 0 : index
      %100 = vector.load %arg6[%c0_63, %c0_64] : memref<32x32xf32, #tpu.memory_space<vmem>>, vector<32x32xf32>
      %cst_65 = arith.constant dense<0.000000e+00> : vector<16x32xf32>
      %101 = tpu.matmul %99, %100, %cst_65 {dimension_numbers = #tpu.dot_dimension_numbers<[1], [0], [0], [1], [0, 0, 1, 1], [], []>} : vector<16x32xf32>, vector<32x32xf32>, vector<16x32xf32> -> vector<16x32xf32>
      %c0_66 = arith.constant 0 : index
      %c0_67 = arith.constant 0 : index
      %102 = vector.load %arg7[%c0_66, %c0_67] : memref<1x32xf32, #tpu.memory_space<vmem>>, vector<1x32xf32>
      %103 = vector.broadcast %102 : vector<1x32xf32> to vector<16x32xf32>
      %104 = arith.addf %101, %103 : vector<16x32xf32>
      %c0_68 = arith.constant 0 : index
      %c0_69 = arith.constant 0 : index
      %105 = vector.load %arg8[%c0_68, %c0_69] : memref<32x32xf32, #tpu.memory_space<vmem>>, vector<32x32xf32>
      %cst_70 = arith.constant dense<0.000000e+00> : vector<16x32xf32>
      %106 = tpu.matmul %99, %105, %cst_70 {dimension_numbers = #tpu.dot_dimension_numbers<[1], [0], [0], [1], [0, 0, 1, 1], [], []>} : vector<16x32xf32>, vector<32x32xf32>, vector<16x32xf32> -> vector<16x32xf32>
      %c0_71 = arith.constant 0 : index
      %c0_72 = arith.constant 0 : index
      %107 = vector.load %arg9[%c0_71, %c0_72] : memref<1x32xf32, #tpu.memory_space<vmem>>, vector<1x32xf32>
      %108 = vector.broadcast %107 : vector<1x32xf32> to vector<16x32xf32>
      %109 = arith.addf %106, %108 : vector<16x32xf32>
      %c0_73 = arith.constant 0 : index
      %c0_74 = arith.constant 0 : index
      %110 = vector.load %arg17[%c0_73, %c0_74] : memref<16x32xf32, #tpu.memory_space<vmem>>, vector<16x32xf32>
      tpu.vector_store %arg17[%c0_73, %c0_74], %104 {strides = array<i32>} : memref<16x32xf32, #tpu.memory_space<vmem>>, vector<16x32xf32>,
      %c0_75 = arith.constant 0 : index
      %c0_76 = arith.constant 0 : index
      %111 = vector.load %arg18[%c0_75, %c0_76] : memref<16x32xf32, #tpu.memory_space<vmem>>, vector<16x32xf32>
      tpu.vector_store %arg18[%c0_75, %c0_76], %109 {strides = array<i32>} : memref<16x32xf32, #tpu.memory_space<vmem>>, vector<16x32xf32>,
    } else {
    }
    %c0 = arith.constant 0 : index
    %c0_1 = arith.constant 0 : index
    %c0_2 = arith.constant 0 : index
    %3 = vector.load %arg2[%c0, %c0_1, %c0_2] : memref<1x16x32xf32, #tpu.memory_space<vmem>>, vector<1x16x32xf32>
    %4 = vector.shape_cast %3 : vector<1x16x32xf32> to vector<16x32xf32>
    %c0_3 = arith.constant 0 : index
    %c0_4 = arith.constant 0 : index
    %5 = vector.load %arg4[%c0_3, %c0_4] : memref<32x32xf32, #tpu.memory_space<vmem>>, vector<32x32xf32>
    %cst = arith.constant dense<0.000000e+00> : vector<16x32xf32>
    %6 = tpu.matmul %4, %5, %cst {dimension_numbers = #tpu.dot_dimension_numbers<[1], [0], [0], [1], [0, 0, 1, 1], [], []>} : vector<16x32xf32>, vector<32x32xf32>, vector<16x32xf32> -> vector<16x32xf32>
    %c0_5 = arith.constant 0 : index
    %c0_6 = arith.constant 0 : index
    %7 = vector.load %arg5[%c0_5, %c0_6] : memref<1x32xf32, #tpu.memory_space<vmem>>, vector<1x32xf32>
    %8 = vector.broadcast %7 : vector<1x32xf32> to vector<16x32xf32>
    %9 = arith.addf %6, %8 : vector<16x32xf32>
    %cst_7 = arith.constant 0.000000e+00 : f32
    %10 = vector.broadcast %cst_7 : f32 to vector<16x32xf32>
    %c0_8 = arith.constant 0 : index
    %c0_9 = arith.constant 0 : index
    %11 = vector.load %arg17[%c0_8, %c0_9] : memref<16x32xf32, #tpu.memory_space<vmem>>, vector<16x8xf32>
    %c0_10 = arith.constant 0 : index
    %c0_11 = arith.constant 0 : index
    %12 = vector.load %arg18[%c0_10, %c0_11] : memref<16x32xf32, #tpu.memory_space<vmem>>, vector<16x8xf32>
    %13 = vector.extract_strided_slice %9 {offsets = [0, 0], sizes = [16, 8], strides = [1, 1]} : vector<16x32xf32> to vector<16x8xf32>
    %cst_12 = arith.constant dense<0.000000e+00> : vector<16x16xf32>
    %14 = tpu.matmul %13, %11, %cst_12 {dimension_numbers = #tpu.dot_dimension_numbers<[1], [1], [0], [0], [0, 0, 1, 0], [], []>} : vector<16x8xf32>, vector<16x8xf32>, vector<16x16xf32> -> vector<16x16xf32>
    %cst_13 = arith.constant dense<0xFF800000> : vector<16xf32>
    %15 = vector.multi_reduction <maximumf>, %14, %cst_13 [1] : vector<16x16xf32> to vector<16xf32>
    %16 = vector.shape_cast %15 : vector<16xf32> to vector<16x1xf32>
    %17 = vector.broadcast %16 : vector<16x1xf32> to vector<16x16xf32>
    %18 = arith.subf %14, %17 : vector<16x16xf32>
    %19 = math.exp %18 : vector<16x16xf32>
    %cst_14 = arith.constant dense<0.000000e+00> : vector<16xf32>
    %20 = vector.multi_reduction <add>, %19, %cst_14 [1] : vector<16x16xf32> to vector<16xf32>
    %21 = vector.shape_cast %20 : vector<16xf32> to vector<16x1xf32>
    %22 = tpu.reciprocal %21 : vector<16x1xf32> -> vector<16x1xf32>
    %cst_15 = arith.constant dense<0.000000e+00> : vector<16x8xf32>
    %23 = tpu.matmul %19, %12, %cst_15 {dimension_numbers = #tpu.dot_dimension_numbers<[1], [0], [0], [1], [0, 0, 1, 1], [], []>} : vector<16x16xf32>, vector<16x8xf32>, vector<16x8xf32> -> vector<16x8xf32>
    %24 = vector.broadcast %22 : vector<16x1xf32> to vector<16x8xf32>
    %25 = arith.mulf %23, %24 : vector<16x8xf32>
    %c0_16 = arith.constant 0 : index
    %c0_17 = arith.constant 0 : index
    %26 = vector.load %arg10[%c0_16, %c0_17] : memref<32x32xf32, #tpu.memory_space<vmem>>, vector<8x32xf32>
    %cst_18 = arith.constant dense<0.000000e+00> : vector<16x32xf32>
    %27 = tpu.matmul %25, %26, %cst_18 {dimension_numbers = #tpu.dot_dimension_numbers<[1], [0], [0], [1], [0, 0, 1, 1], [], []>} : vector<16x8xf32>, vector<8x32xf32>, vector<16x32xf32> -> vector<16x32xf32>
    %28 = arith.addf %10, %27 : vector<16x32xf32>
    %c0_19 = arith.constant 0 : index
    %c8 = arith.constant 8 : index
    %29 = vector.load %arg17[%c0_19, %c8] : memref<16x32xf32, #tpu.memory_space<vmem>>, vector<16x8xf32>
    %c0_20 = arith.constant 0 : index
    %c8_21 = arith.constant 8 : index
    %30 = vector.load %arg18[%c0_20, %c8_21] : memref<16x32xf32, #tpu.memory_space<vmem>>, vector<16x8xf32>
    %31 = vector.extract_strided_slice %9 {offsets = [0, 8], sizes = [16, 8], strides = [1, 1]} : vector<16x32xf32> to vector<16x8xf32>
    %cst_22 = arith.constant dense<0.000000e+00> : vector<16x16xf32>
    %32 = tpu.matmul %31, %29, %cst_22 {dimension_numbers = #tpu.dot_dimension_numbers<[1], [1], [0], [0], [0, 0, 1, 0], [], []>} : vector<16x8xf32>, vector<16x8xf32>, vector<16x16xf32> -> vector<16x16xf32>
    %cst_23 = arith.constant dense<0xFF800000> : vector<16xf32>
    %33 = vector.multi_reduction <maximumf>, %32, %cst_23 [1] : vector<16x16xf32> to vector<16xf32>
    %34 = vector.shape_cast %33 : vector<16xf32> to vector<16x1xf32>
    %35 = vector.broadcast %34 : vector<16x1xf32> to vector<16x16xf32>
    %36 = arith.subf %32, %35 : vector<16x16xf32>
    %37 = math.exp %36 : vector<16x16xf32>
    %cst_24 = arith.constant dense<0.000000e+00> : vector<16xf32>
    %38 = vector.multi_reduction <add>, %37, %cst_24 [1] : vector<16x16xf32> to vector<16xf32>
    %39 = vector.shape_cast %38 : vector<16xf32> to vector<16x1xf32>
    %40 = tpu.reciprocal %39 : vector<16x1xf32> -> vector<16x1xf32>
    %cst_25 = arith.constant dense<0.000000e+00> : vector<16x8xf32>
    %41 = tpu.matmul %37, %30, %cst_25 {dimension_numbers = #tpu.dot_dimension_numbers<[1], [0], [0], [1], [0, 0, 1, 1], [], []>} : vector<16x16xf32>, vector<16x8xf32>, vector<16x8xf32> -> vector<16x8xf32>
    %42 = vector.broadcast %40 : vector<16x1xf32> to vector<16x8xf32>
    %43 = arith.mulf %41, %42 : vector<16x8xf32>
    %c8_26 = arith.constant 8 : index
    %c0_27 = arith.constant 0 : index
    %44 = vector.load %arg10[%c8_26, %c0_27] : memref<32x32xf32, #tpu.memory_space<vmem>>, vector<8x32xf32>
    %cst_28 = arith.constant dense<0.000000e+00> : vector<16x32xf32>
    %45 = tpu.matmul %43, %44, %cst_28 {dimension_numbers = #tpu.dot_dimension_numbers<[1], [0], [0], [1], [0, 0, 1, 1], [], []>} : vector<16x8xf32>, vector<8x32xf32>, vector<16x32xf32> -> vector<16x32xf32>
    %46 = arith.addf %28, %45 : vector<16x32xf32>
    %c0_29 = arith.constant 0 : index
    %c16 = arith.constant 16 : index
    %47 = vector.load %arg17[%c0_29, %c16] : memref<16x32xf32, #tpu.memory_space<vmem>>, vector<16x8xf32>
    %c0_30 = arith.constant 0 : index
    %c16_31 = arith.constant 16 : index
    %48 = vector.load %arg18[%c0_30, %c16_31] : memref<16x32xf32, #tpu.memory_space<vmem>>, vector<16x8xf32>
    %49 = vector.extract_strided_slice %9 {offsets = [0, 16], sizes = [16, 8], strides = [1, 1]} : vector<16x32xf32> to vector<16x8xf32>
    %cst_32 = arith.constant dense<0.000000e+00> : vector<16x16xf32>
    %50 = tpu.matmul %49, %47, %cst_32 {dimension_numbers = #tpu.dot_dimension_numbers<[1], [1], [0], [0], [0, 0, 1, 0], [], []>} : vector<16x8xf32>, vector<16x8xf32>, vector<16x16xf32> -> vector<16x16xf32>
    %cst_33 = arith.constant dense<0xFF800000> : vector<16xf32>
    %51 = vector.multi_reduction <maximumf>, %50, %cst_33 [1] : vector<16x16xf32> to vector<16xf32>
    %52 = vector.shape_cast %51 : vector<16xf32> to vector<16x1xf32>
    %53 = vector.broadcast %52 : vector<16x1xf32> to vector<16x16xf32>
    %54 = arith.subf %50, %53 : vector<16x16xf32>
    %55 = math.exp %54 : vector<16x16xf32>
    %cst_34 = arith.constant dense<0.000000e+00> : vector<16xf32>
    %56 = vector.multi_reduction <add>, %55, %cst_34 [1] : vector<16x16xf32> to vector<16xf32>
    %57 = vector.shape_cast %56 : vector<16xf32> to vector<16x1xf32>
    %58 = tpu.reciprocal %57 : vector<16x1xf32> -> vector<16x1xf32>
    %cst_35 = arith.constant dense<0.000000e+00> : vector<16x8xf32>
    %59 = tpu.matmul %55, %48, %cst_35 {dimension_numbers = #tpu.dot_dimension_numbers<[1], [0], [0], [1], [0, 0, 1, 1], [], []>} : vector<16x16xf32>, vector<16x8xf32>, vector<16x8xf32> -> vector<16x8xf32>
    %60 = vector.broadcast %58 : vector<16x1xf32> to vector<16x8xf32>
    %61 = arith.mulf %59, %60 : vector<16x8xf32>
    %c16_36 = arith.constant 16 : index
    %c0_37 = arith.constant 0 : index
    %62 = vector.load %arg10[%c16_36, %c0_37] : memref<32x32xf32, #tpu.memory_space<vmem>>, vector<8x32xf32>
    %cst_38 = arith.constant dense<0.000000e+00> : vector<16x32xf32>
    %63 = tpu.matmul %61, %62, %cst_38 {dimension_numbers = #tpu.dot_dimension_numbers<[1], [0], [0], [1], [0, 0, 1, 1], [], []>} : vector<16x8xf32>, vector<8x32xf32>, vector<16x32xf32> -> vector<16x32xf32>
    %64 = arith.addf %46, %63 : vector<16x32xf32>
    %c0_39 = arith.constant 0 : index
    %c24 = arith.constant 24 : index
    %65 = vector.load %arg17[%c0_39, %c24] : memref<16x32xf32, #tpu.memory_space<vmem>>, vector<16x8xf32>
    %c0_40 = arith.constant 0 : index
    %c24_41 = arith.constant 24 : index
    %66 = vector.load %arg18[%c0_40, %c24_41] : memref<16x32xf32, #tpu.memory_space<vmem>>, vector<16x8xf32>
    %67 = vector.extract_strided_slice %9 {offsets = [0, 24], sizes = [16, 8], strides = [1, 1]} : vector<16x32xf32> to vector<16x8xf32>
    %cst_42 = arith.constant dense<0.000000e+00> : vector<16x16xf32>
    %68 = tpu.matmul %67, %65, %cst_42 {dimension_numbers = #tpu.dot_dimension_numbers<[1], [1], [0], [0], [0, 0, 1, 0], [], []>} : vector<16x8xf32>, vector<16x8xf32>, vector<16x16xf32> -> vector<16x16xf32>
    %cst_43 = arith.constant dense<0xFF800000> : vector<16xf32>
    %69 = vector.multi_reduction <maximumf>, %68, %cst_43 [1] : vector<16x16xf32> to vector<16xf32>
    %70 = vector.shape_cast %69 : vector<16xf32> to vector<16x1xf32>
    %71 = vector.broadcast %70 : vector<16x1xf32> to vector<16x16xf32>
    %72 = arith.subf %68, %71 : vector<16x16xf32>
    %73 = math.exp %72 : vector<16x16xf32>
    %cst_44 = arith.constant dense<0.000000e+00> : vector<16xf32>
    %74 = vector.multi_reduction <add>, %73, %cst_44 [1] : vector<16x16xf32> to vector<16xf32>
    %75 = vector.shape_cast %74 : vector<16xf32> to vector<16x1xf32>
    %76 = tpu.reciprocal %75 : vector<16x1xf32> -> vector<16x1xf32>
    %cst_45 = arith.constant dense<0.000000e+00> : vector<16x8xf32>
    %77 = tpu.matmul %73, %66, %cst_45 {dimension_numbers = #tpu.dot_dimension_numbers<[1], [0], [0], [1], [0, 0, 1, 1], [], []>} : vector<16x16xf32>, vector<16x8xf32>, vector<16x8xf32> -> vector<16x8xf32>
    %78 = vector.broadcast %76 : vector<16x1xf32> to vector<16x8xf32>
    %79 = arith.mulf %77, %78 : vector<16x8xf32>
    %c24_46 = arith.constant 24 : index
    %c0_47 = arith.constant 0 : index
    %80 = vector.load %arg10[%c24_46, %c0_47] : memref<32x32xf32, #tpu.memory_space<vmem>>, vector<8x32xf32>
    %cst_48 = arith.constant dense<0.000000e+00> : vector<16x32xf32>
    %81 = tpu.matmul %79, %80, %cst_48 {dimension_numbers = #tpu.dot_dimension_numbers<[1], [0], [0], [1], [0, 0, 1, 1], [], []>} : vector<16x8xf32>, vector<8x32xf32>, vector<16x32xf32> -> vector<16x32xf32>
    %82 = arith.addf %64, %81 : vector<16x32xf32>
    %c0_49 = arith.constant 0 : index
    %c0_50 = arith.constant 0 : index
    %83 = vector.load %arg11[%c0_49, %c0_50] : memref<32x64xf32, #tpu.memory_space<vmem>>, vector<32x64xf32>
    %cst_51 = arith.constant dense<0.000000e+00> : vector<16x64xf32>
    %84 = tpu.matmul %4, %83, %cst_51 {dimension_numbers = #tpu.dot_dimension_numbers<[1], [0], [0], [1], [0, 0, 1, 1], [], []>} : vector<16x32xf32>, vector<32x64xf32>, vector<16x64xf32> -> vector<16x64xf32>
    %c0_52 = arith.constant 0 : index
    %c0_53 = arith.constant 0 : index
    %85 = vector.load %arg12[%c0_52, %c0_53] : memref<32x64xf32, #tpu.memory_space<vmem>>, vector<32x64xf32>
    %cst_54 = arith.constant dense<0.000000e+00> : vector<16x64xf32>
    %86 = tpu.matmul %82, %85, %cst_54 {dimension_numbers = #tpu.dot_dimension_numbers<[1], [0], [0], [1], [0, 0, 1, 1], [], []>} : vector<16x32xf32>, vector<32x64xf32>, vector<16x64xf32> -> vector<16x64xf32>
    %87 = arith.addf %84, %86 : vector<16x64xf32>
    %c0_55 = arith.constant 0 : index
    %c0_56 = arith.constant 0 : index
    %88 = vector.load %arg13[%c0_55, %c0_56] : memref<1x64xf32, #tpu.memory_space<vmem>>, vector<1x64xf32>
    %89 = vector.broadcast %88 : vector<1x64xf32> to vector<16x64xf32>
    %90 = arith.addf %87, %89 : vector<16x64xf32>
    %c16_i32 = arith.constant 16 : i32
    %91 = arith.muli %arg1, %c16_i32 : i32
    %92 = tpu.assume_multiple %91, 16 : i32
    %93 = arith.index_cast %92 : i32 to index
    %c0_57 = arith.constant 0 : index
    %94 = vector.load %arg19[%93, %c0_57] : memref<16x64xf32, #tpu.memory_space<vmem>>, vector<16x64xf32>
    tpu.vector_store %arg19[%93, %c0_57], %90 {strides = array<i32>} : memref<16x64xf32, #tpu.memory_space<vmem>>, vector<16x64xf32>,
    %c0_i32_58 = arith.constant 0 : i32
    %95 = arith.cmpi eq, %arg1, %c0_i32_58 : i32
    %96 = arith.extui %95 : i1 to i32
    %c0_i32_59 = arith.constant 0 : i32
    %97 = arith.cmpi ne, %96, %c0_i32_59 : i32
    scf.if %97 {
      %c0_60 = arith.constant 0 : index
      %c0_61 = arith.constant 0 : index
      %98 = vector.load %arg19[%c0_60, %c0_61] : memref<16x64xf32, #tpu.memory_space<vmem>>, vector<16x64xf32>
      %cst_62 = arith.constant dense<0.000000e+00> : vector<64xf32>
      %99 = vector.multi_reduction <add>, %98, %cst_62 [0] : vector<16x64xf32> to vector<64xf32>
      %100 = vector.shape_cast %99 : vector<64xf32> to vector<1x64xf32>
      %cst_63 = arith.constant 1.600000e+01 : f32
      %101 = vector.broadcast %cst_63 : f32 to vector<1x64xf32>
      %102 = arith.divf %100, %101 : vector<1x64xf32>
      %103 = vector.broadcast %102 : vector<1x64xf32> to vector<16x64xf32>
      %104 = arith.subf %98, %103 : vector<16x64xf32>
      %105 = arith.mulf %104, %104 : vector<16x64xf32>
      %cst_64 = arith.constant dense<0.000000e+00> : vector<64xf32>
      %106 = vector.multi_reduction <add>, %105, %cst_64 [0] : vector<16x64xf32> to vector<64xf32>
      %107 = vector.shape_cast %106 : vector<64xf32> to vector<1x64xf32>
      %cst_65 = arith.constant 1.600000e+01 : f32
      %108 = vector.broadcast %cst_65 : f32 to vector<1x64xf32>
      %109 = arith.divf %107, %108 : vector<1x64xf32>
      %110 = vector.broadcast %102 : vector<1x64xf32> to vector<16x64xf32>
      %111 = arith.subf %98, %110 : vector<16x64xf32>
      %cst_66 = arith.constant 9.99999974E-6 : f32
      %112 = vector.broadcast %cst_66 : f32 to vector<1x64xf32>
      %113 = arith.addf %109, %112 : vector<1x64xf32>
      %114 = math.rsqrt %113 : vector<1x64xf32>
      %115 = vector.broadcast %114 : vector<1x64xf32> to vector<16x64xf32>
      %116 = arith.mulf %111, %115 : vector<16x64xf32>
      %cst_67 = arith.constant 0.000000e+00 : f32
      %117 = vector.broadcast %cst_67 : f32 to vector<16x64xf32>
      %118 = arith.maximumf %116, %117 : vector<16x64xf32>
      %c0_68 = arith.constant 0 : index
      %c0_69 = arith.constant 0 : index
      %119 = vector.load %arg14[%c0_68, %c0_69] : memref<64x32xf32, #tpu.memory_space<vmem>>, vector<64x32xf32>
      %cst_70 = arith.constant dense<0.000000e+00> : vector<16x32xf32>
      %120 = tpu.matmul %118, %119, %cst_70 {dimension_numbers = #tpu.dot_dimension_numbers<[1], [0], [0], [1], [0, 0, 1, 1], [], []>} : vector<16x64xf32>, vector<64x32xf32>, vector<16x32xf32> -> vector<16x32xf32>
      %c0_71 = arith.constant 0 : index
      %c0_72 = arith.constant 0 : index
      %121 = vector.load %arg15[%c0_71, %c0_72] : memref<1x32xf32, #tpu.memory_space<vmem>>, vector<1x32xf32>
      %122 = vector.broadcast %121 : vector<1x32xf32> to vector<16x32xf32>
      %123 = arith.addf %120, %122 : vector<16x32xf32>
      %c0_73 = arith.constant 0 : index
      %c0_74 = arith.constant 0 : index
      %c0_75 = arith.constant 0 : index
      %124 = vector.load %arg16[%c0_73, %c0_74, %c0_75] : memref<1x16x32xf32, #tpu.memory_space<vmem>>, vector<1x16x32xf32>
      %125 = vector.shape_cast %124 : vector<1x16x32xf32> to vector<16x32xf32>
      %126 = vector.shape_cast %123 : vector<16x32xf32> to vector<1x16x32xf32>
      tpu.vector_store %arg16[%c0_73, %c0_74, %c0_75], %126 {strides = array<i32>} : memref<1x16x32xf32, #tpu.memory_space<vmem>>, vector<1x16x32xf32>,
    } else {
    }
    return
  }
  func.func @transform_0(%arg0: i32, %arg1: i32) -> (i32, i32, i32) {
    %c0_i32 = arith.constant 0 : i32
    %c0_i32_0 = arith.constant 0 : i32
    return %arg0, %arg1, %c0_i32 : i32, i32, i32
  }
  func.func @transform_1(%arg0: i32, %arg1: i32) -> (i32, i32, i32) {
    %c0_i32 = arith.constant 0 : i32
    %c0_i32_0 = arith.constant 0 : i32
    %c0_i32_1 = arith.constant 0 : i32
    return %arg0, %c0_i32, %c0_i32_0 : i32, i32, i32
  }
  func.func @transform_2(%arg0: i32, %arg1: i32) -> (i32, i32) {
    %c0_i32 = arith.constant 0 : i32
    %c0_i32_0 = arith.constant 0 : i32
    %c0_i32_1 = arith.constant 0 : i32
    return %c0_i32, %c0_i32_0 : i32, i32
  }
  func.func @transform_3(%arg0: i32, %arg1: i32) -> (i32, i32) {
    %c0_i32 = arith.constant 0 : i32
    %c0_i32_0 = arith.constant 0 : i32
    %c0_i32_1 = arith.constant 0 : i32
    return %c0_i32, %c0_i32_0 : i32, i32
  }
  func.func @transform_4(%arg0: i32, %arg1: i32) -> (i32, i32) {
    %c0_i32 = arith.constant 0 : i32
    %c0_i32_0 = arith.constant 0 : i32
    %c0_i32_1 = arith.constant 0 : i32
    return %c0_i32, %c0_i32_0 : i32, i32
  }
  func.func @transform_5(%arg0: i32, %arg1: i32) -> (i32, i32) {
    %c0_i32 = arith.constant 0 : i32
    %c0_i32_0 = arith.constant 0 : i32
    %c0_i32_1 = arith.constant 0 : i32
    return %c0_i32, %c0_i32_0 : i32, i32
  }
  func.func @transform_6(%arg0: i32, %arg1: i32) -> (i32, i32) {
    %c0_i32 = arith.constant 0 : i32
    %c0_i32_0 = arith.constant 0 : i32
    %c0_i32_1 = arith.constant 0 : i32
    return %c0_i32, %c0_i32_0 : i32, i32
  }
  func.func @transform_7(%arg0: i32, %arg1: i32) -> (i32, i32) {
    %c0_i32 = arith.constant 0 : i32
    %c0_i32_0 = arith.constant 0 : i32
    %c0_i32_1 = arith.constant 0 : i32
    return %c0_i32, %c0_i32_0 : i32, i32
  }
  func.func @transform_8(%arg0: i32, %arg1: i32) -> (i32, i32) {
    %c0_i32 = arith.constant 0 : i32
    %c0_i32_0 = arith.constant 0 : i32
    %c0_i32_1 = arith.constant 0 : i32
    return %c0_i32, %c0_i32_0 : i32, i32
  }
  func.func @transform_9(%arg0: i32, %arg1: i32) -> (i32, i32) {
    %c0_i32 = arith.constant 0 : i32
    %c0_i32_0 = arith.constant 0 : i32
    %c0_i32_1 = arith.constant 0 : i32
    return %c0_i32, %c0_i32_0 : i32, i32
  }
  func.func @transform_10(%arg0: i32, %arg1: i32) -> (i32, i32) {
    %c0_i32 = arith.constant 0 : i32
    %c0_i32_0 = arith.constant 0 : i32
    %c0_i32_1 = arith.constant 0 : i32
    return %c0_i32, %c0_i32_0 : i32, i32
  }
  func.func @transform_11(%arg0: i32, %arg1: i32) -> (i32, i32) {
    %c0_i32 = arith.constant 0 : i32
    %c0_i32_0 = arith.constant 0 : i32
    %c0_i32_1 = arith.constant 0 : i32
    return %c0_i32, %c0_i32_0 : i32, i32
  }
  func.func @transform_12(%arg0: i32, %arg1: i32) -> (i32, i32) {
    %c0_i32 = arith.constant 0 : i32
    %c0_i32_0 = arith.constant 0 : i32
    %c0_i32_1 = arith.constant 0 : i32
    return %c0_i32, %c0_i32_0 : i32, i32
  }
  func.func @transform_13(%arg0: i32, %arg1: i32) -> (i32, i32) {
    %c0_i32 = arith.constant 0 : i32
    %c0_i32_0 = arith.constant 0 : i32
    %c0_i32_1 = arith.constant 0 : i32
    return %c0_i32, %c0_i32_0 : i32, i32
  }
  func.func @transform_14(%arg0: i32, %arg1: i32) -> (i32, i32, i32) {
    %c0_i32 = arith.constant 0 : i32
    %c0_i32_0 = arith.constant 0 : i32
    %c0_i32_1 = arith.constant 0 : i32
    return %arg0, %c0_i32, %c0_i32_0 : i32, i32, i32
  }
}

module attributes {stable_mosaic.version = 11 : i64} {
  func.func @attn_prop_kernel(%arg0: i32, %arg1: i32, %arg2: memref<1x16x32xf32, #tpu.memory_space<vmem>>, %arg3: memref<1x16x32xf32, #tpu.memory_space<vmem>>, %arg4: memref<32x32xf32, #tpu.memory_space<vmem>>, %arg5: memref<1x32xf32, #tpu.memory_space<vmem>>, %arg6: memref<32x32xf32, #tpu.memory_space<vmem>>, %arg7: memref<1x32xf32, #tpu.memory_space<vmem>>, %arg8: memref<32x32xf32, #tpu.memory_space<vmem>>, %arg9: memref<1x32xf32, #tpu.memory_space<vmem>>, %arg10: memref<32x32xf32, #tpu.memory_space<vmem>>, %arg11: memref<32x64xf32, #tpu.memory_space<vmem>>, %arg12: memref<32x64xf32, #tpu.memory_space<vmem>>, %arg13: memref<1x64xf32, #tpu.memory_space<vmem>>, %arg14: memref<64x32xf32, #tpu.memory_space<vmem>>, %arg15: memref<1x32xf32, #tpu.memory_space<vmem>>, %arg16: memref<1x16x32xf32, #tpu.memory_space<vmem>>, %arg17: memref<16x32xf32, #tpu.memory_space<vmem>>, %arg18: memref<16x32xf32, #tpu.memory_space<vmem>>, %arg19: memref<16x64xf32, #tpu.memory_space<vmem>>) attributes {dimension_semantics = [#tpu.dimension_semantics<parallel>, #tpu.dimension_semantics<arbitrary>], iteration_bounds = array<i64: 2, 1>, scalar_prefetch = 0 : i64, scratch_operands = 3 : i64, tpu.core_type = #tpu.core_type<tc>, window_params = [{transform_indices = @transform_0, window_bounds = array<i64: 1, 16, 32>}, {transform_indices = @transform_1, window_bounds = array<i64: 1, 16, 32>}, {pipeline_mode = #tpu.pipeline_mode<synchronous>, transform_indices = @transform_2, window_bounds = array<i64: 32, 32>}, {pipeline_mode = #tpu.pipeline_mode<synchronous>, transform_indices = @transform_3, window_bounds = array<i64: 1, 32>}, {pipeline_mode = #tpu.pipeline_mode<synchronous>, transform_indices = @transform_4, window_bounds = array<i64: 32, 32>}, {pipeline_mode = #tpu.pipeline_mode<synchronous>, transform_indices = @transform_5, window_bounds = array<i64: 1, 32>}, {pipeline_mode = #tpu.pipeline_mode<synchronous>, transform_indices = @transform_6, window_bounds = array<i64: 32, 32>}, {pipeline_mode = #tpu.pipeline_mode<synchronous>, transform_indices = @transform_7, window_bounds = array<i64: 1, 32>}, {pipeline_mode = #tpu.pipeline_mode<synchronous>, transform_indices = @transform_8, window_bounds = array<i64: 32, 32>}, {pipeline_mode = #tpu.pipeline_mode<synchronous>, transform_indices = @transform_9, window_bounds = array<i64: 32, 64>}, {pipeline_mode = #tpu.pipeline_mode<synchronous>, transform_indices = @transform_10, window_bounds = array<i64: 32, 64>}, {pipeline_mode = #tpu.pipeline_mode<synchronous>, transform_indices = @transform_11, window_bounds = array<i64: 1, 64>}, {pipeline_mode = #tpu.pipeline_mode<synchronous>, transform_indices = @transform_12, window_bounds = array<i64: 64, 32>}, {pipeline_mode = #tpu.pipeline_mode<synchronous>, transform_indices = @transform_13, window_bounds = array<i64: 1, 32>}, {transform_indices = @transform_14, window_bounds = array<i64: 1, 16, 32>}]} {
    %c0_i32 = arith.constant 0 : i32
    %0 = arith.cmpi eq, %arg1, %c0_i32 : i32
    %1 = arith.extui %0 : i1 to i32
    %c0_i32_0 = arith.constant 0 : i32
    %2 = arith.cmpi ne, %1, %c0_i32_0 : i32
    scf.if %2 {
      %c0_60 = arith.constant 0 : index
      %c0_61 = arith.constant 0 : index
      %c0_62 = arith.constant 0 : index
      %98 = vector.load %arg3[%c0_60, %c0_61, %c0_62] : memref<1x16x32xf32, #tpu.memory_space<vmem>>, vector<1x16x32xf32>
      %99 = vector.shape_cast %98 : vector<1x16x32xf32> to vector<16x32xf32>
      %c0_63 = arith.constant 0 : index
      %c0_64 = arith.constant 0 : index
      %100 = vector.load %arg6[%c0_63, %c0_64] : memref<32x32xf32, #tpu.memory_space<vmem>>, vector<32x32xf32>
      %cst_65 = arith.constant dense<0.000000e+00> : vector<16x32xf32>
      %101 = tpu.matmul %99, %100, %cst_65 {dimension_numbers = #tpu.dot_dimension_numbers<[1], [0], [0], [1], [0, 0, 1, 1], [], []>} : vector<16x32xf32>, vector<32x32xf32>, vector<16x32xf32> -> vector<16x32xf32>
      %c0_66 = arith.constant 0 : index
      %c0_67 = arith.constant 0 : index
      %102 = vector.load %arg7[%c0_66, %c0_67] : memref<1x32xf32, #tpu.memory_space<vmem>>, vector<1x32xf32>
      %103 = vector.broadcast %102 : vector<1x32xf32> to vector<16x32xf32>
      %104 = arith.addf %101, %103 : vector<16x32xf32>
      %c0_68 = arith.constant 0 : index
      %c0_69 = arith.constant 0 : index
      %105 = vector.load %arg8[%c0_68, %c0_69] : memref<32x32xf32, #tpu.memory_space<vmem>>, vector<32x32xf32>
      %cst_70 = arith.constant dense<0.000000e+00> : vector<16x32xf32>
      %106 = tpu.matmul %99, %105, %cst_70 {dimension_numbers = #tpu.dot_dimension_numbers<[1], [0], [0], [1], [0, 0, 1, 1], [], []>} : vector<16x32xf32>, vector<32x32xf32>, vector<16x32xf32> -> vector<16x32xf32>
      %c0_71 = arith.constant 0 : index
      %c0_72 = arith.constant 0 : index
      %107 = vector.load %arg9[%c0_71, %c0_72] : memref<1x32xf32, #tpu.memory_space<vmem>>, vector<1x32xf32>
      %108 = vector.broadcast %107 : vector<1x32xf32> to vector<16x32xf32>
      %109 = arith.addf %106, %108 : vector<16x32xf32>
      %c0_73 = arith.constant 0 : index
      %c0_74 = arith.constant 0 : index
      %110 = vector.load %arg17[%c0_73, %c0_74] : memref<16x32xf32, #tpu.memory_space<vmem>>, vector<16x32xf32>
      tpu.vector_store %arg17[%c0_73, %c0_74], %104 {strides = array<i32>} : memref<16x32xf32, #tpu.memory_space<vmem>>, vector<16x32xf32>,
      %c0_75 = arith.constant 0 : index
      %c0_76 = arith.constant 0 : index
      %111 = vector.load %arg18[%c0_75, %c0_76] : memref<16x32xf32, #tpu.memory_space<vmem>>, vector<16x32xf32>
      tpu.vector_store %arg18[%c0_75, %c0_76], %109 {strides = array<i32>} : memref<16x32xf32, #tpu.memory_space<vmem>>, vector<16x32xf32>,
    } else {
    }
    %c0 = arith.constant 0 : index
    %c0_1 = arith.constant 0 : index
    %c0_2 = arith.constant 0 : index
    %3 = vector.load %arg2[%c0, %c0_1, %c0_2] : memref<1x16x32xf32, #tpu.memory_space<vmem>>, vector<1x16x32xf32>
    %4 = vector.shape_cast %3 : vector<1x16x32xf32> to vector<16x32xf32>
    %c0_3 = arith.constant 0 : index
    %c0_4 = arith.constant 0 : index
    %5 = vector.load %arg4[%c0_3, %c0_4] : memref<32x32xf32, #tpu.memory_space<vmem>>, vector<32x32xf32>
    %cst = arith.constant dense<0.000000e+00> : vector<16x32xf32>
    %6 = tpu.matmul %4, %5, %cst {dimension_numbers = #tpu.dot_dimension_numbers<[1], [0], [0], [1], [0, 0, 1, 1], [], []>} : vector<16x32xf32>, vector<32x32xf32>, vector<16x32xf32> -> vector<16x32xf32>
    %c0_5 = arith.constant 0 : index
    %c0_6 = arith.constant 0 : index
    %7 = vector.load %arg5[%c0_5, %c0_6] : memref<1x32xf32, #tpu.memory_space<vmem>>, vector<1x32xf32>
    %8 = vector.broadcast %7 : vector<1x32xf32> to vector<16x32xf32>
    %9 = arith.addf %6, %8 : vector<16x32xf32>
    %cst_7 = arith.constant 0.000000e+00 : f32
    %10 = vector.broadcast %cst_7 : f32 to vector<16x32xf32>
    %c0_8 = arith.constant 0 : index
    %c0_9 = arith.constant 0 : index
    %11 = vector.load %arg17[%c0_8, %c0_9] : memref<16x32xf32, #tpu.memory_space<vmem>>, vector<16x8xf32>
    %c0_10 = arith.constant 0 : index
    %c0_11 = arith.constant 0 : index
    %12 = vector.load %arg18[%c0_10, %c0_11] : memref<16x32xf32, #tpu.memory_space<vmem>>, vector<16x8xf32>
    %13 = vector.extract_strided_slice %9 {offsets = [0, 0], sizes = [16, 8], strides = [1, 1]} : vector<16x32xf32> to vector<16x8xf32>
    %cst_12 = arith.constant dense<0.000000e+00> : vector<16x16xf32>
    %14 = tpu.matmul %13, %11, %cst_12 {dimension_numbers = #tpu.dot_dimension_numbers<[1], [1], [0], [0], [0, 0, 1, 0], [], []>} : vector<16x8xf32>, vector<16x8xf32>, vector<16x16xf32> -> vector<16x16xf32>
    %cst_13 = arith.constant dense<0xFF800000> : vector<16xf32>
    %15 = vector.multi_reduction <maximumf>, %14, %cst_13 [1] : vector<16x16xf32> to vector<16xf32>
    %16 = vector.shape_cast %15 : vector<16xf32> to vector<16x1xf32>
    %17 = vector.broadcast %16 : vector<16x1xf32> to vector<16x16xf32>
    %18 = arith.subf %14, %17 : vector<16x16xf32>
    %19 = math.exp %18 : vector<16x16xf32>
    %cst_14 = arith.constant dense<0.000000e+00> : vector<16xf32>
    %20 = vector.multi_reduction <add>, %19, %cst_14 [1] : vector<16x16xf32> to vector<16xf32>
    %21 = vector.shape_cast %20 : vector<16xf32> to vector<16x1xf32>
    %22 = tpu.reciprocal %21 : vector<16x1xf32> -> vector<16x1xf32>
    %cst_15 = arith.constant dense<0.000000e+00> : vector<16x8xf32>
    %23 = tpu.matmul %19, %12, %cst_15 {dimension_numbers = #tpu.dot_dimension_numbers<[1], [0], [0], [1], [0, 0, 1, 1], [], []>} : vector<16x16xf32>, vector<16x8xf32>, vector<16x8xf32> -> vector<16x8xf32>
    %24 = vector.broadcast %22 : vector<16x1xf32> to vector<16x8xf32>
    %25 = arith.mulf %23, %24 : vector<16x8xf32>
    %c0_16 = arith.constant 0 : index
    %c0_17 = arith.constant 0 : index
    %26 = vector.load %arg10[%c0_16, %c0_17] : memref<32x32xf32, #tpu.memory_space<vmem>>, vector<8x32xf32>
    %cst_18 = arith.constant dense<0.000000e+00> : vector<16x32xf32>
    %27 = tpu.matmul %25, %26, %cst_18 {dimension_numbers = #tpu.dot_dimension_numbers<[1], [0], [0], [1], [0, 0, 1, 1], [], []>} : vector<16x8xf32>, vector<8x32xf32>, vector<16x32xf32> -> vector<16x32xf32>
    %28 = arith.addf %10, %27 : vector<16x32xf32>
    %c0_19 = arith.constant 0 : index
    %c8 = arith.constant 8 : index
    %29 = vector.load %arg17[%c0_19, %c8] : memref<16x32xf32, #tpu.memory_space<vmem>>, vector<16x8xf32>
    %c0_20 = arith.constant 0 : index
    %c8_21 = arith.constant 8 : index
    %30 = vector.load %arg18[%c0_20, %c8_21] : memref<16x32xf32, #tpu.memory_space<vmem>>, vector<16x8xf32>
    %31 = vector.extract_strided_slice %9 {offsets = [0, 8], sizes = [16, 8], strides = [1, 1]} : vector<16x32xf32> to vector<16x8xf32>
    %cst_22 = arith.constant dense<0.000000e+00> : vector<16x16xf32>
    %32 = tpu.matmul %31, %29, %cst_22 {dimension_numbers = #tpu.dot_dimension_numbers<[1], [1], [0], [0], [0, 0, 1, 0], [], []>} : vector<16x8xf32>, vector<16x8xf32>, vector<16x16xf32> -> vector<16x16xf32>
    %cst_23 = arith.constant dense<0xFF800000> : vector<16xf32>
    %33 = vector.multi_reduction <maximumf>, %32, %cst_23 [1] : vector<16x16xf32> to vector<16xf32>
    %34 = vector.shape_cast %33 : vector<16xf32> to vector<16x1xf32>
    %35 = vector.broadcast %34 : vector<16x1xf32> to vector<16x16xf32>
    %36 = arith.subf %32, %35 : vector<16x16xf32>
    %37 = math.exp %36 : vector<16x16xf32>
    %cst_24 = arith.constant dense<0.000000e+00> : vector<16xf32>
    %38 = vector.multi_reduction <add>, %37, %cst_24 [1] : vector<16x16xf32> to vector<16xf32>
    %39 = vector.shape_cast %38 : vector<16xf32> to vector<16x1xf32>
    %40 = tpu.reciprocal %39 : vector<16x1xf32> -> vector<16x1xf32>
    %cst_25 = arith.constant dense<0.000000e+00> : vector<16x8xf32>
    %41 = tpu.matmul %37, %30, %cst_25 {dimension_numbers = #tpu.dot_dimension_numbers<[1], [0], [0], [1], [0, 0, 1, 1], [], []>} : vector<16x16xf32>, vector<16x8xf32>, vector<16x8xf32> -> vector<16x8xf32>
    %42 = vector.broadcast %40 : vector<16x1xf32> to vector<16x8xf32>
    %43 = arith.mulf %41, %42 : vector<16x8xf32>
    %c8_26 = arith.constant 8 : index
    %c0_27 = arith.constant 0 : index
    %44 = vector.load %arg10[%c8_26, %c0_27] : memref<32x32xf32, #tpu.memory_space<vmem>>, vector<8x32xf32>
    %cst_28 = arith.constant dense<0.000000e+00> : vector<16x32xf32>
    %45 = tpu.matmul %43, %44, %cst_28 {dimension_numbers = #tpu.dot_dimension_numbers<[1], [0], [0], [1], [0, 0, 1, 1], [], []>} : vector<16x8xf32>, vector<8x32xf32>, vector<16x32xf32> -> vector<16x32xf32>
    %46 = arith.addf %28, %45 : vector<16x32xf32>
    %c0_29 = arith.constant 0 : index
    %c16 = arith.constant 16 : index
    %47 = vector.load %arg17[%c0_29, %c16] : memref<16x32xf32, #tpu.memory_space<vmem>>, vector<16x8xf32>
    %c0_30 = arith.constant 0 : index
    %c16_31 = arith.constant 16 : index
    %48 = vector.load %arg18[%c0_30, %c16_31] : memref<16x32xf32, #tpu.memory_space<vmem>>, vector<16x8xf32>
    %49 = vector.extract_strided_slice %9 {offsets = [0, 16], sizes = [16, 8], strides = [1, 1]} : vector<16x32xf32> to vector<16x8xf32>
    %cst_32 = arith.constant dense<0.000000e+00> : vector<16x16xf32>
    %50 = tpu.matmul %49, %47, %cst_32 {dimension_numbers = #tpu.dot_dimension_numbers<[1], [1], [0], [0], [0, 0, 1, 0], [], []>} : vector<16x8xf32>, vector<16x8xf32>, vector<16x16xf32> -> vector<16x16xf32>
    %cst_33 = arith.constant dense<0xFF800000> : vector<16xf32>
    %51 = vector.multi_reduction <maximumf>, %50, %cst_33 [1] : vector<16x16xf32> to vector<16xf32>
    %52 = vector.shape_cast %51 : vector<16xf32> to vector<16x1xf32>
    %53 = vector.broadcast %52 : vector<16x1xf32> to vector<16x16xf32>
    %54 = arith.subf %50, %53 : vector<16x16xf32>
    %55 = math.exp %54 : vector<16x16xf32>
    %cst_34 = arith.constant dense<0.000000e+00> : vector<16xf32>
    %56 = vector.multi_reduction <add>, %55, %cst_34 [1] : vector<16x16xf32> to vector<16xf32>
    %57 = vector.shape_cast %56 : vector<16xf32> to vector<16x1xf32>
    %58 = tpu.reciprocal %57 : vector<16x1xf32> -> vector<16x1xf32>
    %cst_35 = arith.constant dense<0.000000e+00> : vector<16x8xf32>
    %59 = tpu.matmul %55, %48, %cst_35 {dimension_numbers = #tpu.dot_dimension_numbers<[1], [0], [0], [1], [0, 0, 1, 1], [], []>} : vector<16x16xf32>, vector<16x8xf32>, vector<16x8xf32> -> vector<16x8xf32>
    %60 = vector.broadcast %58 : vector<16x1xf32> to vector<16x8xf32>
    %61 = arith.mulf %59, %60 : vector<16x8xf32>
    %c16_36 = arith.constant 16 : index
    %c0_37 = arith.constant 0 : index
    %62 = vector.load %arg10[%c16_36, %c0_37] : memref<32x32xf32, #tpu.memory_space<vmem>>, vector<8x32xf32>
    %cst_38 = arith.constant dense<0.000000e+00> : vector<16x32xf32>
    %63 = tpu.matmul %61, %62, %cst_38 {dimension_numbers = #tpu.dot_dimension_numbers<[1], [0], [0], [1], [0, 0, 1, 1], [], []>} : vector<16x8xf32>, vector<8x32xf32>, vector<16x32xf32> -> vector<16x32xf32>
    %64 = arith.addf %46, %63 : vector<16x32xf32>
    %c0_39 = arith.constant 0 : index
    %c24 = arith.constant 24 : index
    %65 = vector.load %arg17[%c0_39, %c24] : memref<16x32xf32, #tpu.memory_space<vmem>>, vector<16x8xf32>
    %c0_40 = arith.constant 0 : index
    %c24_41 = arith.constant 24 : index
    %66 = vector.load %arg18[%c0_40, %c24_41] : memref<16x32xf32, #tpu.memory_space<vmem>>, vector<16x8xf32>
    %67 = vector.extract_strided_slice %9 {offsets = [0, 24], sizes = [16, 8], strides = [1, 1]} : vector<16x32xf32> to vector<16x8xf32>
    %cst_42 = arith.constant dense<0.000000e+00> : vector<16x16xf32>
    %68 = tpu.matmul %67, %65, %cst_42 {dimension_numbers = #tpu.dot_dimension_numbers<[1], [1], [0], [0], [0, 0, 1, 0], [], []>} : vector<16x8xf32>, vector<16x8xf32>, vector<16x16xf32> -> vector<16x16xf32>
    %cst_43 = arith.constant dense<0xFF800000> : vector<16xf32>
    %69 = vector.multi_reduction <maximumf>, %68, %cst_43 [1] : vector<16x16xf32> to vector<16xf32>
    %70 = vector.shape_cast %69 : vector<16xf32> to vector<16x1xf32>
    %71 = vector.broadcast %70 : vector<16x1xf32> to vector<16x16xf32>
    %72 = arith.subf %68, %71 : vector<16x16xf32>
    %73 = math.exp %72 : vector<16x16xf32>
    %cst_44 = arith.constant dense<0.000000e+00> : vector<16xf32>
    %74 = vector.multi_reduction <add>, %73, %cst_44 [1] : vector<16x16xf32> to vector<16xf32>
    %75 = vector.shape_cast %74 : vector<16xf32> to vector<16x1xf32>
    %76 = tpu.reciprocal %75 : vector<16x1xf32> -> vector<16x1xf32>
    %cst_45 = arith.constant dense<0.000000e+00> : vector<16x8xf32>
    %77 = tpu.matmul %73, %66, %cst_45 {dimension_numbers = #tpu.dot_dimension_numbers<[1], [0], [0], [1], [0, 0, 1, 1], [], []>} : vector<16x16xf32>, vector<16x8xf32>, vector<16x8xf32> -> vector<16x8xf32>
    %78 = vector.broadcast %76 : vector<16x1xf32> to vector<16x8xf32>
    %79 = arith.mulf %77, %78 : vector<16x8xf32>
    %c24_46 = arith.constant 24 : index
    %c0_47 = arith.constant 0 : index
    %80 = vector.load %arg10[%c24_46, %c0_47] : memref<32x32xf32, #tpu.memory_space<vmem>>, vector<8x32xf32>
    %cst_48 = arith.constant dense<0.000000e+00> : vector<16x32xf32>
    %81 = tpu.matmul %79, %80, %cst_48 {dimension_numbers = #tpu.dot_dimension_numbers<[1], [0], [0], [1], [0, 0, 1, 1], [], []>} : vector<16x8xf32>, vector<8x32xf32>, vector<16x32xf32> -> vector<16x32xf32>
    %82 = arith.addf %64, %81 : vector<16x32xf32>
    %c0_49 = arith.constant 0 : index
    %c0_50 = arith.constant 0 : index
    %83 = vector.load %arg11[%c0_49, %c0_50] : memref<32x64xf32, #tpu.memory_space<vmem>>, vector<32x64xf32>
    %cst_51 = arith.constant dense<0.000000e+00> : vector<16x64xf32>
    %84 = tpu.matmul %4, %83, %cst_51 {dimension_numbers = #tpu.dot_dimension_numbers<[1], [0], [0], [1], [0, 0, 1, 1], [], []>} : vector<16x32xf32>, vector<32x64xf32>, vector<16x64xf32> -> vector<16x64xf32>
    %c0_52 = arith.constant 0 : index
    %c0_53 = arith.constant 0 : index
    %85 = vector.load %arg12[%c0_52, %c0_53] : memref<32x64xf32, #tpu.memory_space<vmem>>, vector<32x64xf32>
    %cst_54 = arith.constant dense<0.000000e+00> : vector<16x64xf32>
    %86 = tpu.matmul %82, %85, %cst_54 {dimension_numbers = #tpu.dot_dimension_numbers<[1], [0], [0], [1], [0, 0, 1, 1], [], []>} : vector<16x32xf32>, vector<32x64xf32>, vector<16x64xf32> -> vector<16x64xf32>
    %87 = arith.addf %84, %86 : vector<16x64xf32>
    %c0_55 = arith.constant 0 : index
    %c0_56 = arith.constant 0 : index
    %88 = vector.load %arg13[%c0_55, %c0_56] : memref<1x64xf32, #tpu.memory_space<vmem>>, vector<1x64xf32>
    %89 = vector.broadcast %88 : vector<1x64xf32> to vector<16x64xf32>
    %90 = arith.addf %87, %89 : vector<16x64xf32>
    %c16_i32 = arith.constant 16 : i32
    %91 = arith.muli %arg1, %c16_i32 : i32
    %92 = tpu.assume_multiple %91, 16 : i32
    %93 = arith.index_cast %92 : i32 to index
    %c0_57 = arith.constant 0 : index
    %94 = vector.load %arg19[%93, %c0_57] : memref<16x64xf32, #tpu.memory_space<vmem>>, vector<16x64xf32>
    tpu.vector_store %arg19[%93, %c0_57], %90 {strides = array<i32>} : memref<16x64xf32, #tpu.memory_space<vmem>>, vector<16x64xf32>,
    %c0_i32_58 = arith.constant 0 : i32
    %95 = arith.cmpi eq, %arg1, %c0_i32_58 : i32
    %96 = arith.extui %95 : i1 to i32
    %c0_i32_59 = arith.constant 0 : i32
    %97 = arith.cmpi ne, %96, %c0_i32_59 : i32
    scf.if %97 {
      %c0_60 = arith.constant 0 : index
      %c0_61 = arith.constant 0 : index
      %98 = vector.load %arg19[%c0_60, %c0_61] : memref<16x64xf32, #tpu.memory_space<vmem>>, vector<16x64xf32>
      %cst_62 = arith.constant dense<0.000000e+00> : vector<64xf32>
      %99 = vector.multi_reduction <add>, %98, %cst_62 [0] : vector<16x64xf32> to vector<64xf32>
      %100 = vector.shape_cast %99 : vector<64xf32> to vector<1x64xf32>
      %cst_63 = arith.constant 1.600000e+01 : f32
      %101 = vector.broadcast %cst_63 : f32 to vector<1x64xf32>
      %102 = arith.divf %100, %101 : vector<1x64xf32>
      %103 = vector.broadcast %102 : vector<1x64xf32> to vector<16x64xf32>
      %104 = arith.subf %98, %103 : vector<16x64xf32>
      %105 = arith.mulf %104, %104 : vector<16x64xf32>
      %cst_64 = arith.constant dense<0.000000e+00> : vector<64xf32>
      %106 = vector.multi_reduction <add>, %105, %cst_64 [0] : vector<16x64xf32> to vector<64xf32>
      %107 = vector.shape_cast %106 : vector<64xf32> to vector<1x64xf32>
      %cst_65 = arith.constant 1.600000e+01 : f32
      %108 = vector.broadcast %cst_65 : f32 to vector<1x64xf32>
      %109 = arith.divf %107, %108 : vector<1x64xf32>
      %110 = vector.broadcast %102 : vector<1x64xf32> to vector<16x64xf32>
      %111 = arith.subf %98, %110 : vector<16x64xf32>
      %cst_66 = arith.constant 9.99999974E-6 : f32
      %112 = vector.broadcast %cst_66 : f32 to vector<1x64xf32>
      %113 = arith.addf %109, %112 : vector<1x64xf32>
      %114 = math.rsqrt %113 : vector<1x64xf32>
      %115 = vector.broadcast %114 : vector<1x64xf32> to vector<16x64xf32>
      %116 = arith.mulf %111, %115 : vector<16x64xf32>
      %cst_67 = arith.constant 0.000000e+00 : f32
      %117 = vector.broadcast %cst_67 : f32 to vector<16x64xf32>
      %118 = arith.maximumf %116, %117 : vector<16x64xf32>
      %c0_68 = arith.constant 0 : index
      %c0_69 = arith.constant 0 : index
      %119 = vector.load %arg14[%c0_68, %c0_69] : memref<64x32xf32, #tpu.memory_space<vmem>>, vector<64x32xf32>
      %cst_70 = arith.constant dense<0.000000e+00> : vector<16x32xf32>
      %120 = tpu.matmul %118, %119, %cst_70 {dimension_numbers = #tpu.dot_dimension_numbers<[1], [0], [0], [1], [0, 0, 1, 1], [], []>} : vector<16x64xf32>, vector<64x32xf32>, vector<16x32xf32> -> vector<16x32xf32>
      %c0_71 = arith.constant 0 : index
      %c0_72 = arith.constant 0 : index
      %121 = vector.load %arg15[%c0_71, %c0_72] : memref<1x32xf32, #tpu.memory_space<vmem>>, vector<1x32xf32>
      %122 = vector.broadcast %121 : vector<1x32xf32> to vector<16x32xf32>
      %123 = arith.addf %120, %122 : vector<16x32xf32>
      %c0_73 = arith.constant 0 : index
      %c0_74 = arith.constant 0 : index
      %c0_75 = arith.constant 0 : index
      %124 = vector.load %arg16[%c0_73, %c0_74, %c0_75] : memref<1x16x32xf32, #tpu.memory_space<vmem>>, vector<1x16x32xf32>
      %125 = vector.shape_cast %124 : vector<1x16x32xf32> to vector<16x32xf32>
      %126 = vector.shape_cast %123 : vector<16x32xf32> to vector<1x16x32xf32>
      tpu.vector_store %arg16[%c0_73, %c0_74, %c0_75], %126 {strides = array<i32>} : memref<1x16x32xf32, #tpu.memory_space<vmem>>, vector<1x16x32xf32>,
    } else {
    }
    return
  }
  func.func @transform_0(%arg0: i32, %arg1: i32) -> (i32, i32, i32) {
    %c0_i32 = arith.constant 0 : i32
    %c0_i32_0 = arith.constant 0 : i32
    return %arg0, %arg1, %c0_i32 : i32, i32, i32
  }
  func.func @transform_1(%arg0: i32, %arg1: i32) -> (i32, i32, i32) {
    %c0_i32 = arith.constant 0 : i32
    %c0_i32_0 = arith.constant 0 : i32
    %c0_i32_1 = arith.constant 0 : i32
    return %arg0, %c0_i32, %c0_i32_0 : i32, i32, i32
  }
  func.func @transform_2(%arg0: i32, %arg1: i32) -> (i32, i32) {
    %c0_i32 = arith.constant 0 : i32
    %c0_i32_0 = arith.constant 0 : i32
    %c0_i32_1 = arith.constant 0 : i32
    return %c0_i32, %c0_i32_0 : i32, i32
  }
  func.func @transform_3(%arg0: i32, %arg1: i32) -> (i32, i32) {
    %c0_i32 = arith.constant 0 : i32
    %c0_i32_0 = arith.constant 0 : i32
    %c0_i32_1 = arith.constant 0 : i32
    return %c0_i32, %c0_i32_0 : i32, i32
  }
  func.func @transform_4(%arg0: i32, %arg1: i32) -> (i32, i32) {
    %c0_i32 = arith.constant 0 : i32
    %c0_i32_0 = arith.constant 0 : i32
    %c0_i32_1 = arith.constant 0 : i32
    return %c0_i32, %c0_i32_0 : i32, i32
  }
  func.func @transform_5(%arg0: i32, %arg1: i32) -> (i32, i32) {
    %c0_i32 = arith.constant 0 : i32
    %c0_i32_0 = arith.constant 0 : i32
    %c0_i32_1 = arith.constant 0 : i32
    return %c0_i32, %c0_i32_0 : i32, i32
  }
  func.func @transform_6(%arg0: i32, %arg1: i32) -> (i32, i32) {
    %c0_i32 = arith.constant 0 : i32
    %c0_i32_0 = arith.constant 0 : i32
    %c0_i32_1 = arith.constant 0 : i32
    return %c0_i32, %c0_i32_0 : i32, i32
  }
  func.func @transform_7(%arg0: i32, %arg1: i32) -> (i32, i32) {
    %c0_i32 = arith.constant 0 : i32
    %c0_i32_0 = arith.constant 0 : i32
    %c0_i32_1 = arith.constant 0 : i32
    return %c0_i32, %c0_i32_0 : i32, i32
  }
  func.func @transform_8(%arg0: i32, %arg1: i32) -> (i32, i32) {
    %c0_i32 = arith.constant 0 : i32
    %c0_i32_0 = arith.constant 0 : i32
    %c0_i32_1 = arith.constant 0 : i32
    return %c0_i32, %c0_i32_0 : i32, i32
  }
  func.func @transform_9(%arg0: i32, %arg1: i32) -> (i32, i32) {
    %c0_i32 = arith.constant 0 : i32
    %c0_i32_0 = arith.constant 0 : i32
    %c0_i32_1 = arith.constant 0 : i32
    return %c0_i32, %c0_i32_0 : i32, i32
  }
  func.func @transform_10(%arg0: i32, %arg1: i32) -> (i32, i32) {
    %c0_i32 = arith.constant 0 : i32
    %c0_i32_0 = arith.constant 0 : i32
    %c0_i32_1 = arith.constant 0 : i32
    return %c0_i32, %c0_i32_0 : i32, i32
  }
  func.func @transform_11(%arg0: i32, %arg1: i32) -> (i32, i32) {
    %c0_i32 = arith.constant 0 : i32
    %c0_i32_0 = arith.constant 0 : i32
    %c0_i32_1 = arith.constant 0 : i32
    return %c0_i32, %c0_i32_0 : i32, i32
  }
  func.func @transform_12(%arg0: i32, %arg1: i32) -> (i32, i32) {
    %c0_i32 = arith.constant 0 : i32
    %c0_i32_0 = arith.constant 0 : i32
    %c0_i32_1 = arith.constant 0 : i32
    return %c0_i32, %c0_i32_0 : i32, i32
  }
  func.func @transform_13(%arg0: i32, %arg1: i32) -> (i32, i32) {
    %c0_i32 = arith.constant 0 : i32
    %c0_i32_0 = arith.constant 0 : i32
    %c0_i32_1 = arith.constant 0 : i32
    return %c0_i32, %c0_i32_0 : i32, i32
  }
  func.func @transform_14(%arg0: i32, %arg1: i32) -> (i32, i32, i32) {
    %c0_i32 = arith.constant 0 : i32
    %c0_i32_0 = arith.constant 0 : i32
    %c0_i32_1 = arith.constant 0 : i32
    return %arg0, %c0_i32, %c0_i32_0 : i32, i32, i32
  }
}

</mosaic_0001>

<bundles_post_ra>
// kernel: tpu_custom_call.1
= control target key start
LH: loop header
LB: loop body
LE: loop exit
PB: predicated region body
PF: predicated region fallthrough
CT: control target
= control target key end

     0   :  { %s2551_s0 = inlined_call_operand.vmem [shape: f32[2,16,32], index: 0, kind: input, shape index: {}]   ;;  %s2552_s1 = inlined_call_operand.vmem [shape: f32[2,16,32], index: 1, kind: input, shape index: {}]   ;;  %s2553_s2 = inlined_call_operand.vmem [shape: f32[32,32], index: 2, kind: input, shape index: {}]   ;;  %s2554_s3 = inlined_call_operand.vmem [shape: f32[1,32], index: 3, kind: input, shape index: {}]   ;;  %s2555_s4 = inlined_call_operand.hbm [shape: f32[32,32], index: 4, kind: input, shape index: {}]   ;;  %s2556_s5 = inlined_call_operand.vmem [shape: f32[1,32], index: 5, kind: input, shape index: {}]   ;;  %s2557_s6 = inlined_call_operand.hbm [shape: f32[32,32], index: 6, kind: input, shape index: {}]   ;;  %s2558_s7 = inlined_call_operand.vmem [shape: f32[1,32], index: 7, kind: input, shape index: {}]   ;;  %s2559_s8 = inlined_call_operand.hbm [shape: f32[32,32], index: 8, kind: input, shape index: {}]   ;;  %s2560_s9 = inlined_call_operand.hbm [shape: f32[32,64], index: 9, kind: input, shape index: {}]   ;;  %s2561_s10 = inlined_call_operand.hbm [shape: f32[32,64], index: 10, kind: input, shape index: {}]   ;;  %s2562_s11 = inlined_call_operand.vmem [shape: f32[1,64], index: 11, kind: input, shape index: {}]   ;;  %s2563_s12 = inlined_call_operand.vmem [shape: f32[64,32], index: 12, kind: input, shape index: {}]   ;;  %s2564_s13 = inlined_call_operand.vmem [shape: f32[1,32], index: 13, kind: input, shape index: {}]   ;;  %s2565_s14 = inlined_call_operand.hbm [shape: f32[2,16,32], index: 14, kind: output, shape index: {}]  }
   0x1   :  { %2576 = sst [smem:[#allocation27_spill]] %s2557_s6 }
   0x2   :  { %2577 = sst [smem:[#allocation28_spill]] %s2560_s9 }
   0x3   :  { %2578 = sst [smem:[#allocation29_spill]] %s2564_s13 }
   0x4   :  { %2579 = sst [smem:[#allocation30_spill]] %s2565_s14 }
   0x5   :  { %19 = vsyncpa [#allocation6], 0 }
   0x6   :  { %20 = vsyncpa [#allocation9], 0 }
   0x7   :  { %21 = vsyncpa [#allocation12], 0 }
   0x8   :  { %22 = vsyncpa [#allocation7], 0 }
   0x9   :  { %24 = vsyncpa [#allocation7 + $0x1], 0  ;;  %s2227_s29 = smov 0   ;;  %s2229_s30 = smov 0  }
   0xa   :  { %s2231_s15 = smov 0   ;;  %s2233_s16 = smov 0  }
   0xb   :  { %s2235_s17 = smov 0   ;;  %s2237_s18 = smov 0  }
   0xc LB: > { %2580 = sst [smem:[#allocation19_spill]] %s2117_s29  ;;  %s1647_s19 = sadd.s32 4294967295, %s2137_s18   ;;  %s2137_s18 = sphi %s2237_s18, %s30_s18   ;;  %s2133_s17 = sphi %s2235_s17, %s2604_s17   ;;  %s2129_s16 = sphi %s2233_s16, %s2603_s16   ;;  %s2125_s15 = sphi %s2231_s15, %s2602_s15   ;;  %s2121_s30 = sphi %s2229_s30, %s2606_s30   ;;  %s2117_s29 = sphi %s2227_s29, %s2605_s29  }
   0xd   : > { %2581 = sst [smem:[#allocation20_spill]] %s2125_s15  ;;  %s1648_s20 = sadd.s32 4294967294, %s2137_s18  }
   0xe   : > { %2582 = sst [smem:[#allocation21_spill]] %s2133_s17  ;;  %s42_s21 = sadd.s32 1, %s2133_s17 }
   0xf   : > { %2583 = sst [smem:[#allocation22_spill]] %s2137_s18  ;;  %s355_s22 = sadd.s32 1, %s2125_s15 }
  0x10   : > { %p44_p0 = scmp.ge.s32.totalorder %s42_s21, 2  ;;  %p365_p1 = scmp.ne.s32.totalorder %s2125_s15, %s2121_s30 }
  0x11   : > { %p366_p2 = scmp.eq.s32.totalorder %s1647_s19, 1  ;;  %p371_p3 = scmp.ne.s32.totalorder %s2121_s30, %s2117_s29 }
  0x12   : > { %s2608_s21 = smov (%p44_p0, %s42_s21), 0  ;;  %p372_p5 = scmp.eq.s32.totalorder %s1648_s20, 1 }
  0x13   : > { %2584 = sst [smem:[#allocation23_spill]] %s2608_s21  ;;  %p2267_p4 = por %p366_p2, %p365_p1 }
  0x14   : > { %s352_s24 = ssub.s32 %s2133_s17, %s2608_s21  ;;  %p1649_p6 = scmp.ge.s32.totalorder %s2137_s18, 1 }
  0x15   : > { %s2585_s23 = scalar_select %p2267_p4, 1, 0 }
  0x16   : > { %p353_p7 = scmp.eq.s32.totalorder %s352_s24, 0  ;;  %p2274_p8 = por %p372_p5, %p371_p3 }
  0x17   : > { %2586 = sst [smem:[#allocation24_spill]] %s2585_s23  ;;  %p379_p9 = scmp.lt.s32.totalorder %s2137_s18, 3 }
  0x18   : > { %s2587_s25 = scalar_select %p2274_p8, 1, 0 }
  0x19   : > { %s2280_s26 = scalar_select %p353_p7, %s2125_s15, %s355_s22  }
  0x1a   : > { %2588 = sst [smem:[#allocation25_spill]] %s2587_s25  ;;  %p2282_p10 = pnand %p1649_p6, %p379_p9 }
  0x1b   : > { %2589 = sst [smem:[#allocation26_spill]] %s2280_s26  ;;  %p2286_p11 = scmp.eq.s32.totalorder %s1647_s19, 0 }
  0x1c   : > { %p1749_p12 = pneg %p2282_p10  ;;  %s2592_s6 = sld [smem:[#allocation27_spill]] }
  0x1d   : > { %s2139_s17 = smov [#allocation8]   ;;  %s2594_s9 = sld [smem:[#allocation28_spill]] }
  0x1e   : > { %p2297_p13 = pnand %p2286_p11, %p1749_p12  ;;  %s415_s19 = sshll.u32 %s2139_s17, 4  ;;  %s416_s19 = int_to_ptr.vmem [resolvable:$true] %s415_s19 }
  0x1f   : > { %s2140_s29 = smov 128   ;;  %s2141_s20 = smov 8  }
  0x20   : > { %s2142_s24 = smov [#allocation11]   ;;  %s396_s23 = sshll.u32 %s2555_s4, 4  ;;  %s397_s23 = int_to_ptr.hbm [resolvable:$true] %s396_s23 }
  0x21   : > { %s2143_s15 = smov [#allocation5]   ;;  %s430_s13 = sshll.u32 %s2559_s8, 4  ;;  %s431_s13 = int_to_ptr.hbm [resolvable:$true] %s430_s13 }
  0x22   : > { %s413_s21 = sshll.u32 %s2592_s6, 4  ;;  %s446_s6 = sshll.u32 %s2142_s24, 4  ;;  %s414_s21 = int_to_ptr.hbm [resolvable:$true] %s413_s21  ;;  %s447_s6 = int_to_ptr.vmem [resolvable:$true] %s446_s6 }
  0x23   : > { %s444_s25 = sshll.u32 %s2594_s9, 4  ;;  %s398_s17 = sshll.u32 %s2143_s15, 4  ;;  %s445_s25 = int_to_ptr.hbm [resolvable:$true] %s444_s25  ;;  %s399_s17 = int_to_ptr.vmem [resolvable:$true] %s398_s17 }
  0x24   : > { %1755 = dma.hbm_to_vmem [thread:$0]  (!%p2297_p13), %s414_s21, 512, %s416_s19, [#allocation9], %s2140_s29, %s2140_s29, %s2141_s20  }
  0x25   : > { %1761 = dma.hbm_to_vmem [thread:$0]  (!%p2297_p13), %s445_s25, 512, %s447_s6, [#allocation12], %s2140_s29, %s2140_s29, %s2141_s20  }
  0x26   : > { %1752 = dma.hbm_to_vmem [thread:$0]  (!%p2297_p13), %s397_s23, 512, %s399_s17, [#allocation6], %s2140_s29, %s2140_s29, %s2141_s20  }
  0x27   : > { %s458_s24 = sshll.u32 %s2561_s10, 4  ;;  %s2144_s14 = smov [#allocation10]   ;;  %s459_s24 = int_to_ptr.hbm [resolvable:$true] %s458_s24 }
  0x28   : > { %s432_s18 = sshll.u32 %s2144_s14, 4  ;;  %s2145_s6 = smov [#allocation13]   ;;  %s433_s18 = int_to_ptr.vmem [resolvable:$true] %s432_s18 }
  0x29   : > { %1758 = dma.hbm_to_vmem [thread:$0]  (!%p2297_p13), %s431_s13, 512, %s433_s18, [#allocation9], %s2140_s29, %s2140_s29, %s2141_s20  }
  0x2a   : > { %s460_s25 = sshll.u32 %s2145_s6, 4  ;;  %506 = sbr.rel (%p2282_p10) target bundleno = 1499 (0x5db), region = 76  ;;  %s461_s25 = int_to_ptr.vmem [resolvable:$true] %s460_s25 }
  0x2b   : > { %1764 = dma.hbm_to_vmem [thread:$0]  (!%p2297_p13), %s459_s24, 512, %s461_s25, [#allocation12], %s2140_s29, %s2140_s29, %s2141_s20  }
  0x2f   : > { %2100 = dma.done.wait (%p2286_p11), [#allocation6], 512  }
  0x30   : > { %2102 = vsyncadd (%p2286_p11), [#allocation6], 4294966784 }
  0x31   : > { %2104 = dma.done.wait (%p2286_p11), [#allocation9], 1024  }
  0x32   : > { %2106 = vsyncadd (%p2286_p11), [#allocation9], 4294966272 }
  0x33   : > { %2108 = dma.done.wait (%p2286_p11), [#allocation12], 1024  }
  0x34   : > { %2110 = vsyncadd (%p2286_p11), [#allocation12], 4294966272  ;;  %p583_p0 = scmp.lt.s32.totalorder %s2129_s16, 1  ;;  %v606_v0 = vld [vmem:[#allocation5 + $0x18] sm:$0xff]  ;;  %v605_v1 = vld [vmem:[#allocation5 + $0x10] sm:$0xff]  ;;  %vm611_vm0 = vcmask 261120  }
  0x35   : > { %1719 = vmatpush.msra.mxu2 %v606_v0  ;;  %630 = vmatpush.msra.mxu0 %v606_v0  ;;  %v604_v2 = vld [vmem:[#allocation5 + $0x8] sm:$0xff]  ;;  %v603_v3 = vld [vmem:[#allocation5] sm:$0xff]  ;;  %v679_v8 = vld [vmem:[%s2553_s2 + $0x8] sm:$0xff]  ;;  %vm720_vm1 = vcmask 64512   ;;  %s2147_s23 = smov 112   ;;  %vm756_vm2 = vcmask 130048  }
  0x36   : > { %s584_s9 = scalar_select %p583_p0, %s2129_s16, 1  ;;  %v681_v6 = vld [vmem:[%s2553_s2 + $0x18] sm:$0xff]  ;;  %v680_v7 = vld [vmem:[%s2553_s2 + $0x10] sm:$0xff]  ;;  %v678_v9 = vld [vmem:[%s2553_s2] sm:$0xff] }
  0x37   : > { %1720 = vmatpush.msra.mxu2 %v605_v1  ;;  %631 = vmatpush.msra.mxu0 %v605_v1  ;;  %v644_v12 = vld [vmem:[#allocation8 + $0x18] sm:$0xff]  ;;  %v643_v13 = vld [vmem:[#allocation8 + $0x10] sm:$0xff]  ;;  %v642_v14 = vld [vmem:[#allocation8 + $0x8] sm:$0xff]  ;;  %s579_s20 = sand.u32 1, %s2121_s30   ;;  %s2595_s21 = sld [smem:[#allocation29_spill]] }
  0x38   : > { %s1716_s13 = sshll.u32 %s584_s9, 4  ;;  %1723 = vmatpush.msra.mxu3 %v644_v12  ;;  %661 = vmatpush.msra.mxu1 %v644_v12  ;;  %v641_v15 = vld [vmem:[#allocation8] sm:$0xff]  ;;  %v1856_v16 = vld [vmem:[%s2556_s5] ss:$0 sm:$0xff]  ;;  %s2146_s9 = smov 120  }
  0x39   : > { %s596_s27 = scalar_lea.vmem %s2552_s1, %s1716_s13  ;;  %1721 = vmatpush.msra.mxu2 %v604_v2  ;;  %632 = vmatpush.msra.mxu0 %v604_v2  ;;  %s590_s24 = scalar_lea.vmem %s2551_s0, %s1716_s13  ;;  %v1857_v23 = vld [vmem:[%s2554_s3] ss:$0 sm:$0xff]  ;;  %v834_v43 = vld [vmem:[#allocation10] sm:$0xff] }
  0x3a   : > { %v602_v4 = vld [vmem:[%s596_s27 + $0x8] sm:$0xff]  ;;  %v601_v5 = vld [vmem:[%s596_s27] sm:$0xff]  ;;  %1724 = vmatpush.msra.mxu3 %v643_v13  ;;  %662 = vmatpush.msra.mxu1 %v643_v13  ;;  %s2148_s27 = smov 104   ;;  %s1662_s15 = sshll.u32 %s579_s20, 4 }
  0x3b   : > { %1722 = vmatpush.msra.mxu2 %v603_v3  ;;  %633 = vmatpush.msra.mxu0 %v603_v3  ;;  %v2359_v10 = vld [vmem:[%s590_s24] sm:$0xff]  ;;  %v2363_v11 = vld [vmem:[%s590_s24 + $0x8] sm:$0xff]  ;;  %s1718_s19 = sshll.u32 %s2129_s16, 4  ;;  %s581_s14 = scalar_lea.vmem [#allocation14], %s1662_s15 }
  0x3c   : > { %1668 = vmatmul.msk.f32.vlgmr.msra.gmra.mxu2 %vm611_vm0, %v602_v4  ;;  %1667 = vmatmul.msk.f32.vlgmr.msra.gmra.mxu0 %vm611_vm0, %v601_v5  ;;  %v1858_v28 = vld [vmem:[%s2558_s7] ss:$0 sm:$0xff]  ;;  %s2597_s25 = sld [smem:[#allocation30_spill]]  ;;  %s1504_s13 = sshll.u32 %s581_s14, 4  ;;  %s1505_s13 = int_to_ptr.vmem [resolvable:$true] %s1504_s13 }
  0x3d   : > { %705 = vmatpush.msrb.mxu2 %v681_v6  ;;  %1725 = vmatpush.msra.mxu3 %v642_v14 }
  0x3e   : > { %663 = vmatpush.msra.mxu1 %v642_v14 }
  0x3f   : > { %706 = vmatpush.msrb.mxu2 %v680_v7  ;;  %1726 = vmatpush.msra.mxu3 %v641_v15 }
  0x40   : > { %664 = vmatpush.msra.mxu1 %v641_v15  ;;  %1670 = vmatmul.msk.f32.vlgmr.msra.gmra.mxu3 %vm611_vm0, %v602_v4 }
  0x41   : > { %707 = vmatpush.msrb.mxu2 %v679_v8  ;;  %1669 = vmatmul.msk.f32.vlgmr.msra.gmra.mxu1 %vm611_vm0, %v601_v5 }
  0x42   : > { %s2067_s15 = scalar_lea.hbm %s2597_s25, 32 }
  0x43   : > { %708 = vmatpush.msrb.mxu2 %v678_v9 }
  0x44   : > { %1671 = vmatmul.msk.f32.vlgmr.msrb.gmra.mxu2 %vm611_vm0, %v2359_v10 }
  0x4c   : > { %1672 = vmatmul.msk.f32.gmra.mxu2 %vm611_vm0, %v2363_v11 }
  0xb9   : > { %v635_v17 = vpop.f32.mrf.mxu0 }
  0xba   : > { %v636_v18 = vadd.f32 %v1856_v16, %v635_v17 }
  0xbc   : > { %672 = vst.msk [vmem:[#allocation2] sm:$0xff] %vm611_vm0, %v636_v18 }
  0xbe   : > { %v666_v31 = vpop.f32.mrf.mxu1 }
  0xbf   : > { %v638_v19 = vpop.f32.mrf.mxu2  ;;  %v667_v32 = vadd.f32 %v1858_v28, %v666_v31 }
  0xc0   : > { %v639_v20 = vadd.f32 %v1856_v16, %v638_v19 }
  0xc1   : > { %674 = vst.msk [vmem:[#allocation3] sm:$0xff] %vm611_vm0, %v667_v32 }
  0xc2   : > { %673 = vst.msk [vmem:[#allocation2 + $0x8] sm:$0xff] %vm611_vm0, %v639_v20 }
  0xc3   : > { %v716_v21 = vld [vmem:[#allocation2] sm:$0xff]  ;;  %v669_v29 = vpop.f32.mrf.mxu3 }
  0xc4   : > { %839 = vrot.lane.b32.xlu2 %v716_v21, %s2146_s9  ;;  %v670_v30 = vadd.f32 %v1858_v28, %v669_v29 }
  0xc6   : > { %675 = vst.msk [vmem:[#allocation3 + $0x8] sm:$0xff] %vm611_vm0, %v670_v30 }
  0xc7   : > { %v710_v22 = vpop.f32.mrf.mxu2 }
  0xc8   : > { %v2380_v25 = vadd.f32 %v1857_v23, %v710_v22  ;;  %v718_v34 = vld [vmem:[#allocation3] sm:$0xff] }
  0xc9   : > { %v717_v24 = vld [vmem:[#allocation2 + $0x8] sm:$0xff] }
  0xca   : > { %841 = vrot.lane.b32.xlu1 %v717_v24, %s2146_s9  ;;  %1673 = vmatpush.xpose.msk.msrb.mxu3 %vm720_vm1, %v717_v24 }
  0xcd   : > { %v719_v33 = vld [vmem:[#allocation3 + $0x8] sm:$0xff] }
  0xce   : > { %1674 = vmatpush.xpose.msk.msrb.mxu3 %vm720_vm1, %v716_v21  ;;  %823 = vmatpush.msrb.mxu0 %v719_v33  ;;  %v2400_v35 = vpack.i.bf16 %v718_v34, %v719_v33 }
  0xcf   : > { %v713_v26 = vpop.f32.mrf.mxu2 }
  0xd0   : > { %v2383_v27 = vadd.f32 %v1857_v23, %v713_v26  ;;  %824 = vmatpush.msrb.mxu0 %v718_v34 }
  0xd1   : > { %1675 = vmatmul.msk.f32.vlgmr.msrb.gmra.mxu3 %vm720_vm1, %v2380_v25 }
  0xd2   : > { %1024 = vrot.lane.b32.xlu1 %v717_v24, %s2147_s23  ;;  %837 = vrot.lane.b32.xlu2 %v2383_v27, %s2146_s9 }
  0xd3   : > { %1010 = vmatpush.msra.mxu0 %v834_v43 }
  0xd9   : > { %1676 = vmatmul.msk.f32.gmra.mxu3 %vm720_vm1, %v2383_v27 }
  0xda   : > { %1178 = vrot.lane.b32.xlu1 %v717_v24, %s2148_s27  ;;  %1018 = vrot.lane.b32.xlu2 %v2380_v25, %s2147_s23 }
 0x11e   : > { %v840_v37 = vpop.permute.xlu2 %839 }
 0x12c   : > { %v838_v56 = vpop.permute.xlu2 %837 }
 0x134   : > { %v1019_v58 = vpop.permute.xlu2 %1018 }
 0x13c   : > { %v842_v36 = vpop.permute.xlu1 %841 }
 0x13d   : > { %1679 = vmatpush.xpose.msk.msrb.mxu1 %vm720_vm1, %v842_v36 }
 0x141   : > { %1680 = vmatpush.xpose.msk.msrb.mxu1 %vm720_vm1, %v840_v37 }
 0x144   : > { %v1025_v38 = vpop.permute.xlu1 %1024 }
 0x145   : > { %1689 = vmatpush.xpose.msk.msra.mxu1 %vm720_vm1, %v1025_v38 }
 0x14c   : > { %v1179_v51 = vpop.permute.xlu1 %1178 }
 0x154   : > { %v750_v39 = vpop.f32.mrf.mxu3 }
 0x155   : > { %v757_v40 = vsel %vm756_vm2, %v750_v39, -inf }
 0x156   : > { %758 = vmax.xlane.f32.xlu0 %v757_v40 }
 0x15c   : > { %v753_v41 = vpop.f32.mrf.mxu3 }
 0x15d   : > { %v760_v42 = vsel %vm756_vm2, %v753_v41, -inf }
 0x15e   : > { %761 = vmax.xlane.f32.xlu0 %v760_v42 }
 0x172   : > { %835 = vrot.lane.b32.xlu0 %v2380_v25, %s2146_s9 }
 0x17a   : > { %1022 = vrot.lane.b32.xlu0 %v716_v21, %s2147_s23 }
 0x182   : > { %1176 = vrot.lane.b32.xlu0 %v716_v21, %s2148_s27 }
 0x18a   : > { %1174 = vrot.lane.b32.xlu0 %v2383_v27, %s2148_s27 }
 0x192   : > { %1842 = vrot.lane.b32.xlu0 %v2400_v35, %s2146_s9  ;;  %s1503_s9 = scalar_lea.hbm %s2597_s25, %s1718_s19 }
 0x193   : > { %s1506_s29 = sshll.u32 %s1503_s9, 4  ;;  %s1507_s29 = int_to_ptr.hbm [resolvable:$true] %s1506_s29 }
 0x1c9   : > { %v759_v44 = vpop.xlane.xlu0 %758 }
 0x1ca   : > { %v763_v45 = vsub.f32 %v750_v39, %v759_v44 }
 0x1cc   : > { %v765_v46 = vmul.f32 1.442695, %v763_v45 }
 0x1ce   : > { %1861 = vpow2.f32 %v765_v46 }
 0x1d1   : > { %v762_v47 = vpop.xlane.xlu0 %761 }
 0x1d2   : > { %v764_v48 = vsub.f32 %v753_v41, %v762_v47 }
 0x1d4   : > { %v1862_v49 = vpop.eup %1861  ;;  %v767_v50 = vmul.f32 1.442695, %v764_v48 }
 0x1d5   : > { %1677 = vmatmul.msk.f32.vlgmr.msrb.gmra.mxu0 %vm756_vm2, %v1862_v49  ;;  %v769_v52 = vsel %vm756_vm2, %v1862_v49, 0.0 }
 0x1d6   : > { %1863 = vpow2.f32 %v767_v50  ;;  %1697 = vmatpush.xpose.msk.msrb.mxu0 %vm720_vm1, %v1179_v51  ;;  %770 = vadd.xlane.f32.xlu1 %v769_v52 }
 0x1dc   : > { %v1864_v53 = vpop.eup %1863 }
 0x1dd   : > { %1678 = vmatmul.msk.f32.gmra.mxu0 %vm756_vm2, %v1864_v53  ;;  %v772_v54 = vsel %vm756_vm2, %v1864_v53, 0.0 }
 0x1de   : > { %773 = vadd.xlane.f32.xlu2 %v772_v54 }
 0x1e4   : > { %v836_v55 = vpop.permute.xlu0 %835 }
 0x1e5   : > { %1681 = vmatmul.msk.f32.vlgmr.msrb.gmra.mxu1 %vm720_vm1, %v836_v55 }
 0x1ec   : > { %v1023_v57 = vpop.permute.xlu0 %1022 }
 0x1ed   : > { %1682 = vmatmul.msk.f32.gmra.mxu1 %vm720_vm1, %v838_v56 }
 0x1ee   : > { %1690 = vmatpush.xpose.msk.msra.mxu1 %vm720_vm1, %v1023_v57 }
 0x1ef   : > { %1172 = vrot.lane.b32.xlu1 %v2380_v25, %s2148_s27 }
 0x1f4   : > { %v1177_v59 = vpop.permute.xlu0 %1176 }
 0x1f5   : > { %1691 = vmatmul.msk.f32.vlgmr.msra.gmra.mxu1 %vm720_vm1, %v1019_v58  ;;  %1698 = vmatpush.xpose.msk.msrb.mxu0 %vm720_vm1, %v1177_v59 }
 0x1f6   : > { %1020 = vrot.lane.b32.xlu2 %v2383_v27, %s2147_s23 }
 0x1fc   : > { %v1175_v60 = vpop.permute.xlu0 %1174 }
 0x204   : > { %v1843_v61 = vpop.permute.xlu0 %1842 }
 0x205   : > { %v1844_v62 = vunpack.i.l.bf16 %v1843_v61  ;;  %v1845_v63 = vunpack.i.h.bf16 %v1843_v61 }
 0x207   : > { %948 = vmatpush.msra.mxu2 %v1844_v62 }
 0x209   : > { %949 = vmatpush.msra.mxu2 %v1845_v63 }
 0x249   : > { %v771_v0 = vpop.xlane.xlu1 %770 }
 0x24a   : > { %1865 = vrcp.f32 %v771_v0  ;;  %v786_v5 = vand.u32 2147483648, %v771_v0  ;;  %v784_v7 = vand.u32 2147483647, %v771_v0  ;;  %vm780_vm4 = vweird.f32 %v771_v0 }
 0x24c   : > { %v787_v12 = vor.u32 1.1754944e-38, %v786_v5  ;;  %vm785_vm6 = vcmp.eq.f32.partialorder %v784_v7, 8.507059e+37 }
 0x250   : > { %v1866_v1 = vpop.eup %1865 }
 0x251   : > { %v776_v2 = vmul.f32 %v1866_v1, %v771_v0  ;;  %v774_v3 = vpop.xlane.xlu2 %773  ;;  %vm781_vm3 = vweird.f32 %v1866_v1 }
 0x252   : > { %1867 = vrcp.f32 %v774_v3  ;;  %vm782_vm5 = vmor %vm780_vm4, %vm781_vm3  ;;  %v826_v13 = vpop.f32.mrf.mxu0  ;;  %v800_v20 = vand.u32 2147483648, %v774_v3  ;;  %v798_v22 = vand.u32 2147483647, %v774_v3  ;;  %vm794_vm8 = vweird.f32 %v774_v3 }
 0x253   : > { %v777_v4 = vsub.f32 1.0, %v776_v2 }
 0x254   : > { %v801_v24 = vor.u32 1.1754944e-38, %v800_v20  ;;  %vm799_vm10 = vcmp.eq.f32.partialorder %v798_v22, 8.507059e+37 }
 0x255   : > { %v778_v6 = vmul.f32 %v1866_v1, %v777_v4 }
 0x257   : > { %v779_v8 = vadd.f32 %v1866_v1, %v778_v6 }
 0x258   : > { %v1868_v9 = vpop.eup %1867 }
 0x259   : > { %v790_v14 = vmul.f32 %v1868_v9, %v774_v3  ;;  %v783_v15 = vsel %vm782_vm5, %v1866_v1, %v779_v8  ;;  %v1021_v16 = vpop.permute.xlu2 %1020  ;;  %vm795_vm7 = vweird.f32 %v1868_v9 }
 0x25a   : > { %v788_v17 = vsel %vm785_vm6, %v787_v12, %v783_v15  ;;  %1692 = vmatmul.msk.f32.gmra.mxu1 %vm720_vm1, %v1021_v16  ;;  %vm796_vm9 = vmor %vm794_vm8, %vm795_vm7  ;;  %v829_v27 = vpop.f32.mrf.mxu0 }
 0x25b   : > { %v791_v18 = vsub.f32 1.0, %v790_v14  ;;  %v832_v19 = vmul.f32 %v826_v13, %v788_v17 }
 0x25d   : > { %v792_v21 = vmul.f32 %v1868_v9, %v791_v18  ;;  %1687 = vmatmul.msk.f32.vlgmr.msra.gmra.mxu0 %vm720_vm1, %v832_v19 }
 0x25f   : > { %v793_v23 = vadd.f32 %v1868_v9, %v792_v21 }
 0x261   : > { %v797_v25 = vsel %vm796_vm9, %v1868_v9, %v793_v23  ;;  %v1173_v33 = vpop.permute.xlu1 %1172  ;;  %v959_v9 = vld [vmem:[#allocation10 + $0x8] sm:$0xff] }
 0x262   : > { %v802_v26 = vsel %vm799_vm10, %v801_v24, %v797_v25  ;;  %v868_v28 = vpop.f32.mrf.mxu1  ;;  %981 = vmatpush.msra.mxu3 %v959_v9 }
 0x263   : > { %v833_v29 = vmul.f32 %v829_v27, %v802_v26  ;;  %v874_v30 = vsel %vm756_vm2, %v868_v28, -inf }
 0x264   : > { %875 = vmax.xlane.f32.xlu2 %v874_v30 }
 0x265   : > { %1688 = vmatmul.msk.f32.gmra.mxu0 %vm720_vm1, %v833_v29 }
 0x26a   : > { %v871_v31 = vpop.f32.mrf.mxu1 }
 0x26b   : > { %v877_v32 = vsel %vm756_vm2, %v871_v31, -inf }
 0x26c   : > { %878 = vmax.xlane.f32.xlu1 %v877_v32 }
 0x26d   : > { %1699 = vmatmul.msk.f32.vlgmr.msrb.gmra.mxu0 %vm720_vm1, %v1173_v33 }
 0x272   : > { %v1051_v34 = vpop.f32.mrf.mxu1 }
 0x273   : > { %v1057_v36 = vsel %vm756_vm2, %v1051_v34, -inf }
 0x274   : > { %1058 = vmax.xlane.f32.xlu0 %v1057_v36 }
 0x275   : > { %1700 = vmatmul.msk.f32.gmra.mxu0 %vm720_vm1, %v1175_v60 }
 0x288   : > { %1852 = vrot.lane.b32.xlu0 %v2400_v35, %s2148_s27  ;;  %s2061_s27 = sshra.s32 %s1507_s29, 4  ;;  %s2062_s27 = int_to_ptr.hbm [resolvable:$true] %s2061_s27 }
 0x289   : > { %s2063_s16 = scalar_lea.hbm %s2062_s27, 16  ;;  %p2068_p5 = scmp.lt.s32.totalorder %s2062_s27, %s2597_s25 }
 0x28a   : > { %p2064_p1 = scmp.ne.s32.totalorder %s2062_s27, %s2063_s16  ;;  %p2069_p6 = scmp.lt.s32.totalorder %s2067_s15, %s2063_s16 }
 0x28c   : > { %p2065_p2 = pnand %p2064_p1, %p2267_p4  ;;  %p2070_p7 = por %p2069_p6, %p2068_p5 }
 0x28e   : > { %p2066_p3 = pneg %p2065_p2 }
 0x290   : > { %p2071_p9 = pnand %p2070_p7, %p2066_p3 }
 0x2d7   : > { %v876_v37 = vpop.xlane.xlu2 %875  ;;  %v1054_v38 = vpop.f32.mrf.mxu1 }
 0x2d8   : > { %v880_v39 = vsub.f32 %v868_v28, %v876_v37  ;;  %v1060_v40 = vsel %vm756_vm2, %v1054_v38, -inf }
 0x2d9   : > { %1061 = vmax.xlane.f32.xlu2 %v1060_v40 }
 0x2da   : > { %v882_v41 = vmul.f32 1.442695, %v880_v39  ;;  %v2440_v42 = vpop.f32.mrf.mxu0 }
 0x2dc   : > { %1869 = vpow2.f32 %v882_v41 }
 0x2df   : > { %v879_v43 = vpop.xlane.xlu1 %878 }
 0x2e0   : > { %v881_v44 = vsub.f32 %v871_v31, %v879_v43 }
 0x2e2   : > { %v1870_v45 = vpop.eup %1869  ;;  %v884_v46 = vmul.f32 1.442695, %v881_v44  ;;  %v2442_v47 = vpop.f32.mrf.mxu0 }
 0x2e3   : > { %1683 = vmatmul.msk.f32.vlgmr.msra.gmra.mxu2 %vm756_vm2, %v1870_v45  ;;  %v886_v56 = vsel %vm756_vm2, %v1870_v45, 0.0 }
 0x2e4   : > { %1871 = vpow2.f32 %v884_v46 }
 0x2e7   : > { %v1059_v51 = vpop.xlane.xlu0 %1058 }
 0x2e8   : > { %v1063_v59 = vsub.f32 %v1051_v34, %v1059_v51 }
 0x2ea   : > { %v1872_v48 = vpop.eup %1871  ;;  %v1205_v49 = vpop.f32.mrf.mxu0  ;;  %v1065_v60 = vmul.f32 1.442695, %v1063_v59 }
 0x2eb   : > { %1684 = vmatmul.msk.f32.gmra.mxu2 %vm756_vm2, %v1872_v48  ;;  %v1211_v50 = vsel %vm756_vm2, %v1205_v49, -inf  ;;  %v889_v58 = vsel %vm756_vm2, %v1872_v48, 0.0 }
 0x2ec   : > { %1212 = vmax.xlane.f32.xlu1 %v1211_v50  ;;  %1873 = vpow2.f32 %v1065_v60 }
 0x2f1   : > { %1847 = vrot.lane.b32.xlu2 %v2400_v35, %s2147_s23  ;;  %s1492_s23 = scalar_lea.sflag [#allocation7], %s579_s20 }
 0x2f2   : > { %v1208_v52 = vpop.f32.mrf.mxu0  ;;  %v1874_v35 = vpop.eup %1873 }
 0x2f3   : > { %v1214_v53 = vsel %vm756_vm2, %v1208_v52, -inf  ;;  %v1069_v61 = vsel %vm756_vm2, %v1874_v35, 0.0 }
 0x2f4   : > { %1215 = vmax.xlane.f32.xlu1 %v1214_v53 }
 0x2fa   : > { %v1853_v54 = vpop.permute.xlu0 %1852 }
 0x2fb   : > { %v1854_v55 = vunpack.i.l.bf16 %v1853_v54  ;;  %v1855_v57 = vunpack.i.h.bf16 %v1853_v54 }
 0x2fc   : > { %887 = vadd.xlane.f32.xlu1 %v886_v56 }
 0x2fd   : > { %1283 = vmatpush.msrb.mxu1 %v1854_v55 }
 0x2ff   : > { %1284 = vmatpush.msrb.mxu1 %v1855_v57 }
 0x304   : > { %890 = vadd.xlane.f32.xlu1 %v889_v58 }
 0x31a   : > { %1070 = vadd.xlane.f32.xlu2 %v1069_v61 }
 0x34c   : > { %v1062_v62 = vpop.xlane.xlu2 %1061 }
 0x34d   : > { %v1064_v63 = vsub.f32 %v1054_v38, %v1062_v62 }
 0x34f   : > { %v1067_v0 = vmul.f32 1.442695, %v1064_v63 }
 0x351   : > { %1875 = vpow2.f32 %v1067_v0 }
 0x354   : > { %v1848_v1 = vpop.permute.xlu2 %1847 }
 0x355   : > { %v1849_v2 = vunpack.i.l.bf16 %v1848_v1  ;;  %v1850_v4 = vunpack.i.h.bf16 %v1848_v1 }
 0x357   : > { %v1876_v3 = vpop.eup %1875  ;;  %1129 = vmatpush.msrb.mxu2 %v1849_v2 }
 0x358   : > { %v1072_v5 = vsel %vm756_vm2, %v1876_v3, 0.0 }
 0x359   : > { %1073 = vadd.xlane.f32.xlu1 %v1072_v5  ;;  %1130 = vmatpush.msrb.mxu2 %v1850_v4 }
 0x35a   : > { %1693 = vmatmul.msk.f32.vlgmr.msrb.gmra.mxu2 %vm756_vm2, %v1874_v35 }
 0x35f   : > { %v1213_v6 = vpop.xlane.xlu1 %1212 }
 0x360   : > { %v1217_v7 = vsub.f32 %v1205_v49, %v1213_v6  ;;  %v1140_v49 = vld [vmem:[#allocation10 + $0x10] sm:$0xff] }
 0x361   : > { %1162 = vmatpush.msrb.mxu3 %v1140_v49  ;;  %v1326_v49 = vld [vmem:[#allocation11] sm:$0xff] }
 0x362   : > { %v1219_v8 = vmul.f32 1.442695, %v1217_v7  ;;  %1694 = vmatmul.msk.f32.gmra.mxu2 %vm756_vm2, %v1876_v3 }
 0x364   : > { %1877 = vpow2.f32 %v1219_v8 }
 0x366   : > { %v951_v29 = vpop.f32.mrf.mxu2 }
 0x367   : > { %v1216_v12 = vpop.xlane.xlu1 %1215 }
 0x368   : > { %v1218_v13 = vsub.f32 %v1208_v52, %v1216_v12  ;;  %v1294_v52 = vld [vmem:[#allocation10 + $0x18] sm:$0xff] }
 0x369   : > { %1316 = vmatpush.msra.mxu2 %v1294_v52 }
 0x36a   : > { %v1878_v14 = vpop.eup %1877  ;;  %v1221_v15 = vmul.f32 1.442695, %v1218_v13 }
 0x36b   : > { %1701 = vmatmul.msk.f32.vlgmr.msrb.gmra.mxu1 %vm756_vm2, %v1878_v14  ;;  %v1223_v16 = vsel %vm756_vm2, %v1878_v14, 0.0 }
 0x36c   : > { %1879 = vpow2.f32 %v1221_v15  ;;  %1224 = vadd.xlane.f32.xlu0 %v1223_v16 }
 0x36e   : > { %v954_v44 = vpop.f32.mrf.mxu2 }
 0x36f   : > { %v888_v17 = vpop.xlane.xlu1 %887 }
 0x370   : > { %1881 = vrcp.f32 %v888_v17  ;;  %v903_v24 = vand.u32 2147483648, %v888_v17  ;;  %v901_v26 = vand.u32 2147483647, %v888_v17  ;;  %vm897_vm12 = vweird.f32 %v888_v17 }
 0x372   : > { %v1880_v18 = vpop.eup %1879  ;;  %v904_v30 = vor.u32 1.1754944e-38, %v903_v24  ;;  %vm902_vm14 = vcmp.eq.f32.partialorder %v901_v26, 8.507059e+37 }
 0x373   : > { %1702 = vmatmul.msk.f32.gmra.mxu1 %vm756_vm2, %v1880_v18  ;;  %v1226_v19 = vsel %vm756_vm2, %v1880_v18, 0.0 }
 0x374   : > { %1227 = vadd.xlane.f32.xlu1 %v1226_v19 }
 0x376   : > { %v1882_v20 = vpop.eup %1881 }
 0x377   : > { %v893_v21 = vmul.f32 %v1882_v20, %v888_v17  ;;  %v891_v22 = vpop.xlane.xlu1 %890  ;;  %vm898_vm11 = vweird.f32 %v1882_v20 }
 0x378   : > { %1883 = vrcp.f32 %v891_v22  ;;  %vm899_vm13 = vmor %vm897_vm12, %vm898_vm11  ;;  %v917_v37 = vand.u32 2147483648, %v891_v22  ;;  %v915_v39 = vand.u32 2147483647, %v891_v22  ;;  %vm911_vm2 = vweird.f32 %v891_v22 }
 0x379   : > { %v894_v23 = vsub.f32 1.0, %v893_v21 }
 0x37a   : > { %v918_v41 = vor.u32 1.1754944e-38, %v917_v37  ;;  %vm916_vm4 = vcmp.eq.f32.partialorder %v915_v39, 8.507059e+37 }
 0x37b   : > { %v895_v25 = vmul.f32 %v1882_v20, %v894_v23 }
 0x37d   : > { %v896_v27 = vadd.f32 %v1882_v20, %v895_v25 }
 0x37e   : > { %v1884_v28 = vpop.eup %1883 }
 0x37f   : > { %v900_v31 = vsel %vm899_vm13, %v1882_v20, %v896_v27  ;;  %v907_v32 = vmul.f32 %v1884_v28, %v891_v22  ;;  %vm912_vm15 = vweird.f32 %v1884_v28 }
 0x380   : > { %v905_v33 = vsel %vm902_vm14, %v904_v30, %v900_v31  ;;  %vm913_vm3 = vmor %vm911_vm2, %vm912_vm15 }
 0x381   : > { %v908_v34 = vsub.f32 1.0, %v907_v32  ;;  %v957_v36 = vmul.f32 %v951_v29, %v905_v33 }
 0x383   : > { %v909_v38 = vmul.f32 %v1884_v28, %v908_v34  ;;  %1685 = vmatmul.msk.f32.vlgmr.msra.gmra.mxu3 %vm720_vm1, %v957_v36 }
 0x385   : > { %v910_v40 = vadd.f32 %v1884_v28, %v909_v38 }
 0x387   : > { %v914_v43 = vsel %vm913_vm3, %v1884_v28, %v910_v40  ;;  %v1333_v40 = vld [vmem:[#allocation13 + $0x18] sm:$0xff] }
 0x388   : > { %v919_v45 = vsel %vm916_vm4, %v918_v41, %v914_v43  ;;  %1352 = vmatpush.msra.mxu3 %v1333_v40  ;;  %v1332_v41 = vld [vmem:[#allocation13 + $0x10] sm:$0xff]  ;;  %v1329_v43 = vld [vmem:[#allocation11 + $0x18] sm:$0xff] }
 0x389   : > { %v958_v46 = vmul.f32 %v954_v44, %v919_v45  ;;  %v1331_v44 = vld [vmem:[#allocation13 + $0x8] sm:$0xff]  ;;  %1375 = vmatpush.msra.mxu0 %v1329_v43  ;;  %v1328_v45 = vld [vmem:[#allocation11 + $0x10] sm:$0xff] }
 0x38a   : > { %1353 = vmatpush.msra.mxu3 %v1332_v41 }
 0x38b   : > { %1686 = vmatmul.msk.f32.gmra.mxu3 %vm720_vm1, %v958_v46  ;;  %1376 = vmatpush.msra.mxu0 %v1328_v45  ;;  %v1330_v46 = vld [vmem:[#allocation13] sm:$0xff] }
 0x38c   : > { %1354 = vmatpush.msra.mxu3 %v1331_v44 }
 0x38d   : > { %v1071_v48 = vpop.xlane.xlu2 %1070 }
 0x38e   : > { %1885 = vrcp.f32 %v1071_v48  ;;  %v1086_v60 = vand.u32 2147483648, %v1071_v48  ;;  %vm1080_vm6 = vweird.f32 %v1071_v48  ;;  %v1084_v35 = vand.u32 2147483647, %v1071_v48  ;;  %1355 = vmatpush.msra.mxu3 %v1330_v46 }
 0x390   : > { %v1087_v63 = vor.u32 1.1754944e-38, %v1086_v60  ;;  %vm1085_vm8 = vcmp.eq.f32.partialorder %v1084_v35, 8.507059e+37 }
 0x394   : > { %v1886_v50 = vpop.eup %1885 }
 0x395   : > { %v1076_v51 = vmul.f32 %v1886_v50, %v1071_v48  ;;  %vm1081_vm5 = vweird.f32 %v1886_v50  ;;  %v1327_v48 = vld [vmem:[#allocation11 + $0x8] sm:$0xff] }
 0x396   : > { %vm1082_vm7 = vmor %vm1080_vm6, %vm1081_vm5  ;;  %1377 = vmatpush.msra.mxu0 %v1327_v48 }
 0x397   : > { %v1077_v54 = vsub.f32 1.0, %v1076_v51 }
 0x398   : > { %1378 = vmatpush.msra.mxu0 %v1326_v49 }
 0x399   : > { %v1078_v55 = vmul.f32 %v1886_v50, %v1077_v54  ;;  %1707 = vmatmul.msk.f32.vlgmr.msra.gmra.mxu0 %vm611_vm0, %v2359_v10  ;;  %v1455_v10 = vld [vmem:[%s2563_s12 + $0x38] sm:$0xff] }
 0x39a   : > { %1474 = vmatpush.msra.mxu1 %v1455_v10 }
 0x39b   : > { %v1079_v59 = vadd.f32 %v1886_v50, %v1078_v55 }
 0x39d   : > { %v1083_v61 = vsel %vm1082_vm7, %v1886_v50, %v1079_v59 }
 0x39e   : > { %v1088_v0 = vsel %vm1085_vm8, %v1087_v63, %v1083_v61  ;;  %v1451_v61 = vld [vmem:[%s2563_s12 + $0x18] sm:$0xff]  ;;  %v1449_v63 = vld [vmem:[%s2563_s12 + $0x8] sm:$0xff] }
 0x3a1   : > { %1708 = vmatmul.msk.f32.gmra.mxu0 %vm611_vm0, %v2363_v11  ;;  %v1454_v11 = vld [vmem:[%s2563_s12 + $0x30] sm:$0xff] }
 0x3a2   : > { %1475 = vmatpush.msra.mxu1 %v1454_v11 }
 0x3cc   : > { %v1074_v53 = vpop.xlane.xlu1 %1073 }
 0x3cd   : > { %1887 = vrcp.f32 %v1074_v53  ;;  %v1100_v5 = vand.u32 2147483648, %v1074_v53  ;;  %vm1094_vm10 = vweird.f32 %v1074_v53  ;;  %v1098_v6 = vand.u32 2147483647, %v1074_v53 }
 0x3cf   : > { %v1101_v8 = vor.u32 1.1754944e-38, %v1100_v5  ;;  %vm1099_vm12 = vcmp.eq.f32.partialorder %v1098_v6, 8.507059e+37 }
 0x3d3   : > { %v1888_v56 = vpop.eup %1887 }
 0x3d4   : > { %v1090_v57 = vmul.f32 %v1888_v56, %v1074_v53  ;;  %vm1095_vm9 = vweird.f32 %v1888_v56 }
 0x3d5   : > { %vm1096_vm11 = vmor %vm1094_vm10, %vm1095_vm9 }
 0x3d6   : > { %v1091_v58 = vsub.f32 1.0, %v1090_v57 }
 0x3d8   : > { %v1092_v62 = vmul.f32 %v1888_v56, %v1091_v58 }
 0x3da   : > { %v1093_v3 = vadd.f32 %v1888_v56, %v1092_v62  ;;  %v1450_v62 = vld [vmem:[%s2563_s12 + $0x10] sm:$0xff] }
 0x3dc   : > { %v1097_v7 = vsel %vm1096_vm11, %v1888_v56, %v1093_v3 }
 0x3dd   : > { %v1132_v1 = vpop.f32.mrf.mxu2  ;;  %v1102_v9 = vsel %vm1099_vm12, %v1101_v8, %v1097_v7  ;;  %v2149_v8 = vmov 16.0  }
 0x3de   : > { %v1138_v2 = vmul.f32 %v1132_v1, %v1088_v0  ;;  %v1448_v0 = vld [vmem:[%s2563_s12] sm:$0xff] }
 0x3df   : > { %v1225_v4 = vpop.xlane.xlu0 %1224 }
 0x3e0   : > { %1889 = vrcp.f32 %v1225_v4  ;;  %1695 = vmatmul.msk.f32.vlgmr.msrb.gmra.mxu3 %vm720_vm1, %v1138_v2  ;;  %v1240_v18 = vand.u32 2147483648, %v1225_v4  ;;  %v1238_v20 = vand.u32 2147483647, %v1225_v4  ;;  %vm1234_vm14 = vweird.f32 %v1225_v4  ;;  %v1859_v2 = vld [vmem:[%s2562_s11] ss:$0 sm:$0xff] }
 0x3e2   : > { %v1241_v23 = vor.u32 1.1754944e-38, %v1240_v18  ;;  %vm1239_vm2 = vcmp.eq.f32.partialorder %v1238_v20, 8.507059e+37 }
 0x3e5   : > { %v1135_v12 = vpop.f32.mrf.mxu2 }
 0x3e6   : > { %v1890_v13 = vpop.eup %1889  ;;  %v1139_v14 = vmul.f32 %v1135_v12, %v1102_v9 }
 0x3e7   : > { %v1230_v15 = vmul.f32 %v1890_v13, %v1225_v4  ;;  %v1228_v16 = vpop.xlane.xlu1 %1227  ;;  %vm1235_vm13 = vweird.f32 %v1890_v13 }
 0x3e8   : > { %1891 = vrcp.f32 %v1228_v16  ;;  %1696 = vmatmul.msk.f32.gmra.mxu3 %vm720_vm1, %v1139_v14  ;;  %vm1236_vm15 = vmor %vm1234_vm14, %vm1235_vm13  ;;  %v1286_v24 = vpop.f32.mrf.mxu1  ;;  %v1254_v30 = vand.u32 2147483648, %v1228_v16  ;;  %v1252_v32 = vand.u32 2147483647, %v1228_v16  ;;  %vm1248_vm4 = vweird.f32 %v1228_v16 }
 0x3e9   : > { %v1231_v17 = vsub.f32 1.0, %v1230_v15  ;;  %1893 = vrcp.f32 %v2149_v8 }
 0x3ea   : > { %v1255_v34 = vor.u32 1.1754944e-38, %v1254_v30  ;;  %vm1253_vm6 = vcmp.eq.f32.partialorder %v1252_v32, 8.507059e+37 }
 0x3eb   : > { %v1232_v19 = vmul.f32 %v1890_v13, %v1231_v17 }
 0x3ed   : > { %v1233_v21 = vadd.f32 %v1890_v13, %v1232_v19 }
 0x3ee   : > { %v1892_v22 = vpop.eup %1891 }
 0x3ef   : > { %v1244_v25 = vmul.f32 %v1892_v22, %v1228_v16  ;;  %v1237_v26 = vsel %vm1236_vm15, %v1890_v13, %v1233_v21  ;;  %vm1249_vm3 = vweird.f32 %v1892_v22  ;;  %v1894_v13 = vpop.eup %1893 }
 0x3f0   : > { %v1242_v27 = vsel %vm1239_vm2, %v1241_v23, %v1237_v26  ;;  %vm1250_vm5 = vmor %vm1248_vm4, %vm1249_vm3  ;;  %v1289_v38 = vpop.f32.mrf.mxu1  ;;  %v1412_v14 = vmul.f32 16.0, %v1894_v13  ;;  %vm1416_vm7 = vweird.f32 %v1894_v13 }
 0x3f1   : > { %v1245_v28 = vsub.f32 1.0, %v1244_v25  ;;  %v1292_v29 = vmul.f32 %v1286_v24, %v1242_v27 }
 0x3f2   : > { %v1413_v19 = vsub.f32 1.0, %v1412_v14 }
 0x3f3   : > { %v1246_v31 = vmul.f32 %v1892_v22, %v1245_v28  ;;  %1703 = vmatmul.msk.f32.vlgmr.msra.gmra.mxu2 %vm720_vm1, %v1292_v29 }
 0x3f5   : > { %v1247_v33 = vadd.f32 %v1892_v22, %v1246_v31 }
 0x3f7   : > { %v1251_v36 = vsel %vm1250_vm5, %v1892_v22, %v1247_v33  ;;  %v1414_v22 = vmul.f32 %v1894_v13, %v1413_v19 }
 0x3f8   : > { %v1256_v37 = vsel %vm1253_vm6, %v1255_v34, %v1251_v36 }
 0x3f9   : > { %v1293_v39 = vmul.f32 %v1289_v38, %v1256_v37  ;;  %v1415_v25 = vadd.f32 %v1894_v13, %v1414_v22 }
 0x3fb   : > { %1704 = vmatmul.msk.f32.gmra.mxu2 %vm720_vm1, %v1293_v39  ;;  %vm1394_vm1 = vcmask 523264   ;;  %v1417_v28 = vsel %vm1416_vm7, %v1894_v13, %v1415_v25 }
 0x406   : > { %v983_v50 = vpop.f32.mrf.mxu3 }
 0x407   : > { %v1013_v53 = vadd.f32 %v2440_v42, %v983_v50  ;;  %v1453_v42 = vld [vmem:[%s2563_s12 + $0x28] sm:$0xff] }
 0x408   : > { %1476 = vmatpush.msra.mxu1 %v1453_v42 }
 0x40e   : > { %v986_v51 = vpop.f32.mrf.mxu3 }
 0x40f   : > { %v1016_v58 = vadd.f32 %v2442_v47, %v986_v51  ;;  %v1452_v47 = vld [vmem:[%s2563_s12 + $0x20] sm:$0xff] }
 0x410   : > { %1477 = vmatpush.msra.mxu1 %v1452_v47 }
 0x412   : > { %1478 = vmatpush.msra.mxu1 %v1451_v61 }
 0x414   : > { %1479 = vmatpush.msra.mxu1 %v1450_v62 }
 0x416   : > { %1480 = vmatpush.msra.mxu1 %v1449_v63  ;;  %v1380_v1 = vpop.f32.mrf.mxu0 }
 0x418   : > { %1481 = vmatpush.msra.mxu1 %v1448_v0 }
 0x41e   : > { %v1383_v6 = vpop.f32.mrf.mxu0 }
 0x463   : > { %v1164_v52 = vpop.f32.mrf.mxu3 }
 0x464   : > { %v1170_v54 = vadd.f32 %v1164_v52, %v1013_v53 }
 0x46b   : > { %v1167_v57 = vpop.f32.mrf.mxu3 }
 0x46c   : > { %v1171_v59 = vadd.f32 %v1167_v57, %v1016_v58 }
 0x476   : > { %v1318_v55 = vpop.f32.mrf.mxu2 }
 0x477   : > { %v1324_v56 = vadd.f32 %v1318_v55, %v1170_v54 }
 0x479   : > { %1705 = vmatmul.msk.f32.vlgmr.msra.gmra.mxu3 %vm611_vm0, %v1324_v56 }
 0x47e   : > { %v1321_v60 = vpop.f32.mrf.mxu2 }
 0x47f   : > { %v1325_v35 = vadd.f32 %v1321_v60, %v1171_v59  ;;  %v1860_v60 = vld [vmem:[%s2595_s21] ss:$0 sm:$0xff] }
 0x481   : > { %1706 = vmatmul.msk.f32.gmra.mxu3 %vm611_vm0, %v1325_v35 }
 0x4fc   : > { %v1357_v3 = vpop.f32.mrf.mxu3 }
 0x4fd   : > { %v1381_v4 = vadd.f32 %v1380_v1, %v1357_v3 }
 0x4ff   : > { %v1390_v5 = vadd.f32 %v1859_v2, %v1381_v4 }
 0x501   : > { %1395 = vst.msk [vmem:[#allocation4] sm:$0xff] %vm1394_vm1, %v1390_v5 }
 0x504   : > { %v1360_v7 = vpop.f32.mrf.mxu3 }
 0x505   : > { %v1384_v9 = vadd.f32 %v1383_v6, %v1360_v7 }
 0x507   : > { %v1391_v12 = vadd.f32 %v1859_v2, %v1384_v9 }
 0x508   : > { %v1400_v15 = vld [vmem:[#allocation4] sm:$0xff] }
 0x509   : > { %1396 = vst.msk [vmem:[#allocation4 + $0x8] sm:$0xff] %vm1394_vm1, %v1391_v12  ;;  %v1402_v17 = vsel %vm1394_vm1, %v1400_v15, 0.0 }
 0x510   : > { %v1401_v16 = vld [vmem:[#allocation4 + $0x8] sm:$0xff] }
 0x511   : > { %v1403_v18 = vsel %vm1394_vm1, %v1401_v16, 0.0 }
 0x512   : > { %v1404_v20 = vadd.f32 %v1403_v18, %v1402_v17 }
 0x514   : > { %v1405_v21 = vrot.slane %v1404_v20, 4 }
 0x516   : > { %v1406_v23 = vadd.f32 %v1405_v21, %v1404_v20 }
 0x518   : > { %v1407_v24 = vrot.slane %v1406_v23, 2 }
 0x51a   : > { %v1408_v26 = vadd.f32 %v1407_v24, %v1406_v23 }
 0x51c   : > { %v1409_v27 = vrot.slane %v1408_v26, 1 }
 0x51e   : > { %v1410_v29 = vadd.f32 %v1409_v27, %v1408_v26 }
 0x520   : > { %v1418_v30 = vmul.f32 %v1417_v28, %v1410_v29 }
 0x522   : > { %v1419_v31 = vsub.f32 %v1400_v15, %v1418_v30  ;;  %v1420_v32 = vsub.f32 %v1401_v16, %v1418_v30 }
 0x524   : > { %v1421_v33 = vmul.f32 %v1419_v31, %v1419_v31  ;;  %v1422_v34 = vmul.f32 %v1420_v32, %v1420_v32 }
 0x526   : > { %v1423_v36 = vsel %vm1394_vm1, %v1421_v33, 0.0  ;;  %v1424_v37 = vsel %vm1394_vm1, %v1422_v34, 0.0 }
 0x527   : > { %v1425_v38 = vadd.f32 %v1424_v37, %v1423_v36 }
 0x529   : > { %v1426_v39 = vrot.slane %v1425_v38, 4 }
 0x52b   : > { %v1427_v40 = vadd.f32 %v1426_v39, %v1425_v38 }
 0x52d   : > { %v1428_v41 = vrot.slane %v1427_v40, 2 }
 0x52f   : > { %v1429_v43 = vadd.f32 %v1428_v41, %v1427_v40 }
 0x531   : > { %v1430_v44 = vrot.slane %v1429_v43, 1 }
 0x533   : > { %v1431_v45 = vadd.f32 %v1430_v44, %v1429_v43 }
 0x535   : > { %v1432_v46 = vmul.f32 %v1431_v45, %v1417_v28 }
 0x537   : > { %v1433_v48 = vadd.f32 1e-05, %v1432_v46 }
 0x539   : > { %1895 = vrsqrt.f32 %v1433_v48  ;;  %vm1440_vm9 = vweird.f32 %v1433_v48 }
 0x53f   : > { %v1896_v49 = vpop.eup %1895 }
 0x540   : > { %v1435_v50 = vmul.f32 %v1896_v49, %v1433_v48  ;;  %vm1441_vm8 = vweird.f32 %v1896_v49 }
 0x541   : > { %vm1442_vm10 = vmor %vm1440_vm9, %vm1441_vm8 }
 0x542   : > { %v1436_v51 = vmul.f32 %v1896_v49, %v1435_v50 }
 0x544   : > { %v1437_v52 = vmul.f32 0.5, %v1436_v51 }
 0x546   : > { %v1438_v53 = vsub.f32 1.5, %v1437_v52 }
 0x548   : > { %v1439_v54 = vmul.f32 %v1896_v49, %v1438_v53 }
 0x54a   : > { %v1443_v55 = vsel %vm1442_vm10, %v1896_v49, %v1439_v54 }
 0x54b   : > { %v1444_v56 = vmul.f32 %v1443_v55, %v1419_v31  ;;  %v1445_v58 = vmul.f32 %v1443_v55, %v1420_v32 }
 0x54d   : > { %v1446_v57 = vmax.f32 %v1444_v56, 0.0  ;;  %v1447_v59 = vmax.f32 %v1445_v58, 0.0 }
 0x54f   : > { %1709 = vmatmul.msk.f32.vlgmr.msra.gmra.mxu1 %vm1394_vm1, %v1446_v57 }
 0x557   : > { %1710 = vmatmul.msk.f32.gmra.mxu1 %vm1394_vm1, %v1447_v59 }
 0x5cc   : > { %v1483_v35 = vpop.f32.mrf.mxu1 }
 0x5cd   : > { %v1484_v10 = vadd.f32 %v1860_v60, %v1483_v35 }
 0x5cf   : > { %1489 = vst.msk [vmem:[%s581_s14] sm:$0xff] %vm611_vm0, %v1484_v10 }
 0x5d4   : > { %v1486_v11 = vpop.f32.mrf.mxu1 }
 0x5d5   : > { %v1487_v42 = vadd.f32 %v1860_v60, %v1486_v11 }
 0x5d7   : > { %1490 = vst.msk [vmem:[%s581_s14 + $0x8] sm:$0xff] %vm611_vm0, %v1487_v42 }
 0x5d8   : > { %2074 = shalt.err (!%p2071_p9)
}
 0x5d9   : > { %s2150_s20 = smov 128   ;;  %s2151_s21 = smov 8  }
 0x5da   : > { %1747 = dma.vmem_to_hbm [thread:$0]  (%p2267_p4), %s1505_s13, 256, %s1507_s29, %s1492_s23, %s2150_s20, %s2150_s20, %s2151_s21  }
 0x5db PF: > { %s2598_s19 = sld [smem:[#allocation22_spill]] }
 0x5dc   : > { %s2599_s14 = sld [smem:[#allocation19_spill]] }
 0x5e1   : > { %p1779_p10 = scmp.ge.s32.totalorder %s2598_s19, 2 }
 0x5e2   : > { %s1521_s6 = sand.u32 1, %s2599_s14  }
 0x5e3   : > { %p1766_p11 = pnand %p1779_p10, %p2274_p8  ;;  %s1522_s9 = scalar_lea.sflag [#allocation7], %s1521_s6 }
 0x5e5   : > { %p1767_p12 = pneg %p1766_p11 }
 0x5e7   : > { %2112 = dma.done.wait (%p1767_p12), %s1522_s9, 256  }
 0x5e8   : > { %2114 = vsyncadd (%p1767_p12), %s1522_s9, 4294967040  ;;  %s30_s18 = sadd.s32 1, %s2598_s19   ;;  %s2601_s27 = sld [smem:[#allocation20_spill]] }
 0x5e9   : > { %p27_p13 = scmp.ge.s32.totalorder %s30_s18, 4   ;;  %s2602_s15 = sld [smem:[#allocation26_spill]] }
 0x5ea   : > { %s2603_s16 = sld [smem:[#allocation21_spill]]  ;;  %s2605_s29 = smov %s2121_s30 }
 0x5eb   : > { %s2604_s17 = sld [smem:[#allocation23_spill]]  ;;  %29 = sbr.rel (!%p27_p13) target bundleno = 12 (0xc), region = 144 }
 0x5ee   : > { %s2606_s30 = smov %s2601_s27 }
 0x5f0   :  { %1528 = vsyncpa [#allocation6], 1 }
 0x5f1   :  { %1530 = vsyncpa [#allocation6 + $0x1], 1 }
 0x5f2   :  { %1531 = vsyncpa [#allocation9], 1 }
 0x5f3   :  { %1532 = vsyncpa [#allocation12], 1 }
 0x5f4   :  { %1533 = vsyncpa [#allocation7], 1 }
 0x5f5   :  { %1535 = vsyncpa [#allocation7 + $0x1], 1 }

// kernel: tpu_custom_call.1
= control target key start
LH: loop header
LB: loop body
LE: loop exit
PB: predicated region body
PF: predicated region fallthrough
CT: control target
= control target key end

     0   :  { %s2551_s0 = inlined_call_operand.vmem [shape: f32[2,16,32], index: 0, kind: input, shape index: {}]   ;;  %s2552_s1 = inlined_call_operand.vmem [shape: f32[2,16,32], index: 1, kind: input, shape index: {}]   ;;  %s2553_s2 = inlined_call_operand.vmem [shape: f32[32,32], index: 2, kind: input, shape index: {}]   ;;  %s2554_s3 = inlined_call_operand.vmem [shape: f32[1,32], index: 3, kind: input, shape index: {}]   ;;  %s2555_s4 = inlined_call_operand.hbm [shape: f32[32,32], index: 4, kind: input, shape index: {}]   ;;  %s2556_s5 = inlined_call_operand.vmem [shape: f32[1,32], index: 5, kind: input, shape index: {}]   ;;  %s2557_s6 = inlined_call_operand.hbm [shape: f32[32,32], index: 6, kind: input, shape index: {}]   ;;  %s2558_s7 = inlined_call_operand.vmem [shape: f32[1,32], index: 7, kind: input, shape index: {}]   ;;  %s2559_s8 = inlined_call_operand.hbm [shape: f32[32,32], index: 8, kind: input, shape index: {}]   ;;  %s2560_s9 = inlined_call_operand.hbm [shape: f32[32,64], index: 9, kind: input, shape index: {}]   ;;  %s2561_s10 = inlined_call_operand.hbm [shape: f32[32,64], index: 10, kind: input, shape index: {}]   ;;  %s2562_s11 = inlined_call_operand.vmem [shape: f32[1,64], index: 11, kind: input, shape index: {}]   ;;  %s2563_s12 = inlined_call_operand.vmem [shape: f32[64,32], index: 12, kind: input, shape index: {}]   ;;  %s2564_s13 = inlined_call_operand.vmem [shape: f32[1,32], index: 13, kind: input, shape index: {}]   ;;  %s2565_s14 = inlined_call_operand.hbm [shape: f32[2,16,32], index: 14, kind: output, shape index: {}]  }
   0x1   :  { %2576 = sst [smem:[#allocation27_spill]] %s2557_s6 }
   0x2   :  { %2577 = sst [smem:[#allocation28_spill]] %s2560_s9 }
   0x3   :  { %2578 = sst [smem:[#allocation29_spill]] %s2564_s13 }
   0x4   :  { %2579 = sst [smem:[#allocation30_spill]] %s2565_s14 }
   0x5   :  { %19 = vsyncpa [#allocation6], 0 }
   0x6   :  { %20 = vsyncpa [#allocation9], 0 }
   0x7   :  { %21 = vsyncpa [#allocation12], 0 }
   0x8   :  { %22 = vsyncpa [#allocation7], 0 }
   0x9   :  { %24 = vsyncpa [#allocation7 + $0x1], 0  ;;  %s2227_s29 = smov 0   ;;  %s2229_s30 = smov 0  }
   0xa   :  { %s2231_s15 = smov 0   ;;  %s2233_s16 = smov 0  }
   0xb   :  { %s2235_s17 = smov 0   ;;  %s2237_s18 = smov 0  }
   0xc LB: > { %2580 = sst [smem:[#allocation19_spill]] %s2117_s29  ;;  %s1647_s19 = sadd.s32 4294967295, %s2137_s18   ;;  %s2137_s18 = sphi %s2237_s18, %s30_s18   ;;  %s2133_s17 = sphi %s2235_s17, %s2604_s17   ;;  %s2129_s16 = sphi %s2233_s16, %s2603_s16   ;;  %s2125_s15 = sphi %s2231_s15, %s2602_s15   ;;  %s2121_s30 = sphi %s2229_s30, %s2606_s30   ;;  %s2117_s29 = sphi %s2227_s29, %s2605_s29  }
   0xd   : > { %2581 = sst [smem:[#allocation20_spill]] %s2125_s15  ;;  %s1648_s20 = sadd.s32 4294967294, %s2137_s18  }
   0xe   : > { %2582 = sst [smem:[#allocation21_spill]] %s2133_s17  ;;  %s42_s21 = sadd.s32 1, %s2133_s17 }
   0xf   : > { %2583 = sst [smem:[#allocation22_spill]] %s2137_s18  ;;  %s355_s22 = sadd.s32 1, %s2125_s15 }
  0x10   : > { %p44_p0 = scmp.ge.s32.totalorder %s42_s21, 2  ;;  %p365_p1 = scmp.ne.s32.totalorder %s2125_s15, %s2121_s30 }
  0x11   : > { %p366_p2 = scmp.eq.s32.totalorder %s1647_s19, 1  ;;  %p371_p3 = scmp.ne.s32.totalorder %s2121_s30, %s2117_s29 }
  0x12   : > { %s2608_s21 = smov (%p44_p0, %s42_s21), 0  ;;  %p372_p5 = scmp.eq.s32.totalorder %s1648_s20, 1 }
  0x13   : > { %2584 = sst [smem:[#allocation23_spill]] %s2608_s21  ;;  %p2267_p4 = por %p366_p2, %p365_p1 }
  0x14   : > { %s352_s24 = ssub.s32 %s2133_s17, %s2608_s21  ;;  %p1649_p6 = scmp.ge.s32.totalorder %s2137_s18, 1 }
  0x15   : > { %s2585_s23 = scalar_select %p2267_p4, 1, 0 }
  0x16   : > { %p353_p7 = scmp.eq.s32.totalorder %s352_s24, 0  ;;  %p2274_p8 = por %p372_p5, %p371_p3 }
  0x17   : > { %2586 = sst [smem:[#allocation24_spill]] %s2585_s23  ;;  %p379_p9 = scmp.lt.s32.totalorder %s2137_s18, 3 }
  0x18   : > { %s2587_s25 = scalar_select %p2274_p8, 1, 0 }
  0x19   : > { %s2280_s26 = scalar_select %p353_p7, %s2125_s15, %s355_s22  }
  0x1a   : > { %2588 = sst [smem:[#allocation25_spill]] %s2587_s25  ;;  %p2282_p10 = pnand %p1649_p6, %p379_p9 }
  0x1b   : > { %2589 = sst [smem:[#allocation26_spill]] %s2280_s26  ;;  %p2286_p11 = scmp.eq.s32.totalorder %s1647_s19, 0 }
  0x1c   : > { %p1749_p12 = pneg %p2282_p10  ;;  %s2592_s6 = sld [smem:[#allocation27_spill]] }
  0x1d   : > { %s2139_s17 = smov [#allocation8]   ;;  %s2594_s9 = sld [smem:[#allocation28_spill]] }
  0x1e   : > { %p2297_p13 = pnand %p2286_p11, %p1749_p12  ;;  %s415_s19 = sshll.u32 %s2139_s17, 4  ;;  %s416_s19 = int_to_ptr.vmem [resolvable:$true] %s415_s19 }
  0x1f   : > { %s2140_s29 = smov 128   ;;  %s2141_s20 = smov 8  }
  0x20   : > { %s2142_s24 = smov [#allocation11]   ;;  %s396_s23 = sshll.u32 %s2555_s4, 4  ;;  %s397_s23 = int_to_ptr.hbm [resolvable:$true] %s396_s23 }
  0x21   : > { %s2143_s15 = smov [#allocation5]   ;;  %s430_s13 = sshll.u32 %s2559_s8, 4  ;;  %s431_s13 = int_to_ptr.hbm [resolvable:$true] %s430_s13 }
  0x22   : > { %s413_s21 = sshll.u32 %s2592_s6, 4  ;;  %s446_s6 = sshll.u32 %s2142_s24, 4  ;;  %s414_s21 = int_to_ptr.hbm [resolvable:$true] %s413_s21  ;;  %s447_s6 = int_to_ptr.vmem [resolvable:$true] %s446_s6 }
  0x23   : > { %s444_s25 = sshll.u32 %s2594_s9, 4  ;;  %s398_s17 = sshll.u32 %s2143_s15, 4  ;;  %s445_s25 = int_to_ptr.hbm [resolvable:$true] %s444_s25  ;;  %s399_s17 = int_to_ptr.vmem [resolvable:$true] %s398_s17 }
  0x24   : > { %1755 = dma.hbm_to_vmem [thread:$0]  (!%p2297_p13), %s414_s21, 512, %s416_s19, [#allocation9], %s2140_s29, %s2140_s29, %s2141_s20  }
  0x25   : > { %1761 = dma.hbm_to_vmem [thread:$0]  (!%p2297_p13), %s445_s25, 512, %s447_s6, [#allocation12], %s2140_s29, %s2140_s29, %s2141_s20  }
  0x26   : > { %1752 = dma.hbm_to_vmem [thread:$0]  (!%p2297_p13), %s397_s23, 512, %s399_s17, [#allocation6], %s2140_s29, %s2140_s29, %s2141_s20  }
  0x27   : > { %s458_s24 = sshll.u32 %s2561_s10, 4  ;;  %s2144_s14 = smov [#allocation10]   ;;  %s459_s24 = int_to_ptr.hbm [resolvable:$true] %s458_s24 }
  0x28   : > { %s432_s18 = sshll.u32 %s2144_s14, 4  ;;  %s2145_s6 = smov [#allocation13]   ;;  %s433_s18 = int_to_ptr.vmem [resolvable:$true] %s432_s18 }
  0x29   : > { %1758 = dma.hbm_to_vmem [thread:$0]  (!%p2297_p13), %s431_s13, 512, %s433_s18, [#allocation9], %s2140_s29, %s2140_s29, %s2141_s20  }
  0x2a   : > { %s460_s25 = sshll.u32 %s2145_s6, 4  ;;  %506 = sbr.rel (%p2282_p10) target bundleno = 1499 (0x5db), region = 76  ;;  %s461_s25 = int_to_ptr.vmem [resolvable:$true] %s460_s25 }
  0x2b   : > { %1764 = dma.hbm_to_vmem [thread:$0]  (!%p2297_p13), %s459_s24, 512, %s461_s25, [#allocation12], %s2140_s29, %s2140_s29, %s2141_s20  }
  0x2f   : > { %2100 = dma.done.wait (%p2286_p11), [#allocation6], 512  }
  0x30   : > { %2102 = vsyncadd (%p2286_p11), [#allocation6], 4294966784 }
  0x31   : > { %2104 = dma.done.wait (%p2286_p11), [#allocation9], 1024  }
  0x32   : > { %2106 = vsyncadd (%p2286_p11), [#allocation9], 4294966272 }
  0x33   : > { %2108 = dma.done.wait (%p2286_p11), [#allocation12], 1024  }
  0x34   : > { %2110 = vsyncadd (%p2286_p11), [#allocation12], 4294966272  ;;  %p583_p0 = scmp.lt.s32.totalorder %s2129_s16, 1  ;;  %v606_v0 = vld [vmem:[#allocation5 + $0x18] sm:$0xff]  ;;  %v605_v1 = vld [vmem:[#allocation5 + $0x10] sm:$0xff]  ;;  %vm611_vm0 = vcmask 261120  }
  0x35   : > { %1719 = vmatpush.msra.mxu2 %v606_v0  ;;  %630 = vmatpush.msra.mxu0 %v606_v0  ;;  %v604_v2 = vld [vmem:[#allocation5 + $0x8] sm:$0xff]  ;;  %v603_v3 = vld [vmem:[#allocation5] sm:$0xff]  ;;  %v679_v8 = vld [vmem:[%s2553_s2 + $0x8] sm:$0xff]  ;;  %vm720_vm1 = vcmask 64512   ;;  %s2147_s23 = smov 112   ;;  %vm756_vm2 = vcmask 130048  }
  0x36   : > { %s584_s9 = scalar_select %p583_p0, %s2129_s16, 1  ;;  %v681_v6 = vld [vmem:[%s2553_s2 + $0x18] sm:$0xff]  ;;  %v680_v7 = vld [vmem:[%s2553_s2 + $0x10] sm:$0xff]  ;;  %v678_v9 = vld [vmem:[%s2553_s2] sm:$0xff] }
  0x37   : > { %1720 = vmatpush.msra.mxu2 %v605_v1  ;;  %631 = vmatpush.msra.mxu0 %v605_v1  ;;  %v644_v12 = vld [vmem:[#allocation8 + $0x18] sm:$0xff]  ;;  %v643_v13 = vld [vmem:[#allocation8 + $0x10] sm:$0xff]  ;;  %v642_v14 = vld [vmem:[#allocation8 + $0x8] sm:$0xff]  ;;  %s579_s20 = sand.u32 1, %s2121_s30   ;;  %s2595_s21 = sld [smem:[#allocation29_spill]] }
  0x38   : > { %s1716_s13 = sshll.u32 %s584_s9, 4  ;;  %1723 = vmatpush.msra.mxu3 %v644_v12  ;;  %661 = vmatpush.msra.mxu1 %v644_v12  ;;  %v641_v15 = vld [vmem:[#allocation8] sm:$0xff]  ;;  %v1856_v16 = vld [vmem:[%s2556_s5] ss:$0 sm:$0xff]  ;;  %s2146_s9 = smov 120  }
  0x39   : > { %s596_s27 = scalar_lea.vmem %s2552_s1, %s1716_s13  ;;  %1721 = vmatpush.msra.mxu2 %v604_v2  ;;  %632 = vmatpush.msra.mxu0 %v604_v2  ;;  %s590_s24 = scalar_lea.vmem %s2551_s0, %s1716_s13  ;;  %v1857_v23 = vld [vmem:[%s2554_s3] ss:$0 sm:$0xff]  ;;  %v834_v43 = vld [vmem:[#allocation10] sm:$0xff] }
  0x3a   : > { %v602_v4 = vld [vmem:[%s596_s27 + $0x8] sm:$0xff]  ;;  %v601_v5 = vld [vmem:[%s596_s27] sm:$0xff]  ;;  %1724 = vmatpush.msra.mxu3 %v643_v13  ;;  %662 = vmatpush.msra.mxu1 %v643_v13  ;;  %s2148_s27 = smov 104   ;;  %s1662_s15 = sshll.u32 %s579_s20, 4 }
  0x3b   : > { %1722 = vmatpush.msra.mxu2 %v603_v3  ;;  %633 = vmatpush.msra.mxu0 %v603_v3  ;;  %v2359_v10 = vld [vmem:[%s590_s24] sm:$0xff]  ;;  %v2363_v11 = vld [vmem:[%s590_s24 + $0x8] sm:$0xff]  ;;  %s1718_s19 = sshll.u32 %s2129_s16, 4  ;;  %s581_s14 = scalar_lea.vmem [#allocation14], %s1662_s15 }
  0x3c   : > { %1668 = vmatmul.msk.f32.vlgmr.msra.gmra.mxu2 %vm611_vm0, %v602_v4  ;;  %1667 = vmatmul.msk.f32.vlgmr.msra.gmra.mxu0 %vm611_vm0, %v601_v5  ;;  %v1858_v28 = vld [vmem:[%s2558_s7] ss:$0 sm:$0xff]  ;;  %s2597_s25 = sld [smem:[#allocation30_spill]]  ;;  %s1504_s13 = sshll.u32 %s581_s14, 4  ;;  %s1505_s13 = int_to_ptr.vmem [resolvable:$true] %s1504_s13 }
  0x3d   : > { %705 = vmatpush.msrb.mxu2 %v681_v6  ;;  %1725 = vmatpush.msra.mxu3 %v642_v14 }
  0x3e   : > { %663 = vmatpush.msra.mxu1 %v642_v14 }
  0x3f   : > { %706 = vmatpush.msrb.mxu2 %v680_v7  ;;  %1726 = vmatpush.msra.mxu3 %v641_v15 }
  0x40   : > { %664 = vmatpush.msra.mxu1 %v641_v15  ;;  %1670 = vmatmul.msk.f32.vlgmr.msra.gmra.mxu3 %vm611_vm0, %v602_v4 }
  0x41   : > { %707 = vmatpush.msrb.mxu2 %v679_v8  ;;  %1669 = vmatmul.msk.f32.vlgmr.msra.gmra.mxu1 %vm611_vm0, %v601_v5 }
  0x42   : > { %s2067_s15 = scalar_lea.hbm %s2597_s25, 32 }
  0x43   : > { %708 = vmatpush.msrb.mxu2 %v678_v9 }
  0x44   : > { %1671 = vmatmul.msk.f32.vlgmr.msrb.gmra.mxu2 %vm611_vm0, %v2359_v10 }
  0x4c   : > { %1672 = vmatmul.msk.f32.gmra.mxu2 %vm611_vm0, %v2363_v11 }
  0xb9   : > { %v635_v17 = vpop.f32.mrf.mxu0 }
  0xba   : > { %v636_v18 = vadd.f32 %v1856_v16, %v635_v17 }
  0xbc   : > { %672 = vst.msk [vmem:[#allocation2] sm:$0xff] %vm611_vm0, %v636_v18 }
  0xbe   : > { %v666_v31 = vpop.f32.mrf.mxu1 }
  0xbf   : > { %v638_v19 = vpop.f32.mrf.mxu2  ;;  %v667_v32 = vadd.f32 %v1858_v28, %v666_v31 }
  0xc0   : > { %v639_v20 = vadd.f32 %v1856_v16, %v638_v19 }
  0xc1   : > { %674 = vst.msk [vmem:[#allocation3] sm:$0xff] %vm611_vm0, %v667_v32 }
  0xc2   : > { %673 = vst.msk [vmem:[#allocation2 + $0x8] sm:$0xff] %vm611_vm0, %v639_v20 }
  0xc3   : > { %v716_v21 = vld [vmem:[#allocation2] sm:$0xff]  ;;  %v669_v29 = vpop.f32.mrf.mxu3 }
  0xc4   : > { %839 = vrot.lane.b32.xlu2 %v716_v21, %s2146_s9  ;;  %v670_v30 = vadd.f32 %v1858_v28, %v669_v29 }
  0xc6   : > { %675 = vst.msk [vmem:[#allocation3 + $0x8] sm:$0xff] %vm611_vm0, %v670_v30 }
  0xc7   : > { %v710_v22 = vpop.f32.mrf.mxu2 }
  0xc8   : > { %v2380_v25 = vadd.f32 %v1857_v23, %v710_v22  ;;  %v718_v34 = vld [vmem:[#allocation3] sm:$0xff] }
  0xc9   : > { %v717_v24 = vld [vmem:[#allocation2 + $0x8] sm:$0xff] }
  0xca   : > { %841 = vrot.lane.b32.xlu1 %v717_v24, %s2146_s9  ;;  %1673 = vmatpush.xpose.msk.msrb.mxu3 %vm720_vm1, %v717_v24 }
  0xcd   : > { %v719_v33 = vld [vmem:[#allocation3 + $0x8] sm:$0xff] }
  0xce   : > { %1674 = vmatpush.xpose.msk.msrb.mxu3 %vm720_vm1, %v716_v21  ;;  %823 = vmatpush.msrb.mxu0 %v719_v33  ;;  %v2400_v35 = vpack.i.bf16 %v718_v34, %v719_v33 }
  0xcf   : > { %v713_v26 = vpop.f32.mrf.mxu2 }
  0xd0   : > { %v2383_v27 = vadd.f32 %v1857_v23, %v713_v26  ;;  %824 = vmatpush.msrb.mxu0 %v718_v34 }
  0xd1   : > { %1675 = vmatmul.msk.f32.vlgmr.msrb.gmra.mxu3 %vm720_vm1, %v2380_v25 }
  0xd2   : > { %1024 = vrot.lane.b32.xlu1 %v717_v24, %s2147_s23  ;;  %837 = vrot.lane.b32.xlu2 %v2383_v27, %s2146_s9 }
  0xd3   : > { %1010 = vmatpush.msra.mxu0 %v834_v43 }
  0xd9   : > { %1676 = vmatmul.msk.f32.gmra.mxu3 %vm720_vm1, %v2383_v27 }
  0xda   : > { %1178 = vrot.lane.b32.xlu1 %v717_v24, %s2148_s27  ;;  %1018 = vrot.lane.b32.xlu2 %v2380_v25, %s2147_s23 }
 0x11e   : > { %v840_v37 = vpop.permute.xlu2 %839 }
 0x12c   : > { %v838_v56 = vpop.permute.xlu2 %837 }
 0x134   : > { %v1019_v58 = vpop.permute.xlu2 %1018 }
 0x13c   : > { %v842_v36 = vpop.permute.xlu1 %841 }
 0x13d   : > { %1679 = vmatpush.xpose.msk.msrb.mxu1 %vm720_vm1, %v842_v36 }
 0x141   : > { %1680 = vmatpush.xpose.msk.msrb.mxu1 %vm720_vm1, %v840_v37 }
 0x144   : > { %v1025_v38 = vpop.permute.xlu1 %1024 }
 0x145   : > { %1689 = vmatpush.xpose.msk.msra.mxu1 %vm720_vm1, %v1025_v38 }
 0x14c   : > { %v1179_v51 = vpop.permute.xlu1 %1178 }
 0x154   : > { %v750_v39 = vpop.f32.mrf.mxu3 }
 0x155   : > { %v757_v40 = vsel %vm756_vm2, %v750_v39, -inf }
 0x156   : > { %758 = vmax.xlane.f32.xlu0 %v757_v40 }
 0x15c   : > { %v753_v41 = vpop.f32.mrf.mxu3 }
 0x15d   : > { %v760_v42 = vsel %vm756_vm2, %v753_v41, -inf }
 0x15e   : > { %761 = vmax.xlane.f32.xlu0 %v760_v42 }
 0x172   : > { %835 = vrot.lane.b32.xlu0 %v2380_v25, %s2146_s9 }
 0x17a   : > { %1022 = vrot.lane.b32.xlu0 %v716_v21, %s2147_s23 }
 0x182   : > { %1176 = vrot.lane.b32.xlu0 %v716_v21, %s2148_s27 }
 0x18a   : > { %1174 = vrot.lane.b32.xlu0 %v2383_v27, %s2148_s27 }
 0x192   : > { %1842 = vrot.lane.b32.xlu0 %v2400_v35, %s2146_s9  ;;  %s1503_s9 = scalar_lea.hbm %s2597_s25, %s1718_s19 }
 0x193   : > { %s1506_s29 = sshll.u32 %s1503_s9, 4  ;;  %s1507_s29 = int_to_ptr.hbm [resolvable:$true] %s1506_s29 }
 0x1c9   : > { %v759_v44 = vpop.xlane.xlu0 %758 }
 0x1ca   : > { %v763_v45 = vsub.f32 %v750_v39, %v759_v44 }
 0x1cc   : > { %v765_v46 = vmul.f32 1.442695, %v763_v45 }
 0x1ce   : > { %1861 = vpow2.f32 %v765_v46 }
 0x1d1   : > { %v762_v47 = vpop.xlane.xlu0 %761 }
 0x1d2   : > { %v764_v48 = vsub.f32 %v753_v41, %v762_v47 }
 0x1d4   : > { %v1862_v49 = vpop.eup %1861  ;;  %v767_v50 = vmul.f32 1.442695, %v764_v48 }
 0x1d5   : > { %1677 = vmatmul.msk.f32.vlgmr.msrb.gmra.mxu0 %vm756_vm2, %v1862_v49  ;;  %v769_v52 = vsel %vm756_vm2, %v1862_v49, 0.0 }
 0x1d6   : > { %1863 = vpow2.f32 %v767_v50  ;;  %1697 = vmatpush.xpose.msk.msrb.mxu0 %vm720_vm1, %v1179_v51  ;;  %770 = vadd.xlane.f32.xlu1 %v769_v52 }
 0x1dc   : > { %v1864_v53 = vpop.eup %1863 }
 0x1dd   : > { %1678 = vmatmul.msk.f32.gmra.mxu0 %vm756_vm2, %v1864_v53  ;;  %v772_v54 = vsel %vm756_vm2, %v1864_v53, 0.0 }
 0x1de   : > { %773 = vadd.xlane.f32.xlu2 %v772_v54 }
 0x1e4   : > { %v836_v55 = vpop.permute.xlu0 %835 }
 0x1e5   : > { %1681 = vmatmul.msk.f32.vlgmr.msrb.gmra.mxu1 %vm720_vm1, %v836_v55 }
 0x1ec   : > { %v1023_v57 = vpop.permute.xlu0 %1022 }
 0x1ed   : > { %1682 = vmatmul.msk.f32.gmra.mxu1 %vm720_vm1, %v838_v56 }
 0x1ee   : > { %1690 = vmatpush.xpose.msk.msra.mxu1 %vm720_vm1, %v1023_v57 }
 0x1ef   : > { %1172 = vrot.lane.b32.xlu1 %v2380_v25, %s2148_s27 }
 0x1f4   : > { %v1177_v59 = vpop.permute.xlu0 %1176 }
 0x1f5   : > { %1691 = vmatmul.msk.f32.vlgmr.msra.gmra.mxu1 %vm720_vm1, %v1019_v58  ;;  %1698 = vmatpush.xpose.msk.msrb.mxu0 %vm720_vm1, %v1177_v59 }
 0x1f6   : > { %1020 = vrot.lane.b32.xlu2 %v2383_v27, %s2147_s23 }
 0x1fc   : > { %v1175_v60 = vpop.permute.xlu0 %1174 }
 0x204   : > { %v1843_v61 = vpop.permute.xlu0 %1842 }
 0x205   : > { %v1844_v62 = vunpack.i.l.bf16 %v1843_v61  ;;  %v1845_v63 = vunpack.i.h.bf16 %v1843_v61 }
 0x207   : > { %948 = vmatpush.msra.mxu2 %v1844_v62 }
 0x209   : > { %949 = vmatpush.msra.mxu2 %v1845_v63 }
 0x249   : > { %v771_v0 = vpop.xlane.xlu1 %770 }
 0x24a   : > { %1865 = vrcp.f32 %v771_v0  ;;  %v786_v5 = vand.u32 2147483648, %v771_v0  ;;  %v784_v7 = vand.u32 2147483647, %v771_v0  ;;  %vm780_vm4 = vweird.f32 %v771_v0 }
 0x24c   : > { %v787_v12 = vor.u32 1.1754944e-38, %v786_v5  ;;  %vm785_vm6 = vcmp.eq.f32.partialorder %v784_v7, 8.507059e+37 }
 0x250   : > { %v1866_v1 = vpop.eup %1865 }
 0x251   : > { %v776_v2 = vmul.f32 %v1866_v1, %v771_v0  ;;  %v774_v3 = vpop.xlane.xlu2 %773  ;;  %vm781_vm3 = vweird.f32 %v1866_v1 }
 0x252   : > { %1867 = vrcp.f32 %v774_v3  ;;  %vm782_vm5 = vmor %vm780_vm4, %vm781_vm3  ;;  %v826_v13 = vpop.f32.mrf.mxu0  ;;  %v800_v20 = vand.u32 2147483648, %v774_v3  ;;  %v798_v22 = vand.u32 2147483647, %v774_v3  ;;  %vm794_vm8 = vweird.f32 %v774_v3 }
 0x253   : > { %v777_v4 = vsub.f32 1.0, %v776_v2 }
 0x254   : > { %v801_v24 = vor.u32 1.1754944e-38, %v800_v20  ;;  %vm799_vm10 = vcmp.eq.f32.partialorder %v798_v22, 8.507059e+37 }
 0x255   : > { %v778_v6 = vmul.f32 %v1866_v1, %v777_v4 }
 0x257   : > { %v779_v8 = vadd.f32 %v1866_v1, %v778_v6 }
 0x258   : > { %v1868_v9 = vpop.eup %1867 }
 0x259   : > { %v790_v14 = vmul.f32 %v1868_v9, %v774_v3  ;;  %v783_v15 = vsel %vm782_vm5, %v1866_v1, %v779_v8  ;;  %v1021_v16 = vpop.permute.xlu2 %1020  ;;  %vm795_vm7 = vweird.f32 %v1868_v9 }
 0x25a   : > { %v788_v17 = vsel %vm785_vm6, %v787_v12, %v783_v15  ;;  %1692 = vmatmul.msk.f32.gmra.mxu1 %vm720_vm1, %v1021_v16  ;;  %vm796_vm9 = vmor %vm794_vm8, %vm795_vm7  ;;  %v829_v27 = vpop.f32.mrf.mxu0 }
 0x25b   : > { %v791_v18 = vsub.f32 1.0, %v790_v14  ;;  %v832_v19 = vmul.f32 %v826_v13, %v788_v17 }
 0x25d   : > { %v792_v21 = vmul.f32 %v1868_v9, %v791_v18  ;;  %1687 = vmatmul.msk.f32.vlgmr.msra.gmra.mxu0 %vm720_vm1, %v832_v19 }
 0x25f   : > { %v793_v23 = vadd.f32 %v1868_v9, %v792_v21 }
 0x261   : > { %v797_v25 = vsel %vm796_vm9, %v1868_v9, %v793_v23  ;;  %v1173_v33 = vpop.permute.xlu1 %1172  ;;  %v959_v9 = vld [vmem:[#allocation10 + $0x8] sm:$0xff] }
 0x262   : > { %v802_v26 = vsel %vm799_vm10, %v801_v24, %v797_v25  ;;  %v868_v28 = vpop.f32.mrf.mxu1  ;;  %981 = vmatpush.msra.mxu3 %v959_v9 }
 0x263   : > { %v833_v29 = vmul.f32 %v829_v27, %v802_v26  ;;  %v874_v30 = vsel %vm756_vm2, %v868_v28, -inf }
 0x264   : > { %875 = vmax.xlane.f32.xlu2 %v874_v30 }
 0x265   : > { %1688 = vmatmul.msk.f32.gmra.mxu0 %vm720_vm1, %v833_v29 }
 0x26a   : > { %v871_v31 = vpop.f32.mrf.mxu1 }
 0x26b   : > { %v877_v32 = vsel %vm756_vm2, %v871_v31, -inf }
 0x26c   : > { %878 = vmax.xlane.f32.xlu1 %v877_v32 }
 0x26d   : > { %1699 = vmatmul.msk.f32.vlgmr.msrb.gmra.mxu0 %vm720_vm1, %v1173_v33 }
 0x272   : > { %v1051_v34 = vpop.f32.mrf.mxu1 }
 0x273   : > { %v1057_v36 = vsel %vm756_vm2, %v1051_v34, -inf }
 0x274   : > { %1058 = vmax.xlane.f32.xlu0 %v1057_v36 }
 0x275   : > { %1700 = vmatmul.msk.f32.gmra.mxu0 %vm720_vm1, %v1175_v60 }
 0x288   : > { %1852 = vrot.lane.b32.xlu0 %v2400_v35, %s2148_s27  ;;  %s2061_s27 = sshra.s32 %s1507_s29, 4  ;;  %s2062_s27 = int_to_ptr.hbm [resolvable:$true] %s2061_s27 }
 0x289   : > { %s2063_s16 = scalar_lea.hbm %s2062_s27, 16  ;;  %p2068_p5 = scmp.lt.s32.totalorder %s2062_s27, %s2597_s25 }
 0x28a   : > { %p2064_p1 = scmp.ne.s32.totalorder %s2062_s27, %s2063_s16  ;;  %p2069_p6 = scmp.lt.s32.totalorder %s2067_s15, %s2063_s16 }
 0x28c   : > { %p2065_p2 = pnand %p2064_p1, %p2267_p4  ;;  %p2070_p7 = por %p2069_p6, %p2068_p5 }
 0x28e   : > { %p2066_p3 = pneg %p2065_p2 }
 0x290   : > { %p2071_p9 = pnand %p2070_p7, %p2066_p3 }
 0x2d7   : > { %v876_v37 = vpop.xlane.xlu2 %875  ;;  %v1054_v38 = vpop.f32.mrf.mxu1 }
 0x2d8   : > { %v880_v39 = vsub.f32 %v868_v28, %v876_v37  ;;  %v1060_v40 = vsel %vm756_vm2, %v1054_v38, -inf }
 0x2d9   : > { %1061 = vmax.xlane.f32.xlu2 %v1060_v40 }
 0x2da   : > { %v882_v41 = vmul.f32 1.442695, %v880_v39  ;;  %v2440_v42 = vpop.f32.mrf.mxu0 }
 0x2dc   : > { %1869 = vpow2.f32 %v882_v41 }
 0x2df   : > { %v879_v43 = vpop.xlane.xlu1 %878 }
 0x2e0   : > { %v881_v44 = vsub.f32 %v871_v31, %v879_v43 }
 0x2e2   : > { %v1870_v45 = vpop.eup %1869  ;;  %v884_v46 = vmul.f32 1.442695, %v881_v44  ;;  %v2442_v47 = vpop.f32.mrf.mxu0 }
 0x2e3   : > { %1683 = vmatmul.msk.f32.vlgmr.msra.gmra.mxu2 %vm756_vm2, %v1870_v45  ;;  %v886_v56 = vsel %vm756_vm2, %v1870_v45, 0.0 }
 0x2e4   : > { %1871 = vpow2.f32 %v884_v46 }
 0x2e7   : > { %v1059_v51 = vpop.xlane.xlu0 %1058 }
 0x2e8   : > { %v1063_v59 = vsub.f32 %v1051_v34, %v1059_v51 }
 0x2ea   : > { %v1872_v48 = vpop.eup %1871  ;;  %v1205_v49 = vpop.f32.mrf.mxu0  ;;  %v1065_v60 = vmul.f32 1.442695, %v1063_v59 }
 0x2eb   : > { %1684 = vmatmul.msk.f32.gmra.mxu2 %vm756_vm2, %v1872_v48  ;;  %v1211_v50 = vsel %vm756_vm2, %v1205_v49, -inf  ;;  %v889_v58 = vsel %vm756_vm2, %v1872_v48, 0.0 }
 0x2ec   : > { %1212 = vmax.xlane.f32.xlu1 %v1211_v50  ;;  %1873 = vpow2.f32 %v1065_v60 }
 0x2f1   : > { %1847 = vrot.lane.b32.xlu2 %v2400_v35, %s2147_s23  ;;  %s1492_s23 = scalar_lea.sflag [#allocation7], %s579_s20 }
 0x2f2   : > { %v1208_v52 = vpop.f32.mrf.mxu0  ;;  %v1874_v35 = vpop.eup %1873 }
 0x2f3   : > { %v1214_v53 = vsel %vm756_vm2, %v1208_v52, -inf  ;;  %v1069_v61 = vsel %vm756_vm2, %v1874_v35, 0.0 }
 0x2f4   : > { %1215 = vmax.xlane.f32.xlu1 %v1214_v53 }
 0x2fa   : > { %v1853_v54 = vpop.permute.xlu0 %1852 }
 0x2fb   : > { %v1854_v55 = vunpack.i.l.bf16 %v1853_v54  ;;  %v1855_v57 = vunpack.i.h.bf16 %v1853_v54 }
 0x2fc   : > { %887 = vadd.xlane.f32.xlu1 %v886_v56 }
 0x2fd   : > { %1283 = vmatpush.msrb.mxu1 %v1854_v55 }
 0x2ff   : > { %1284 = vmatpush.msrb.mxu1 %v1855_v57 }
 0x304   : > { %890 = vadd.xlane.f32.xlu1 %v889_v58 }
 0x31a   : > { %1070 = vadd.xlane.f32.xlu2 %v1069_v61 }
 0x34c   : > { %v1062_v62 = vpop.xlane.xlu2 %1061 }
 0x34d   : > { %v1064_v63 = vsub.f32 %v1054_v38, %v1062_v62 }
 0x34f   : > { %v1067_v0 = vmul.f32 1.442695, %v1064_v63 }
 0x351   : > { %1875 = vpow2.f32 %v1067_v0 }
 0x354   : > { %v1848_v1 = vpop.permute.xlu2 %1847 }
 0x355   : > { %v1849_v2 = vunpack.i.l.bf16 %v1848_v1  ;;  %v1850_v4 = vunpack.i.h.bf16 %v1848_v1 }
 0x357   : > { %v1876_v3 = vpop.eup %1875  ;;  %1129 = vmatpush.msrb.mxu2 %v1849_v2 }
 0x358   : > { %v1072_v5 = vsel %vm756_vm2, %v1876_v3, 0.0 }
 0x359   : > { %1073 = vadd.xlane.f32.xlu1 %v1072_v5  ;;  %1130 = vmatpush.msrb.mxu2 %v1850_v4 }
 0x35a   : > { %1693 = vmatmul.msk.f32.vlgmr.msrb.gmra.mxu2 %vm756_vm2, %v1874_v35 }
 0x35f   : > { %v1213_v6 = vpop.xlane.xlu1 %1212 }
 0x360   : > { %v1217_v7 = vsub.f32 %v1205_v49, %v1213_v6  ;;  %v1140_v49 = vld [vmem:[#allocation10 + $0x10] sm:$0xff] }
 0x361   : > { %1162 = vmatpush.msrb.mxu3 %v1140_v49  ;;  %v1326_v49 = vld [vmem:[#allocation11] sm:$0xff] }
 0x362   : > { %v1219_v8 = vmul.f32 1.442695, %v1217_v7  ;;  %1694 = vmatmul.msk.f32.gmra.mxu2 %vm756_vm2, %v1876_v3 }
 0x364   : > { %1877 = vpow2.f32 %v1219_v8 }
 0x366   : > { %v951_v29 = vpop.f32.mrf.mxu2 }
 0x367   : > { %v1216_v12 = vpop.xlane.xlu1 %1215 }
 0x368   : > { %v1218_v13 = vsub.f32 %v1208_v52, %v1216_v12  ;;  %v1294_v52 = vld [vmem:[#allocation10 + $0x18] sm:$0xff] }
 0x369   : > { %1316 = vmatpush.msra.mxu2 %v1294_v52 }
 0x36a   : > { %v1878_v14 = vpop.eup %1877  ;;  %v1221_v15 = vmul.f32 1.442695, %v1218_v13 }
 0x36b   : > { %1701 = vmatmul.msk.f32.vlgmr.msrb.gmra.mxu1 %vm756_vm2, %v1878_v14  ;;  %v1223_v16 = vsel %vm756_vm2, %v1878_v14, 0.0 }
 0x36c   : > { %1879 = vpow2.f32 %v1221_v15  ;;  %1224 = vadd.xlane.f32.xlu0 %v1223_v16 }
 0x36e   : > { %v954_v44 = vpop.f32.mrf.mxu2 }
 0x36f   : > { %v888_v17 = vpop.xlane.xlu1 %887 }
 0x370   : > { %1881 = vrcp.f32 %v888_v17  ;;  %v903_v24 = vand.u32 2147483648, %v888_v17  ;;  %v901_v26 = vand.u32 2147483647, %v888_v17  ;;  %vm897_vm12 = vweird.f32 %v888_v17 }
 0x372   : > { %v1880_v18 = vpop.eup %1879  ;;  %v904_v30 = vor.u32 1.1754944e-38, %v903_v24  ;;  %vm902_vm14 = vcmp.eq.f32.partialorder %v901_v26, 8.507059e+37 }
 0x373   : > { %1702 = vmatmul.msk.f32.gmra.mxu1 %vm756_vm2, %v1880_v18  ;;  %v1226_v19 = vsel %vm756_vm2, %v1880_v18, 0.0 }
 0x374   : > { %1227 = vadd.xlane.f32.xlu1 %v1226_v19 }
 0x376   : > { %v1882_v20 = vpop.eup %1881 }
 0x377   : > { %v893_v21 = vmul.f32 %v1882_v20, %v888_v17  ;;  %v891_v22 = vpop.xlane.xlu1 %890  ;;  %vm898_vm11 = vweird.f32 %v1882_v20 }
 0x378   : > { %1883 = vrcp.f32 %v891_v22  ;;  %vm899_vm13 = vmor %vm897_vm12, %vm898_vm11  ;;  %v917_v37 = vand.u32 2147483648, %v891_v22  ;;  %v915_v39 = vand.u32 2147483647, %v891_v22  ;;  %vm911_vm2 = vweird.f32 %v891_v22 }
 0x379   : > { %v894_v23 = vsub.f32 1.0, %v893_v21 }
 0x37a   : > { %v918_v41 = vor.u32 1.1754944e-38, %v917_v37  ;;  %vm916_vm4 = vcmp.eq.f32.partialorder %v915_v39, 8.507059e+37 }
 0x37b   : > { %v895_v25 = vmul.f32 %v1882_v20, %v894_v23 }
 0x37d   : > { %v896_v27 = vadd.f32 %v1882_v20, %v895_v25 }
 0x37e   : > { %v1884_v28 = vpop.eup %1883 }
 0x37f   : > { %v900_v31 = vsel %vm899_vm13, %v1882_v20, %v896_v27  ;;  %v907_v32 = vmul.f32 %v1884_v28, %v891_v22  ;;  %vm912_vm15 = vweird.f32 %v1884_v28 }
 0x380   : > { %v905_v33 = vsel %vm902_vm14, %v904_v30, %v900_v31  ;;  %vm913_vm3 = vmor %vm911_vm2, %vm912_vm15 }
 0x381   : > { %v908_v34 = vsub.f32 1.0, %v907_v32  ;;  %v957_v36 = vmul.f32 %v951_v29, %v905_v33 }
 0x383   : > { %v909_v38 = vmul.f32 %v1884_v28, %v908_v34  ;;  %1685 = vmatmul.msk.f32.vlgmr.msra.gmra.mxu3 %vm720_vm1, %v957_v36 }
 0x385   : > { %v910_v40 = vadd.f32 %v1884_v28, %v909_v38 }
 0x387   : > { %v914_v43 = vsel %vm913_vm3, %v1884_v28, %v910_v40  ;;  %v1333_v40 = vld [vmem:[#allocation13 + $0x18] sm:$0xff] }
 0x388   : > { %v919_v45 = vsel %vm916_vm4, %v918_v41, %v914_v43  ;;  %1352 = vmatpush.msra.mxu3 %v1333_v40  ;;  %v1332_v41 = vld [vmem:[#allocation13 + $0x10] sm:$0xff]  ;;  %v1329_v43 = vld [vmem:[#allocation11 + $0x18] sm:$0xff] }
 0x389   : > { %v958_v46 = vmul.f32 %v954_v44, %v919_v45  ;;  %v1331_v44 = vld [vmem:[#allocation13 + $0x8] sm:$0xff]  ;;  %1375 = vmatpush.msra.mxu0 %v1329_v43  ;;  %v1328_v45 = vld [vmem:[#allocation11 + $0x10] sm:$0xff] }
 0x38a   : > { %1353 = vmatpush.msra.mxu3 %v1332_v41 }
 0x38b   : > { %1686 = vmatmul.msk.f32.gmra.mxu3 %vm720_vm1, %v958_v46  ;;  %1376 = vmatpush.msra.mxu0 %v1328_v45  ;;  %v1330_v46 = vld [vmem:[#allocation13] sm:$0xff] }
 0x38c   : > { %1354 = vmatpush.msra.mxu3 %v1331_v44 }
 0x38d   : > { %v1071_v48 = vpop.xlane.xlu2 %1070 }
 0x38e   : > { %1885 = vrcp.f32 %v1071_v48  ;;  %v1086_v60 = vand.u32 2147483648, %v1071_v48  ;;  %vm1080_vm6 = vweird.f32 %v1071_v48  ;;  %v1084_v35 = vand.u32 2147483647, %v1071_v48  ;;  %1355 = vmatpush.msra.mxu3 %v1330_v46 }
 0x390   : > { %v1087_v63 = vor.u32 1.1754944e-38, %v1086_v60  ;;  %vm1085_vm8 = vcmp.eq.f32.partialorder %v1084_v35, 8.507059e+37 }
 0x394   : > { %v1886_v50 = vpop.eup %1885 }
 0x395   : > { %v1076_v51 = vmul.f32 %v1886_v50, %v1071_v48  ;;  %vm1081_vm5 = vweird.f32 %v1886_v50  ;;  %v1327_v48 = vld [vmem:[#allocation11 + $0x8] sm:$0xff] }
 0x396   : > { %vm1082_vm7 = vmor %vm1080_vm6, %vm1081_vm5  ;;  %1377 = vmatpush.msra.mxu0 %v1327_v48 }
 0x397   : > { %v1077_v54 = vsub.f32 1.0, %v1076_v51 }
 0x398   : > { %1378 = vmatpush.msra.mxu0 %v1326_v49 }
 0x399   : > { %v1078_v55 = vmul.f32 %v1886_v50, %v1077_v54  ;;  %1707 = vmatmul.msk.f32.vlgmr.msra.gmra.mxu0 %vm611_vm0, %v2359_v10  ;;  %v1455_v10 = vld [vmem:[%s2563_s12 + $0x38] sm:$0xff] }
 0x39a   : > { %1474 = vmatpush.msra.mxu1 %v1455_v10 }
 0x39b   : > { %v1079_v59 = vadd.f32 %v1886_v50, %v1078_v55 }
 0x39d   : > { %v1083_v61 = vsel %vm1082_vm7, %v1886_v50, %v1079_v59 }
 0x39e   : > { %v1088_v0 = vsel %vm1085_vm8, %v1087_v63, %v1083_v61  ;;  %v1451_v61 = vld [vmem:[%s2563_s12 + $0x18] sm:$0xff]  ;;  %v1449_v63 = vld [vmem:[%s2563_s12 + $0x8] sm:$0xff] }
 0x3a1   : > { %1708 = vmatmul.msk.f32.gmra.mxu0 %vm611_vm0, %v2363_v11  ;;  %v1454_v11 = vld [vmem:[%s2563_s12 + $0x30] sm:$0xff] }
 0x3a2   : > { %1475 = vmatpush.msra.mxu1 %v1454_v11 }
 0x3cc   : > { %v1074_v53 = vpop.xlane.xlu1 %1073 }
 0x3cd   : > { %1887 = vrcp.f32 %v1074_v53  ;;  %v1100_v5 = vand.u32 2147483648, %v1074_v53  ;;  %vm1094_vm10 = vweird.f32 %v1074_v53  ;;  %v1098_v6 = vand.u32 2147483647, %v1074_v53 }
 0x3cf   : > { %v1101_v8 = vor.u32 1.1754944e-38, %v1100_v5  ;;  %vm1099_vm12 = vcmp.eq.f32.partialorder %v1098_v6, 8.507059e+37 }
 0x3d3   : > { %v1888_v56 = vpop.eup %1887 }
 0x3d4   : > { %v1090_v57 = vmul.f32 %v1888_v56, %v1074_v53  ;;  %vm1095_vm9 = vweird.f32 %v1888_v56 }
 0x3d5   : > { %vm1096_vm11 = vmor %vm1094_vm10, %vm1095_vm9 }
 0x3d6   : > { %v1091_v58 = vsub.f32 1.0, %v1090_v57 }
 0x3d8   : > { %v1092_v62 = vmul.f32 %v1888_v56, %v1091_v58 }
 0x3da   : > { %v1093_v3 = vadd.f32 %v1888_v56, %v1092_v62  ;;  %v1450_v62 = vld [vmem:[%s2563_s12 + $0x10] sm:$0xff] }
 0x3dc   : > { %v1097_v7 = vsel %vm1096_vm11, %v1888_v56, %v1093_v3 }
 0x3dd   : > { %v1132_v1 = vpop.f32.mrf.mxu2  ;;  %v1102_v9 = vsel %vm1099_vm12, %v1101_v8, %v1097_v7  ;;  %v2149_v8 = vmov 16.0  }
 0x3de   : > { %v1138_v2 = vmul.f32 %v1132_v1, %v1088_v0  ;;  %v1448_v0 = vld [vmem:[%s2563_s12] sm:$0xff] }
 0x3df   : > { %v1225_v4 = vpop.xlane.xlu0 %1224 }
 0x3e0   : > { %1889 = vrcp.f32 %v1225_v4  ;;  %1695 = vmatmul.msk.f32.vlgmr.msrb.gmra.mxu3 %vm720_vm1, %v1138_v2  ;;  %v1240_v18 = vand.u32 2147483648, %v1225_v4  ;;  %v1238_v20 = vand.u32 2147483647, %v1225_v4  ;;  %vm1234_vm14 = vweird.f32 %v1225_v4  ;;  %v1859_v2 = vld [vmem:[%s2562_s11] ss:$0 sm:$0xff] }
 0x3e2   : > { %v1241_v23 = vor.u32 1.1754944e-38, %v1240_v18  ;;  %vm1239_vm2 = vcmp.eq.f32.partialorder %v1238_v20, 8.507059e+37 }
 0x3e5   : > { %v1135_v12 = vpop.f32.mrf.mxu2 }
 0x3e6   : > { %v1890_v13 = vpop.eup %1889  ;;  %v1139_v14 = vmul.f32 %v1135_v12, %v1102_v9 }
 0x3e7   : > { %v1230_v15 = vmul.f32 %v1890_v13, %v1225_v4  ;;  %v1228_v16 = vpop.xlane.xlu1 %1227  ;;  %vm1235_vm13 = vweird.f32 %v1890_v13 }
 0x3e8   : > { %1891 = vrcp.f32 %v1228_v16  ;;  %1696 = vmatmul.msk.f32.gmra.mxu3 %vm720_vm1, %v1139_v14  ;;  %vm1236_vm15 = vmor %vm1234_vm14, %vm1235_vm13  ;;  %v1286_v24 = vpop.f32.mrf.mxu1  ;;  %v1254_v30 = vand.u32 2147483648, %v1228_v16  ;;  %v1252_v32 = vand.u32 2147483647, %v1228_v16  ;;  %vm1248_vm4 = vweird.f32 %v1228_v16 }
 0x3e9   : > { %v1231_v17 = vsub.f32 1.0, %v1230_v15  ;;  %1893 = vrcp.f32 %v2149_v8 }
 0x3ea   : > { %v1255_v34 = vor.u32 1.1754944e-38, %v1254_v30  ;;  %vm1253_vm6 = vcmp.eq.f32.partialorder %v1252_v32, 8.507059e+37 }
 0x3eb   : > { %v1232_v19 = vmul.f32 %v1890_v13, %v1231_v17 }
 0x3ed   : > { %v1233_v21 = vadd.f32 %v1890_v13, %v1232_v19 }
 0x3ee   : > { %v1892_v22 = vpop.eup %1891 }
 0x3ef   : > { %v1244_v25 = vmul.f32 %v1892_v22, %v1228_v16  ;;  %v1237_v26 = vsel %vm1236_vm15, %v1890_v13, %v1233_v21  ;;  %vm1249_vm3 = vweird.f32 %v1892_v22  ;;  %v1894_v13 = vpop.eup %1893 }
 0x3f0   : > { %v1242_v27 = vsel %vm1239_vm2, %v1241_v23, %v1237_v26  ;;  %vm1250_vm5 = vmor %vm1248_vm4, %vm1249_vm3  ;;  %v1289_v38 = vpop.f32.mrf.mxu1  ;;  %v1412_v14 = vmul.f32 16.0, %v1894_v13  ;;  %vm1416_vm7 = vweird.f32 %v1894_v13 }
 0x3f1   : > { %v1245_v28 = vsub.f32 1.0, %v1244_v25  ;;  %v1292_v29 = vmul.f32 %v1286_v24, %v1242_v27 }
 0x3f2   : > { %v1413_v19 = vsub.f32 1.0, %v1412_v14 }
 0x3f3   : > { %v1246_v31 = vmul.f32 %v1892_v22, %v1245_v28  ;;  %1703 = vmatmul.msk.f32.vlgmr.msra.gmra.mxu2 %vm720_vm1, %v1292_v29 }
 0x3f5   : > { %v1247_v33 = vadd.f32 %v1892_v22, %v1246_v31 }
 0x3f7   : > { %v1251_v36 = vsel %vm1250_vm5, %v1892_v22, %v1247_v33  ;;  %v1414_v22 = vmul.f32 %v1894_v13, %v1413_v19 }
 0x3f8   : > { %v1256_v37 = vsel %vm1253_vm6, %v1255_v34, %v1251_v36 }
 0x3f9   : > { %v1293_v39 = vmul.f32 %v1289_v38, %v1256_v37  ;;  %v1415_v25 = vadd.f32 %v1894_v13, %v1414_v22 }
 0x3fb   : > { %1704 = vmatmul.msk.f32.gmra.mxu2 %vm720_vm1, %v1293_v39  ;;  %vm1394_vm1 = vcmask 523264   ;;  %v1417_v28 = vsel %vm1416_vm7, %v1894_v13, %v1415_v25 }
 0x406   : > { %v983_v50 = vpop.f32.mrf.mxu3 }
 0x407   : > { %v1013_v53 = vadd.f32 %v2440_v42, %v983_v50  ;;  %v1453_v42 = vld [vmem:[%s2563_s12 + $0x28] sm:$0xff] }
 0x408   : > { %1476 = vmatpush.msra.mxu1 %v1453_v42 }
 0x40e   : > { %v986_v51 = vpop.f32.mrf.mxu3 }
 0x40f   : > { %v1016_v58 = vadd.f32 %v2442_v47, %v986_v51  ;;  %v1452_v47 = vld [vmem:[%s2563_s12 + $0x20] sm:$0xff] }
 0x410   : > { %1477 = vmatpush.msra.mxu1 %v1452_v47 }
 0x412   : > { %1478 = vmatpush.msra.mxu1 %v1451_v61 }
 0x414   : > { %1479 = vmatpush.msra.mxu1 %v1450_v62 }
 0x416   : > { %1480 = vmatpush.msra.mxu1 %v1449_v63  ;;  %v1380_v1 = vpop.f32.mrf.mxu0 }
 0x418   : > { %1481 = vmatpush.msra.mxu1 %v1448_v0 }
 0x41e   : > { %v1383_v6 = vpop.f32.mrf.mxu0 }
 0x463   : > { %v1164_v52 = vpop.f32.mrf.mxu3 }
 0x464   : > { %v1170_v54 = vadd.f32 %v1164_v52, %v1013_v53 }
 0x46b   : > { %v1167_v57 = vpop.f32.mrf.mxu3 }
 0x46c   : > { %v1171_v59 = vadd.f32 %v1167_v57, %v1016_v58 }
 0x476   : > { %v1318_v55 = vpop.f32.mrf.mxu2 }
 0x477   : > { %v1324_v56 = vadd.f32 %v1318_v55, %v1170_v54 }
 0x479   : > { %1705 = vmatmul.msk.f32.vlgmr.msra.gmra.mxu3 %vm611_vm0, %v1324_v56 }
 0x47e   : > { %v1321_v60 = vpop.f32.mrf.mxu2 }
 0x47f   : > { %v1325_v35 = vadd.f32 %v1321_v60, %v1171_v59  ;;  %v1860_v60 = vld [vmem:[%s2595_s21] ss:$0 sm:$0xff] }
 0x481   : > { %1706 = vmatmul.msk.f32.gmra.mxu3 %vm611_vm0, %v1325_v35 }
 0x4fc   : > { %v1357_v3 = vpop.f32.mrf.mxu3 }
 0x4fd   : > { %v1381_v4 = vadd.f32 %v1380_v1, %v1357_v3 }
 0x4ff   : > { %v1390_v5 = vadd.f32 %v1859_v2, %v1381_v4 }
 0x501   : > { %1395 = vst.msk [vmem:[#allocation4] sm:$0xff] %vm1394_vm1, %v1390_v5 }
 0x504   : > { %v1360_v7 = vpop.f32.mrf.mxu3 }
 0x505   : > { %v1384_v9 = vadd.f32 %v1383_v6, %v1360_v7 }
 0x507   : > { %v1391_v12 = vadd.f32 %v1859_v2, %v1384_v9 }
 0x508   : > { %v1400_v15 = vld [vmem:[#allocation4] sm:$0xff] }
 0x509   : > { %1396 = vst.msk [vmem:[#allocation4 + $0x8] sm:$0xff] %vm1394_vm1, %v1391_v12  ;;  %v1402_v17 = vsel %vm1394_vm1, %v1400_v15, 0.0 }
 0x510   : > { %v1401_v16 = vld [vmem:[#allocation4 + $0x8] sm:$0xff] }
 0x511   : > { %v1403_v18 = vsel %vm1394_vm1, %v1401_v16, 0.0 }
 0x512   : > { %v1404_v20 = vadd.f32 %v1403_v18, %v1402_v17 }
 0x514   : > { %v1405_v21 = vrot.slane %v1404_v20, 4 }
 0x516   : > { %v1406_v23 = vadd.f32 %v1405_v21, %v1404_v20 }
 0x518   : > { %v1407_v24 = vrot.slane %v1406_v23, 2 }
 0x51a   : > { %v1408_v26 = vadd.f32 %v1407_v24, %v1406_v23 }
 0x51c   : > { %v1409_v27 = vrot.slane %v1408_v26, 1 }
 0x51e   : > { %v1410_v29 = vadd.f32 %v1409_v27, %v1408_v26 }
 0x520   : > { %v1418_v30 = vmul.f32 %v1417_v28, %v1410_v29 }
 0x522   : > { %v1419_v31 = vsub.f32 %v1400_v15, %v1418_v30  ;;  %v1420_v32 = vsub.f32 %v1401_v16, %v1418_v30 }
 0x524   : > { %v1421_v33 = vmul.f32 %v1419_v31, %v1419_v31  ;;  %v1422_v34 = vmul.f32 %v1420_v32, %v1420_v32 }
 0x526   : > { %v1423_v36 = vsel %vm1394_vm1, %v1421_v33, 0.0  ;;  %v1424_v37 = vsel %vm1394_vm1, %v1422_v34, 0.0 }
 0x527   : > { %v1425_v38 = vadd.f32 %v1424_v37, %v1423_v36 }
 0x529   : > { %v1426_v39 = vrot.slane %v1425_v38, 4 }
 0x52b   : > { %v1427_v40 = vadd.f32 %v1426_v39, %v1425_v38 }
 0x52d   : > { %v1428_v41 = vrot.slane %v1427_v40, 2 }
 0x52f   : > { %v1429_v43 = vadd.f32 %v1428_v41, %v1427_v40 }
 0x531   : > { %v1430_v44 = vrot.slane %v1429_v43, 1 }
 0x533   : > { %v1431_v45 = vadd.f32 %v1430_v44, %v1429_v43 }
 0x535   : > { %v1432_v46 = vmul.f32 %v1431_v45, %v1417_v28 }
 0x537   : > { %v1433_v48 = vadd.f32 1e-05, %v1432_v46 }
 0x539   : > { %1895 = vrsqrt.f32 %v1433_v48  ;;  %vm1440_vm9 = vweird.f32 %v1433_v48 }
 0x53f   : > { %v1896_v49 = vpop.eup %1895 }
 0x540   : > { %v1435_v50 = vmul.f32 %v1896_v49, %v1433_v48  ;;  %vm1441_vm8 = vweird.f32 %v1896_v49 }
 0x541   : > { %vm1442_vm10 = vmor %vm1440_vm9, %vm1441_vm8 }
 0x542   : > { %v1436_v51 = vmul.f32 %v1896_v49, %v1435_v50 }
 0x544   : > { %v1437_v52 = vmul.f32 0.5, %v1436_v51 }
 0x546   : > { %v1438_v53 = vsub.f32 1.5, %v1437_v52 }
 0x548   : > { %v1439_v54 = vmul.f32 %v1896_v49, %v1438_v53 }
 0x54a   : > { %v1443_v55 = vsel %vm1442_vm10, %v1896_v49, %v1439_v54 }
 0x54b   : > { %v1444_v56 = vmul.f32 %v1443_v55, %v1419_v31  ;;  %v1445_v58 = vmul.f32 %v1443_v55, %v1420_v32 }
 0x54d   : > { %v1446_v57 = vmax.f32 %v1444_v56, 0.0  ;;  %v1447_v59 = vmax.f32 %v1445_v58, 0.0 }
 0x54f   : > { %1709 = vmatmul.msk.f32.vlgmr.msra.gmra.mxu1 %vm1394_vm1, %v1446_v57 }
 0x557   : > { %1710 = vmatmul.msk.f32.gmra.mxu1 %vm1394_vm1, %v1447_v59 }
 0x5cc   : > { %v1483_v35 = vpop.f32.mrf.mxu1 }
 0x5cd   : > { %v1484_v10 = vadd.f32 %v1860_v60, %v1483_v35 }
 0x5cf   : > { %1489 = vst.msk [vmem:[%s581_s14] sm:$0xff] %vm611_vm0, %v1484_v10 }
 0x5d4   : > { %v1486_v11 = vpop.f32.mrf.mxu1 }
 0x5d5   : > { %v1487_v42 = vadd.f32 %v1860_v60, %v1486_v11 }
 0x5d7   : > { %1490 = vst.msk [vmem:[%s581_s14 + $0x8] sm:$0xff] %vm611_vm0, %v1487_v42 }
 0x5d8   : > { %2074 = shalt.err (!%p2071_p9)
}
 0x5d9   : > { %s2150_s20 = smov 128   ;;  %s2151_s21 = smov 8  }
 0x5da   : > { %1747 = dma.vmem_to_hbm [thread:$0]  (%p2267_p4), %s1505_s13, 256, %s1507_s29, %s1492_s23, %s2150_s20, %s2150_s20, %s2151_s21  }
 0x5db PF: > { %s2598_s19 = sld [smem:[#allocation22_spill]] }
 0x5dc   : > { %s2599_s14 = sld [smem:[#allocation19_spill]] }
 0x5e1   : > { %p1779_p10 = scmp.ge.s32.totalorder %s2598_s19, 2 }
 0x5e2   : > { %s1521_s6 = sand.u32 1, %s2599_s14  }
 0x5e3   : > { %p1766_p11 = pnand %p1779_p10, %p2274_p8  ;;  %s1522_s9 = scalar_lea.sflag [#allocation7], %s1521_s6 }
 0x5e5   : > { %p1767_p12 = pneg %p1766_p11 }
 0x5e7   : > { %2112 = dma.done.wait (%p1767_p12), %s1522_s9, 256  }
 0x5e8   : > { %2114 = vsyncadd (%p1767_p12), %s1522_s9, 4294967040  ;;  %s30_s18 = sadd.s32 1, %s2598_s19   ;;  %s2601_s27 = sld [smem:[#allocation20_spill]] }
 0x5e9   : > { %p27_p13 = scmp.ge.s32.totalorder %s30_s18, 4   ;;  %s2602_s15 = sld [smem:[#allocation26_spill]] }
 0x5ea   : > { %s2603_s16 = sld [smem:[#allocation21_spill]]  ;;  %s2605_s29 = smov %s2121_s30 }
 0x5eb   : > { %s2604_s17 = sld [smem:[#allocation23_spill]]  ;;  %29 = sbr.rel (!%p27_p13) target bundleno = 12 (0xc), region = 144 }
 0x5ee   : > { %s2606_s30 = smov %s2601_s27 }
 0x5f0   :  { %1528 = vsyncpa [#allocation6], 1 }
 0x5f1   :  { %1530 = vsyncpa [#allocation6 + $0x1], 1 }
 0x5f2   :  { %1531 = vsyncpa [#allocation9], 1 }
 0x5f3   :  { %1532 = vsyncpa [#allocation12], 1 }
 0x5f4   :  { %1533 = vsyncpa [#allocation7], 1 }
 0x5f5   :  { %1535 = vsyncpa [#allocation7 + $0x1], 1 }

</bundles_post_ra>
